<compile_context>
chip_gen: v6e
topology: v6e:2x2x1
jax: 0.10.0
libtpu: 0.0.40
codegen_flags: <defaults>
</compile_context>

<pallas_src>
import functools

import jax
import jax.numpy as jnp
import numpy as np
from jax.experimental import pallas as pl
from jax.experimental.pallas import tpu as pltpu


def _round_up(x, m):
    return (x + m - 1) // m * m


def _tpu_vmem_capacity_bytes():
    try:
        return int(pltpu.get_tpu_info().vmem_capacity_bytes)
    except Exception:
        return 64 * 1024 * 1024          # conservative (v7x-sized) fallback


# ---------------------------------------------------------------------------
# kernels
# ---------------------------------------------------------------------------

def _conv_taps(y, mask_ref, w_ref, *, K, pad, Cp):
    """sum_k W_k @ (shift_s(y) * mask_s),  s = k - pad.

    One MXU matmul per tap, accumulated in f32 (no concatenated im2col slab).
    `y` is the full-Cin (Cp, TN) f32 tile.  The tap mask zeroes exactly the
    contributions PyTorch's zero 'same' padding would zero (sequence edges and
    the Lp padding tail), so conv output is exactly 0 on invalid lanes (keeps
    BN stats exact) and tile-edge roll wraparound never leaks across batch
    elements.
    """
    tn = y.shape[1]
    acc = None
    for k in range(K):                               # K small & static -> unrolled
        s = k - pad
        t = y if s == 0 else pltpu.roll(y, shift=(-s) % tn, axis=1)
        # f32 mask-multiply (v5e-friendly VPU path), cast tap to bf16 only for
        # the MXU operand.
        # TODO(synk): for very long sequences add intra-sequence lane tiling
        # with (K-1)-lane halo'd slices and drop pltpu.roll (vrot shares the
        # vector-extended slots with vmatmul push).
        t = (t * mask_ref[k:k + 1, :]).astype(jnp.bfloat16)
        w_k = w_ref[:, k * Cp:(k + 1) * Cp]          # (TCO, Cp) bf16, static slice
        p = jnp.dot(w_k, t, preferred_element_type=jnp.float32)
        acc = p if acc is None else acc + p
    return acc


def _conv_stats_kernel(x_ref, mask_ref, w_ref, h_ref, s_ref, q_ref, *, K, pad, Cp):
    """pass 1: h = conv1(x); accumulate per-channel sum / sum-of-squares."""
    h = _conv_taps(x_ref[...], mask_ref, w_ref, K=K, pad=pad, Cp=Cp)
    h_ref[...] = h

    @pl.when(pl.program_id(1) == 0)                  # first lane tile of this Cout tile
    def _():
        s_ref[...] = jnp.zeros_like(s_ref)
        q_ref[...] = jnp.zeros_like(q_ref)

    # stats outputs have a lane-tile-invariant index_map -> grid-resident
    # accumulators (written back to HBM once per Cout tile).
    s_ref[...] += jnp.sum(h, axis=1, keepdims=True)
    q_ref[...] += jnp.sum(h * h, axis=1, keepdims=True)


def _bn_relu_conv_stats_kernel(h_ref, a_ref, b_ref, mask_ref, w_ref,
                               o_ref, s_ref, q_ref, *, K, pad, Cp):
    """pass 2: y = relu(h*a + b); o = conv2(y); accumulate sum / sumsq of o."""
    y = jnp.maximum(h_ref[...] * a_ref[...] + b_ref[...], 0.0)   # f32 elementwise
    h2 = _conv_taps(y, mask_ref, w_ref, K=K, pad=pad, Cp=Cp)
    o_ref[...] = h2

    @pl.when(pl.program_id(1) == 0)
    def _():
        s_ref[...] = jnp.zeros_like(s_ref)
        q_ref[...] = jnp.zeros_like(q_ref)

    s_ref[...] += jnp.sum(h2, axis=1, keepdims=True)
    q_ref[...] += jnp.sum(h2 * h2, axis=1, keepdims=True)


def _bn_residual_relu_kernel(h_ref, x_ref, a_ref, b_ref, o_ref):
    """pass 3: out = relu(h*a + b + x)   (downsample=None -> identity residual)."""
    o_ref[...] = jnp.maximum(h_ref[...] * a_ref[...] + b_ref[...] + x_ref[...], 0.0)


# ---------------------------------------------------------------------------
# wrapper
# ---------------------------------------------------------------------------

def residual_block(x, w1, b1, g1, be1, w2, b2, g2, be2, *, eps=1e-5):
    """Forward of ResidualBlock (training-mode BatchNorm, stride=1, no downsample).

    x: (B, C, L) f32.  w1/w2: (C, C, K) in PyTorch Conv1d layout.
    b1/b2 are accepted for API parity with nn.Conv1d but intentionally unused:
    a per-channel constant bias is exactly removed by the batch-statistics
    BatchNorm that follows each conv.
    """
    del b1, b2
    B, C, L = x.shape
    Cout, Cin, K = w1.shape
    assert (Cout, Cin) == (C, C), "identity residual needs in_channels == out_channels"
    pad = (K - 1) // 2

    Cp = _round_up(C, 128)               # channel padding: MXU / lane aligned
    TCO = 128                            # Cout tile = the "parallel" grid axis
    n_co = Cp // TCO
    Lp = _round_up(L, 128)               # per-sequence lane padding
    Np = B * Lp

    # Lane-tile size: whole padded sequences per tile, target >= 512 lanes
    # (roofline knee), halved budget on 64 MiB-VMEM chips (v7x).
    vmem_cap = _tpu_vmem_capacity_bytes()
    lane_target = 512 if vmem_cap <= (64 << 20) else 1024
    n_seq = min(max(1, lane_target // Lp), B)
    while B % n_seq:
        n_seq -= 1
    if n_seq > 1 and B // n_seq < 2:     # keep >=2 lane tiles so the cross-tile
        n_seq //= 2                      # BN accumulation / pipeline path runs
        while B % n_seq:
            n_seq -= 1
    TN = n_seq * Lp
    n_tiles = Np // TN

    # ---------------- wrapper-side layout plumbing ----------------
    x2 = jnp.transpose(x, (1, 0, 2))                                  # (C, B, L)
    x2 = jnp.pad(x2, ((0, Cp - C), (0, 0), (0, Lp - L))).reshape(Cp, Np)

    def pack_w(w):
        # (Cout, Cin, K) -> (Cp, K*Cp) bf16; column block k holds tap k's Cin.
        wp = jnp.pad(w, ((0, Cp - C), (0, Cp - C), (0, 0)))
        return jnp.transpose(wp, (0, 2, 1)).reshape(Cp, K * Cp).astype(jnp.bfloat16)

    def pack_c(v):                                                    # (C,) -> (Cp,1) f32
        return jnp.pad(v.astype(jnp.float32).reshape(C, 1), ((0, Cp - C), (0, 0)))

    # Static tap-validity masks, identical for every lane tile: tap s = k - pad
    # at in-tile position p (sequence offset l = p % Lp) is valid iff
    # l < L and 0 <= l + s < L.  Rows padded to a sublane multiple.
    Kr = _round_up(K, 8)
    l_idx = np.arange(TN) % Lp
    tap_mask = np.zeros((Kr, TN), np.float32)
    for k in range(K):
        s = k - pad
        tap_mask[k] = (l_idx < L) & (l_idx + s >= 0) & (l_idx + s < L)
    tap_mask = jnp.asarray(tap_mask)

    # ---------------- specs shared by pass 1 / pass 2 ----------------
    grid = (n_co, n_tiles)
    act_spec = pl.BlockSpec((Cp, TN), lambda co, i: (0, i))       # full-Cin activations
    mask_spec = pl.BlockSpec((Kr, TN), lambda co, i: (0, 0))      # tile-invariant
    w_spec = pl.BlockSpec((TCO, K * Cp), lambda co, i: (co, 0))   # resident per Cout tile
    chan_in_spec = pl.BlockSpec((Cp, 1), lambda co, i: (0, 0))    # bn affine (full Cin)
    h_spec = pl.BlockSpec((TCO, TN), lambda co, i: (co, i))
    stat_spec = pl.BlockSpec((TCO, 1), lambda co, i: (co, 0))     # grid-resident accum

    vmem_limit = max(32 << 20, int(vmem_cap * 0.85))
    cparams = pltpu.CompilerParams(
        dimension_semantics=("parallel", "arbitrary"),
        vmem_limit_bytes=vmem_limit)

    act_shape = jax.ShapeDtypeStruct((Cp, Np), jnp.float32)
    stat_shape = jax.ShapeDtypeStruct((Cp, 1), jnp.float32)

    n_valid = float(B * L)               # true per-channel element count
    def bn_affine(ssum, sqsum, gamma, beta):
        mean = ssum / n_valid
        var = sqsum / n_valid - mean * mean           # biased, training-mode BN
        a = gamma * jax.lax.rsqrt(var + eps)
        return a, beta - mean * a

    # ---------------- pass 1: conv1 + stats ----------------
    h1, s1, q1 = pl.pallas_call(
        functools.partial(_conv_stats_kernel, K=K, pad=pad, Cp=Cp),
        grid=grid,
        in_specs=[act_spec, mask_spec, w_spec],
        out_specs=[h_spec, stat_spec, stat_spec],
        out_shape=(act_shape, stat_shape, stat_shape),
        compiler_params=cparams,
    )(x2, tap_mask, pack_w(w1))
    a1, c1 = bn_affine(s1, q1, pack_c(g1), pack_c(be1))

    # ---------------- pass 2: bn1 + relu + conv2 + stats ----------------
    h2, s2, q2 = pl.pallas_call(
        functools.partial(_bn_relu_conv_stats_kernel, K=K, pad=pad, Cp=Cp),
        grid=grid,
        in_specs=[act_spec, chan_in_spec, chan_in_spec, mask_spec, w_spec],
        out_specs=[h_spec, stat_spec, stat_spec],
        out_shape=(act_shape, stat_shape, stat_shape),
        compiler_params=cparams,
    )(h1, a1, c1, tap_mask, pack_w(w2))
    a2, c2 = bn_affine(s2, q2, pack_c(g2), pack_c(be2))

    # ---------------- pass 3: bn2 + residual + relu ----------------
    tile_spec = pl.BlockSpec((Cp, TN), lambda i: (0, i))
    chan_spec = pl.BlockSpec((Cp, 1), lambda i: (0, 0))
    out2 = pl.pallas_call(
        _bn_residual_relu_kernel,
        grid=(n_tiles,),
        in_specs=[tile_spec, tile_spec, chan_spec, chan_spec],
        out_specs=tile_spec,
        out_shape=act_shape,
        compiler_params=pltpu.CompilerParams(
            dimension_semantics=("parallel",),
            vmem_limit_bytes=vmem_limit),
    )(h2, x2, a2, c2)

    # Undo the layout plumbing: (Cp, Np) -> (B, C, L).
    return jnp.transpose(out2.reshape(Cp, B, Lp)[:C, :, :L], (1, 0, 2))


# ---------------------------------------------------------------------------
# params / reference / test
# ---------------------------------------------------------------------------

def init_params(key, channels, kernel_size):
    # PyTorch Conv1d default init: U(-1/sqrt(fan_in), 1/sqrt(fan_in)).
    fan_in = channels * kernel_size
    bound = 1.0 / float(np.sqrt(fan_in))
    k1, k2, k3, k4 = jax.random.split(key, 4)
    w1 = jax.random.uniform(k1, (channels, channels, kernel_size), jnp.float32, -bound, bound)
    b1 = jax.random.uniform(k2, (channels,), jnp.float32, -bound, bound)
    w2 = jax.random.uniform(k3, (channels, channels, kernel_size), jnp.float32, -bound, bound)
    b2 = jax.random.uniform(k4, (channels,), jnp.float32, -bound, bound)
    g1 = jnp.ones((channels,), jnp.float32)
    be1 = jnp.zeros((channels,), jnp.float32)
    g2 = jnp.ones((channels,), jnp.float32)
    be2 = jnp.zeros((channels,), jnp.float32)
    return w1, b1, g1, be1, w2, b2, g2, be2


def _reference(x, w1, b1, g1, be1, w2, b2, g2, be2, *, eps=1e-5):
    """Pure-JAX ResidualBlock forward (training-mode BN) for validation.
    Conv operands are cast to bf16 (f32 accumulation) to mirror the kernel's
    MXU precision; all other math (incl. conv bias, which the kernel drops
    because batch-stat BN cancels it exactly) stays in f32."""
    pad = (w1.shape[-1] - 1) // 2

    def conv(y, w, b):
        out = jax.lax.conv_general_dilated(
            y.astype(jnp.bfloat16), w.astype(jnp.bfloat16),
            window_strides=(1,), padding=[(pad, pad)],
            dimension_numbers=("NCH", "OIH", "NCH"),
            preferred_element_type=jnp.float32)
        return out + b[None, :, None]

    def bn(y, gamma, beta):
        mean = jnp.mean(y, axis=(0, 2), keepdims=True)
        var = jnp.mean(jnp.square(y - mean), axis=(0, 2), keepdims=True)
        return ((y - mean) * jax.lax.rsqrt(var + eps)
                * gamma[None, :, None] + beta[None, :, None])

    h = jax.nn.relu(bn(conv(x, w1, b1), g1, be1))
    h = bn(conv(h, w2, b2), g2, be2)
    return jax.nn.relu(h + x)


if __name__ == "__main__":
    B, C, L, K = 2, 4, 16, 3     # in_channels == out_channels, stride=1, downsample=None
    key = jax.random.PRNGKey(0)
    kx, kp = jax.random.split(key)
    x = jax.random.normal(kx, (B, C, L), jnp.float32)
    params = init_params(kp, C, K)

    out = jax.jit(residual_block)(x, *params)
    out = jax.block_until_ready(out)
    assert out.shape == (B, C, L)
    assert bool(jnp.all(jnp.isfinite(out)))

    ref = _reference(x, *params)
    err = float(jnp.max(jnp.abs(out - ref)))
    assert err < 2e-2, f"kernel/reference mismatch: max abs err = {err}"
    print("KERNEL_OK")
</pallas_src>

<mosaic_0001>
module attributes {stable_mosaic.version = 11 : i64} {
  func.func @_bn_residual_relu_kernel(%arg0: i32, %arg1: memref<128x128xf32, #tpu.memory_space<vmem>>, %arg2: memref<128x128xf32, #tpu.memory_space<vmem>>, %arg3: memref<128x1xf32, #tpu.memory_space<vmem>>, %arg4: memref<128x1xf32, #tpu.memory_space<vmem>>, %arg5: memref<128x128xf32, #tpu.memory_space<vmem>>) attributes {dimension_semantics = [#tpu.dimension_semantics<parallel>], iteration_bounds = array<i64: 2>, scalar_prefetch = 0 : i64, scratch_operands = 0 : i64, tpu.core_type = #tpu.core_type<tc>, window_params = [{transform_indices = @transform_0, window_bounds = array<i64: 128, 128>}, {transform_indices = @transform_1, window_bounds = array<i64: 128, 128>}, {pipeline_mode = #tpu.pipeline_mode<synchronous>, transform_indices = @transform_2, window_bounds = array<i64: 128, 1>}, {pipeline_mode = #tpu.pipeline_mode<synchronous>, transform_indices = @transform_3, window_bounds = array<i64: 128, 1>}, {transform_indices = @transform_4, window_bounds = array<i64: 128, 128>}]} {
    %c0 = arith.constant 0 : index
    %c0_0 = arith.constant 0 : index
    %0 = vector.load %arg1[%c0, %c0_0] : memref<128x128xf32, #tpu.memory_space<vmem>>, vector<128x128xf32>
    %c0_1 = arith.constant 0 : index
    %c0_2 = arith.constant 0 : index
    %1 = vector.load %arg3[%c0_1, %c0_2] : memref<128x1xf32, #tpu.memory_space<vmem>>, vector<128x1xf32>
    %2 = vector.broadcast %1 : vector<128x1xf32> to vector<128x128xf32>
    %3 = arith.mulf %0, %2 : vector<128x128xf32>
    %c0_3 = arith.constant 0 : index
    %c0_4 = arith.constant 0 : index
    %4 = vector.load %arg4[%c0_3, %c0_4] : memref<128x1xf32, #tpu.memory_space<vmem>>, vector<128x1xf32>
    %5 = vector.broadcast %4 : vector<128x1xf32> to vector<128x128xf32>
    %6 = arith.addf %3, %5 : vector<128x128xf32>
    %c0_5 = arith.constant 0 : index
    %c0_6 = arith.constant 0 : index
    %7 = vector.load %arg2[%c0_5, %c0_6] : memref<128x128xf32, #tpu.memory_space<vmem>>, vector<128x128xf32>
    %8 = arith.addf %6, %7 : vector<128x128xf32>
    %cst = arith.constant 0.000000e+00 : f32
    %9 = vector.broadcast %cst : f32 to vector<128x128xf32>
    %10 = arith.maximumf %8, %9 : vector<128x128xf32>
    %c0_7 = arith.constant 0 : index
    %c0_8 = arith.constant 0 : index
    %11 = vector.load %arg5[%c0_7, %c0_8] : memref<128x128xf32, #tpu.memory_space<vmem>>, vector<128x128xf32>
    tpu.vector_store %arg5[%c0_7, %c0_8], %10 {strides = array<i32>} : memref<128x128xf32, #tpu.memory_space<vmem>>, vector<128x128xf32>,
    return
  }
  func.func @transform_0(%arg0: i32) -> (i32, i32) {
    %c0_i32 = arith.constant 0 : i32
    %c0_i32_0 = arith.constant 0 : i32
    return %c0_i32, %arg0 : i32, i32
  }
  func.func @transform_1(%arg0: i32) -> (i32, i32) {
    %c0_i32 = arith.constant 0 : i32
    %c0_i32_0 = arith.constant 0 : i32
    return %c0_i32, %arg0 : i32, i32
  }
  func.func @transform_2(%arg0: i32) -> (i32, i32) {
    %c0_i32 = arith.constant 0 : i32
    %c0_i32_0 = arith.constant 0 : i32
    %c0_i32_1 = arith.constant 0 : i32
    return %c0_i32, %c0_i32_0 : i32, i32
  }
  func.func @transform_3(%arg0: i32) -> (i32, i32) {
    %c0_i32 = arith.constant 0 : i32
    %c0_i32_0 = arith.constant 0 : i32
    %c0_i32_1 = arith.constant 0 : i32
    return %c0_i32, %c0_i32_0 : i32, i32
  }
  func.func @transform_4(%arg0: i32) -> (i32, i32) {
    %c0_i32 = arith.constant 0 : i32
    %c0_i32_0 = arith.constant 0 : i32
    return %c0_i32, %arg0 : i32, i32
  }
}

module attributes {stable_mosaic.version = 11 : i64} {
  func.func @_conv_stats_kernel(%arg0: i32, %arg1: i32, %arg2: memref<128x128xf32, #tpu.memory_space<vmem>>, %arg3: memref<8x128xf32, #tpu.memory_space<vmem>>, %arg4: memref<128x384xbf16, #tpu.memory_space<vmem>>, %arg5: memref<128x128xf32, #tpu.memory_space<vmem>>, %arg6: memref<128x1xf32, #tpu.memory_space<vmem>>, %arg7: memref<128x1xf32, #tpu.memory_space<vmem>>) attributes {dimension_semantics = [#tpu.dimension_semantics<parallel>, #tpu.dimension_semantics<arbitrary>], iteration_bounds = array<i64: 1, 2>, scalar_prefetch = 0 : i64, scratch_operands = 0 : i64, tpu.core_type = #tpu.core_type<tc>, window_params = [{transform_indices = @transform_0, window_bounds = array<i64: 128, 128>}, {pipeline_mode = #tpu.pipeline_mode<synchronous>, transform_indices = @transform_1, window_bounds = array<i64: 8, 128>}, {transform_indices = @transform_2, window_bounds = array<i64: 128, 384>}, {transform_indices = @transform_3, window_bounds = array<i64: 128, 128>}, {transform_indices = @transform_4, window_bounds = array<i64: 128, 1>}, {transform_indices = @transform_5, window_bounds = array<i64: 128, 1>}]} {
    %c0 = arith.constant 0 : index
    %c0_0 = arith.constant 0 : index
    %0 = vector.load %arg2[%c0, %c0_0] : memref<128x128xf32, #tpu.memory_space<vmem>>, vector<128x128xf32>
    %c1_i32 = arith.constant 1 : i32
    %1 = tpu.dynamic_rotate %0 by %c1_i32 dim 1 : vector<128x128xf32>, i32 -> vector<128x128xf32>
    %c0_1 = arith.constant 0 : index
    %c0_2 = arith.constant 0 : index
    %2 = vector.load %arg3[%c0_1, %c0_2] : memref<8x128xf32, #tpu.memory_space<vmem>>, vector<1x128xf32>
    %3 = vector.broadcast %2 : vector<1x128xf32> to vector<128x128xf32>
    %4 = arith.mulf %1, %3 : vector<128x128xf32>
    %5 = arith.truncf %4 : vector<128x128xf32> to vector<128x128xbf16>
    %c0_3 = arith.constant 0 : index
    %c0_4 = arith.constant 0 : index
    %6 = vector.load %arg4[%c0_3, %c0_4] : memref<128x384xbf16, #tpu.memory_space<vmem>>, vector<128x128xbf16>
    %cst = arith.constant dense<0.000000e+00> : vector<128x128xf32>
    %7 = tpu.matmul %6, %5, %cst {dimension_numbers = #tpu.dot_dimension_numbers<[1], [0], [0], [1], [0, 0, 1, 1], [], []>} : vector<128x128xbf16>, vector<128x128xbf16>, vector<128x128xf32> -> vector<128x128xf32>
    %c1 = arith.constant 1 : index
    %c0_5 = arith.constant 0 : index
    %8 = vector.load %arg3[%c1, %c0_5] : memref<8x128xf32, #tpu.memory_space<vmem>>, vector<1x128xf32>
    %9 = vector.broadcast %8 : vector<1x128xf32> to vector<128x128xf32>
    %10 = arith.mulf %0, %9 : vector<128x128xf32>
    %11 = arith.truncf %10 : vector<128x128xf32> to vector<128x128xbf16>
    %c0_6 = arith.constant 0 : index
    %c128 = arith.constant 128 : index
    %12 = vector.load %arg4[%c0_6, %c128] : memref<128x384xbf16, #tpu.memory_space<vmem>>, vector<128x128xbf16>
    %cst_7 = arith.constant dense<0.000000e+00> : vector<128x128xf32>
    %13 = tpu.matmul %12, %11, %cst_7 {dimension_numbers = #tpu.dot_dimension_numbers<[1], [0], [0], [1], [0, 0, 1, 1], [], []>} : vector<128x128xbf16>, vector<128x128xbf16>, vector<128x128xf32> -> vector<128x128xf32>
    %14 = arith.addf %7, %13 : vector<128x128xf32>
    %c127_i32 = arith.constant 127 : i32
    %15 = tpu.dynamic_rotate %0 by %c127_i32 dim 1 : vector<128x128xf32>, i32 -> vector<128x128xf32>
    %c2 = arith.constant 2 : index
    %c0_8 = arith.constant 0 : index
    %16 = vector.load %arg3[%c2, %c0_8] : memref<8x128xf32, #tpu.memory_space<vmem>>, vector<1x128xf32>
    %17 = vector.broadcast %16 : vector<1x128xf32> to vector<128x128xf32>
    %18 = arith.mulf %15, %17 : vector<128x128xf32>
    %19 = arith.truncf %18 : vector<128x128xf32> to vector<128x128xbf16>
    %c0_9 = arith.constant 0 : index
    %c256 = arith.constant 256 : index
    %20 = vector.load %arg4[%c0_9, %c256] : memref<128x384xbf16, #tpu.memory_space<vmem>>, vector<128x128xbf16>
    %cst_10 = arith.constant dense<0.000000e+00> : vector<128x128xf32>
    %21 = tpu.matmul %20, %19, %cst_10 {dimension_numbers = #tpu.dot_dimension_numbers<[1], [0], [0], [1], [0, 0, 1, 1], [], []>} : vector<128x128xbf16>, vector<128x128xbf16>, vector<128x128xf32> -> vector<128x128xf32>
    %22 = arith.addf %14, %21 : vector<128x128xf32>
    %c0_11 = arith.constant 0 : index
    %c0_12 = arith.constant 0 : index
    %23 = vector.load %arg5[%c0_11, %c0_12] : memref<128x128xf32, #tpu.memory_space<vmem>>, vector<128x128xf32>
    tpu.vector_store %arg5[%c0_11, %c0_12], %22 {strides = array<i32>} : memref<128x128xf32, #tpu.memory_space<vmem>>, vector<128x128xf32>,
    %c0_i32 = arith.constant 0 : i32
    %24 = arith.cmpi eq, %arg1, %c0_i32 : i32
    %25 = arith.extui %24 : i1 to i32
    %c0_i32_13 = arith.constant 0 : i32
    %26 = arith.cmpi ne, %25, %c0_i32_13 : i32
    scf.if %26 {
      %cst_24 = arith.constant 0.000000e+00 : f32
      %38 = vector.broadcast %cst_24 : f32 to vector<128x1xf32>
      %c0_25 = arith.constant 0 : index
      %c0_26 = arith.constant 0 : index
      %39 = vector.load %arg6[%c0_25, %c0_26] : memref<128x1xf32, #tpu.memory_space<vmem>>, vector<128x1xf32>
      tpu.vector_store %arg6[%c0_25, %c0_26], %38 {strides = array<i32>} : memref<128x1xf32, #tpu.memory_space<vmem>>, vector<128x1xf32>,
      %cst_27 = arith.constant 0.000000e+00 : f32
      %40 = vector.broadcast %cst_27 : f32 to vector<128x1xf32>
      %c0_28 = arith.constant 0 : index
      %c0_29 = arith.constant 0 : index
      %41 = vector.load %arg7[%c0_28, %c0_29] : memref<128x1xf32, #tpu.memory_space<vmem>>, vector<128x1xf32>
      tpu.vector_store %arg7[%c0_28, %c0_29], %40 {strides = array<i32>} : memref<128x1xf32, #tpu.memory_space<vmem>>, vector<128x1xf32>,
    } else {
    }
    %c0_14 = arith.constant 0 : index
    %c0_15 = arith.constant 0 : index
    %27 = vector.load %arg6[%c0_14, %c0_15] : memref<128x1xf32, #tpu.memory_space<vmem>>, vector<128x1xf32>
    %cst_16 = arith.constant dense<0.000000e+00> : vector<128xf32>
    %28 = vector.multi_reduction <add>, %22, %cst_16 [1] : vector<128x128xf32> to vector<128xf32>
    %29 = vector.shape_cast %28 : vector<128xf32> to vector<128x1xf32>
    %30 = arith.addf %27, %29 : vector<128x1xf32>
    %c0_17 = arith.constant 0 : index
    %c0_18 = arith.constant 0 : index
    %31 = vector.load %arg6[%c0_17, %c0_18] : memref<128x1xf32, #tpu.memory_space<vmem>>, vector<128x1xf32>
    tpu.vector_store %arg6[%c0_17, %c0_18], %30 {strides = array<i32>} : memref<128x1xf32, #tpu.memory_space<vmem>>, vector<128x1xf32>,
    %c0_19 = arith.constant 0 : index
    %c0_20 = arith.constant 0 : index
    %32 = vector.load %arg7[%c0_19, %c0_20] : memref<128x1xf32, #tpu.memory_space<vmem>>, vector<128x1xf32>
    %33 = arith.mulf %22, %22 : vector<128x128xf32>
    %cst_21 = arith.constant dense<0.000000e+00> : vector<128xf32>
    %34 = vector.multi_reduction <add>, %33, %cst_21 [1] : vector<128x128xf32> to vector<128xf32>
    %35 = vector.shape_cast %34 : vector<128xf32> to vector<128x1xf32>
    %36 = arith.addf %32, %35 : vector<128x1xf32>
    %c0_22 = arith.constant 0 : index
    %c0_23 = arith.constant 0 : index
    %37 = vector.load %arg7[%c0_22, %c0_23] : memref<128x1xf32, #tpu.memory_space<vmem>>, vector<128x1xf32>
    tpu.vector_store %arg7[%c0_22, %c0_23], %36 {strides = array<i32>} : memref<128x1xf32, #tpu.memory_space<vmem>>, vector<128x1xf32>,
    return
  }
  func.func @transform_0(%arg0: i32, %arg1: i32) -> (i32, i32) {
    %c0_i32 = arith.constant 0 : i32
    %c0_i32_0 = arith.constant 0 : i32
    return %c0_i32, %arg1 : i32, i32
  }
  func.func @transform_1(%arg0: i32, %arg1: i32) -> (i32, i32) {
    %c0_i32 = arith.constant 0 : i32
    %c0_i32_0 = arith.constant 0 : i32
    %c0_i32_1 = arith.constant 0 : i32
    return %c0_i32, %c0_i32_0 : i32, i32
  }
  func.func @transform_2(%arg0: i32, %arg1: i32) -> (i32, i32) {
    %c0_i32 = arith.constant 0 : i32
    %c0_i32_0 = arith.constant 0 : i32
    return %arg0, %c0_i32 : i32, i32
  }
  func.func @transform_3(%arg0: i32, %arg1: i32) -> (i32, i32) {
    %c0_i32 = arith.constant 0 : i32
    return %arg0, %arg1 : i32, i32
  }
  func.func @transform_4(%arg0: i32, %arg1: i32) -> (i32, i32) {
    %c0_i32 = arith.constant 0 : i32
    %c0_i32_0 = arith.constant 0 : i32
    return %arg0, %c0_i32 : i32, i32
  }
  func.func @transform_5(%arg0: i32, %arg1: i32) -> (i32, i32) {
    %c0_i32 = arith.constant 0 : i32
    %c0_i32_0 = arith.constant 0 : i32
    return %arg0, %c0_i32 : i32, i32
  }
}

module attributes {stable_mosaic.version = 11 : i64} {
  func.func @_bn_relu_conv_stats_kernel(%arg0: i32, %arg1: i32, %arg2: memref<128x128xf32, #tpu.memory_space<vmem>>, %arg3: memref<128x1xf32, #tpu.memory_space<vmem>>, %arg4: memref<128x1xf32, #tpu.memory_space<vmem>>, %arg5: memref<8x128xf32, #tpu.memory_space<vmem>>, %arg6: memref<128x384xbf16, #tpu.memory_space<vmem>>, %arg7: memref<128x128xf32, #tpu.memory_space<vmem>>, %arg8: memref<128x1xf32, #tpu.memory_space<vmem>>, %arg9: memref<128x1xf32, #tpu.memory_space<vmem>>) attributes {dimension_semantics = [#tpu.dimension_semantics<parallel>, #tpu.dimension_semantics<arbitrary>], iteration_bounds = array<i64: 1, 2>, scalar_prefetch = 0 : i64, scratch_operands = 0 : i64, tpu.core_type = #tpu.core_type<tc>, window_params = [{transform_indices = @transform_0, window_bounds = array<i64: 128, 128>}, {pipeline_mode = #tpu.pipeline_mode<synchronous>, transform_indices = @transform_1, window_bounds = array<i64: 128, 1>}, {pipeline_mode = #tpu.pipeline_mode<synchronous>, transform_indices = @transform_2, window_bounds = array<i64: 128, 1>}, {pipeline_mode = #tpu.pipeline_mode<synchronous>, transform_indices = @transform_3, window_bounds = array<i64: 8, 128>}, {transform_indices = @transform_4, window_bounds = array<i64: 128, 384>}, {transform_indices = @transform_5, window_bounds = array<i64: 128, 128>}, {transform_indices = @transform_6, window_bounds = array<i64: 128, 1>}, {transform_indices = @transform_7, window_bounds = array<i64: 128, 1>}]} {
    %c0 = arith.constant 0 : index
    %c0_0 = arith.constant 0 : index
    %0 = vector.load %arg2[%c0, %c0_0] : memref<128x128xf32, #tpu.memory_space<vmem>>, vector<128x128xf32>
    %c0_1 = arith.constant 0 : index
    %c0_2 = arith.constant 0 : index
    %1 = vector.load %arg3[%c0_1, %c0_2] : memref<128x1xf32, #tpu.memory_space<vmem>>, vector<128x1xf32>
    %2 = vector.broadcast %1 : vector<128x1xf32> to vector<128x128xf32>
    %3 = arith.mulf %0, %2 : vector<128x128xf32>
    %c0_3 = arith.constant 0 : index
    %c0_4 = arith.constant 0 : index
    %4 = vector.load %arg4[%c0_3, %c0_4] : memref<128x1xf32, #tpu.memory_space<vmem>>, vector<128x1xf32>
    %5 = vector.broadcast %4 : vector<128x1xf32> to vector<128x128xf32>
    %6 = arith.addf %3, %5 : vector<128x128xf32>
    %cst = arith.constant 0.000000e+00 : f32
    %7 = vector.broadcast %cst : f32 to vector<128x128xf32>
    %8 = arith.maximumf %6, %7 : vector<128x128xf32>
    %c1_i32 = arith.constant 1 : i32
    %9 = tpu.dynamic_rotate %8 by %c1_i32 dim 1 : vector<128x128xf32>, i32 -> vector<128x128xf32>
    %c0_5 = arith.constant 0 : index
    %c0_6 = arith.constant 0 : index
    %10 = vector.load %arg5[%c0_5, %c0_6] : memref<8x128xf32, #tpu.memory_space<vmem>>, vector<1x128xf32>
    %11 = vector.broadcast %10 : vector<1x128xf32> to vector<128x128xf32>
    %12 = arith.mulf %9, %11 : vector<128x128xf32>
    %13 = arith.truncf %12 : vector<128x128xf32> to vector<128x128xbf16>
    %c0_7 = arith.constant 0 : index
    %c0_8 = arith.constant 0 : index
    %14 = vector.load %arg6[%c0_7, %c0_8] : memref<128x384xbf16, #tpu.memory_space<vmem>>, vector<128x128xbf16>
    %cst_9 = arith.constant dense<0.000000e+00> : vector<128x128xf32>
    %15 = tpu.matmul %14, %13, %cst_9 {dimension_numbers = #tpu.dot_dimension_numbers<[1], [0], [0], [1], [0, 0, 1, 1], [], []>} : vector<128x128xbf16>, vector<128x128xbf16>, vector<128x128xf32> -> vector<128x128xf32>
    %c1 = arith.constant 1 : index
    %c0_10 = arith.constant 0 : index
    %16 = vector.load %arg5[%c1, %c0_10] : memref<8x128xf32, #tpu.memory_space<vmem>>, vector<1x128xf32>
    %17 = vector.broadcast %16 : vector<1x128xf32> to vector<128x128xf32>
    %18 = arith.mulf %8, %17 : vector<128x128xf32>
    %19 = arith.truncf %18 : vector<128x128xf32> to vector<128x128xbf16>
    %c0_11 = arith.constant 0 : index
    %c128 = arith.constant 128 : index
    %20 = vector.load %arg6[%c0_11, %c128] : memref<128x384xbf16, #tpu.memory_space<vmem>>, vector<128x128xbf16>
    %cst_12 = arith.constant dense<0.000000e+00> : vector<128x128xf32>
    %21 = tpu.matmul %20, %19, %cst_12 {dimension_numbers = #tpu.dot_dimension_numbers<[1], [0], [0], [1], [0, 0, 1, 1], [], []>} : vector<128x128xbf16>, vector<128x128xbf16>, vector<128x128xf32> -> vector<128x128xf32>
    %22 = arith.addf %15, %21 : vector<128x128xf32>
    %c127_i32 = arith.constant 127 : i32
    %23 = tpu.dynamic_rotate %8 by %c127_i32 dim 1 : vector<128x128xf32>, i32 -> vector<128x128xf32>
    %c2 = arith.constant 2 : index
    %c0_13 = arith.constant 0 : index
    %24 = vector.load %arg5[%c2, %c0_13] : memref<8x128xf32, #tpu.memory_space<vmem>>, vector<1x128xf32>
    %25 = vector.broadcast %24 : vector<1x128xf32> to vector<128x128xf32>
    %26 = arith.mulf %23, %25 : vector<128x128xf32>
    %27 = arith.truncf %26 : vector<128x128xf32> to vector<128x128xbf16>
    %c0_14 = arith.constant 0 : index
    %c256 = arith.constant 256 : index
    %28 = vector.load %arg6[%c0_14, %c256] : memref<128x384xbf16, #tpu.memory_space<vmem>>, vector<128x128xbf16>
    %cst_15 = arith.constant dense<0.000000e+00> : vector<128x128xf32>
    %29 = tpu.matmul %28, %27, %cst_15 {dimension_numbers = #tpu.dot_dimension_numbers<[1], [0], [0], [1], [0, 0, 1, 1], [], []>} : vector<128x128xbf16>, vector<128x128xbf16>, vector<128x128xf32> -> vector<128x128xf32>
    %30 = arith.addf %22, %29 : vector<128x128xf32>
    %c0_16 = arith.constant 0 : index
    %c0_17 = arith.constant 0 : index
    %31 = vector.load %arg7[%c0_16, %c0_17] : memref<128x128xf32, #tpu.memory_space<vmem>>, vector<128x128xf32>
    tpu.vector_store %arg7[%c0_16, %c0_17], %30 {strides = array<i32>} : memref<128x128xf32, #tpu.memory_space<vmem>>, vector<128x128xf32>,
    %c0_i32 = arith.constant 0 : i32
    %32 = arith.cmpi eq, %arg1, %c0_i32 : i32
    %33 = arith.extui %32 : i1 to i32
    %c0_i32_18 = arith.constant 0 : i32
    %34 = arith.cmpi ne, %33, %c0_i32_18 : i32
    scf.if %34 {
      %cst_29 = arith.constant 0.000000e+00 : f32
      %46 = vector.broadcast %cst_29 : f32 to vector<128x1xf32>
      %c0_30 = arith.constant 0 : index
      %c0_31 = arith.constant 0 : index
      %47 = vector.load %arg8[%c0_30, %c0_31] : memref<128x1xf32, #tpu.memory_space<vmem>>, vector<128x1xf32>
      tpu.vector_store %arg8[%c0_30, %c0_31], %46 {strides = array<i32>} : memref<128x1xf32, #tpu.memory_space<vmem>>, vector<128x1xf32>,
      %cst_32 = arith.constant 0.000000e+00 : f32
      %48 = vector.broadcast %cst_32 : f32 to vector<128x1xf32>
      %c0_33 = arith.constant 0 : index
      %c0_34 = arith.constant 0 : index
      %49 = vector.load %arg9[%c0_33, %c0_34] : memref<128x1xf32, #tpu.memory_space<vmem>>, vector<128x1xf32>
      tpu.vector_store %arg9[%c0_33, %c0_34], %48 {strides = array<i32>} : memref<128x1xf32, #tpu.memory_space<vmem>>, vector<128x1xf32>,
    } else {
    }
    %c0_19 = arith.constant 0 : index
    %c0_20 = arith.constant 0 : index
    %35 = vector.load %arg8[%c0_19, %c0_20] : memref<128x1xf32, #tpu.memory_space<vmem>>, vector<128x1xf32>
    %cst_21 = arith.constant dense<0.000000e+00> : vector<128xf32>
    %36 = vector.multi_reduction <add>, %30, %cst_21 [1] : vector<128x128xf32> to vector<128xf32>
    %37 = vector.shape_cast %36 : vector<128xf32> to vector<128x1xf32>
    %38 = arith.addf %35, %37 : vector<128x1xf32>
    %c0_22 = arith.constant 0 : index
    %c0_23 = arith.constant 0 : index
    %39 = vector.load %arg8[%c0_22, %c0_23] : memref<128x1xf32, #tpu.memory_space<vmem>>, vector<128x1xf32>
    tpu.vector_store %arg8[%c0_22, %c0_23], %38 {strides = array<i32>} : memref<128x1xf32, #tpu.memory_space<vmem>>, vector<128x1xf32>,
    %c0_24 = arith.constant 0 : index
    %c0_25 = arith.constant 0 : index
    %40 = vector.load %arg9[%c0_24, %c0_25] : memref<128x1xf32, #tpu.memory_space<vmem>>, vector<128x1xf32>
    %41 = arith.mulf %30, %30 : vector<128x128xf32>
    %cst_26 = arith.constant dense<0.000000e+00> : vector<128xf32>
    %42 = vector.multi_reduction <add>, %41, %cst_26 [1] : vector<128x128xf32> to vector<128xf32>
    %43 = vector.shape_cast %42 : vector<128xf32> to vector<128x1xf32>
    %44 = arith.addf %40, %43 : vector<128x1xf32>
    %c0_27 = arith.constant 0 : index
    %c0_28 = arith.constant 0 : index
    %45 = vector.load %arg9[%c0_27, %c0_28] : memref<128x1xf32, #tpu.memory_space<vmem>>, vector<128x1xf32>
    tpu.vector_store %arg9[%c0_27, %c0_28], %44 {strides = array<i32>} : memref<128x1xf32, #tpu.memory_space<vmem>>, vector<128x1xf32>,
    return
  }
  func.func @transform_0(%arg0: i32, %arg1: i32) -> (i32, i32) {
    %c0_i32 = arith.constant 0 : i32
    %c0_i32_0 = arith.constant 0 : i32
    return %c0_i32, %arg1 : i32, i32
  }
  func.func @transform_1(%arg0: i32, %arg1: i32) -> (i32, i32) {
    %c0_i32 = arith.constant 0 : i32
    %c0_i32_0 = arith.constant 0 : i32
    %c0_i32_1 = arith.constant 0 : i32
    return %c0_i32, %c0_i32_0 : i32, i32
  }
  func.func @transform_2(%arg0: i32, %arg1: i32) -> (i32, i32) {
    %c0_i32 = arith.constant 0 : i32
    %c0_i32_0 = arith.constant 0 : i32
    %c0_i32_1 = arith.constant 0 : i32
    return %c0_i32, %c0_i32_0 : i32, i32
  }
  func.func @transform_3(%arg0: i32, %arg1: i32) -> (i32, i32) {
    %c0_i32 = arith.constant 0 : i32
    %c0_i32_0 = arith.constant 0 : i32
    %c0_i32_1 = arith.constant 0 : i32
    return %c0_i32, %c0_i32_0 : i32, i32
  }
  func.func @transform_4(%arg0: i32, %arg1: i32) -> (i32, i32) {
    %c0_i32 = arith.constant 0 : i32
    %c0_i32_0 = arith.constant 0 : i32
    return %arg0, %c0_i32 : i32, i32
  }
  func.func @transform_5(%arg0: i32, %arg1: i32) -> (i32, i32) {
    %c0_i32 = arith.constant 0 : i32
    return %arg0, %arg1 : i32, i32
  }
  func.func @transform_6(%arg0: i32, %arg1: i32) -> (i32, i32) {
    %c0_i32 = arith.constant 0 : i32
    %c0_i32_0 = arith.constant 0 : i32
    return %arg0, %c0_i32 : i32, i32
  }
  func.func @transform_7(%arg0: i32, %arg1: i32) -> (i32, i32) {
    %c0_i32 = arith.constant 0 : i32
    %c0_i32_0 = arith.constant 0 : i32
    return %arg0, %c0_i32 : i32, i32
  }
}

</mosaic_0001>

<bundles_post_ra>
// kernel: residual_block.5
= control target key start
LH: loop header
LB: loop body
LE: loop exit
PB: predicated region body
PF: predicated region fallthrough
CT: control target
= control target key end

     0   :  { %s975_s15 = smov 0   ;;  %s977_s16 = smov 0   ;;  %s1279_s0 = inlined_call_operand.vmem [shape: f32[128,256], index: 0, kind: input, shape index: {}]   ;;  %s1280_s1 = inlined_call_operand.vmem [shape: f32[128,256], index: 1, kind: input, shape index: {}]   ;;  %s1281_s2 = inlined_call_operand.vmem [shape: f32[128,1], index: 2, kind: input, shape index: {}]   ;;  %s1282_s3 = inlined_call_operand.vmem [shape: f32[128,1], index: 3, kind: input, shape index: {}]   ;;  %s1283_s4 = inlined_call_operand.vmem [shape: f32[128,256], index: 4, kind: output, shape index: {}]  }
   0x1   :  { %s979_s17 = smov 0  }
   0x2 LB: > { %s882_s18 = sadd.s32 4294967295, %s947_s17   ;;  %s992_s19 = sadd.s32 1, %s947_s17   ;;  %s947_s17 = sphi %s979_s17, %s1288_s17   ;;  %s943_s16 = sphi %s977_s16, %s1287_s16   ;;  %s939_s15 = sphi %s975_s15, %s1286_s15  }
   0x3   : > { %s18_s20 = ssub.s32 %s947_s17, %s992_s19  ;;  %s21_s21 = sadd.s32 1, %s943_s16 }
   0x4   : > { %p19_p0 = scmp.eq.s32.totalorder %s18_s20, 0  ;;  %p28_p1 = scmp.ne.s32.totalorder %s943_s16, %s939_s15 }
   0x5   : > { %p29_p2 = scmp.eq.s32.totalorder %s947_s17, 0  ;;  %p126_p3 = scmp.eq.s32.totalorder %s882_s18, 1 }
   0x6   : > { %s1003_s22 = scalar_select %p19_p0, %s943_s16, %s21_s21  }
   0x7   : > { %p1005_p4 = por %p29_p2, %p28_p1  ;;  %p1009_p5 = por %p126_p3, %p28_p1 }
   0x8   : > { %p885_p6 = scmp.ge.s32.totalorder %s947_s17, 2 }
   0xa   : > { %154 = sbr.rel (%p885_p6) target bundleno = 39 (0x27), region = 24 }
   0xf   : > { %157 = sbr.rel (!%p1005_p4) target bundleno = 27 (0x1b), region = 28  ;;  %s159_s25 = sand.u32 (%p1005_p4), 1, %s943_s16  }
  0x10   : > { %s887_s26 = sshll.u32 (%p1005_p4), %s947_s17, 3  ;;  %s886_s27 = sshll.u32 (%p1005_p4), %s159_s25, 7 }
  0x11   : > { %s1021_s30 = scalar_lea.vmem (%p1005_p4), %s1279_s0, %s887_s26  ;;  %s161_s5 = scalar_lea.vmem (%p1005_p4), [#allocation2], %s886_s27 }
  0x12   : > { %v222_v0 = vld [vmem:[%s1021_s30] sm:$0xff] (%p1005_p4)  ;;  %v224_v1 = vld [vmem:[%s1021_s30 + $0x10] sm:$0xff] (%p1005_p4) }
  0x13   : > { %v226_v2 = vld [vmem:[%s1021_s30 + $0x20] sm:$0xff] (%p1005_p4)  ;;  %223 = vst [vmem:[%s161_s5] sm:$0xff] (%p1005_p4), %v222_v0  ;;  %225 = vst [vmem:[%s161_s5 + $0x8] sm:$0xff] (%p1005_p4), %v224_v1  ;;  %v228_v3 = vld [vmem:[%s1021_s30 + $0x30] sm:$0xff] (%p1005_p4) }
  0x14   : > { %227 = vst [vmem:[%s161_s5 + $0x10] sm:$0xff] %v226_v2  ;;  %v230_v4 = vld [vmem:[%s1021_s30 + $0x40] sm:$0xff]  ;;  %v232_v5 = vld [vmem:[%s1021_s30 + $0x50] sm:$0xff]  ;;  %229 = vst [vmem:[%s161_s5 + $0x18] sm:$0xff] %v228_v3 }
  0x15   : > { %231 = vst [vmem:[%s161_s5 + $0x20] sm:$0xff] %v230_v4  ;;  %233 = vst [vmem:[%s161_s5 + $0x28] sm:$0xff] %v232_v5  ;;  %v234_v6 = vld [vmem:[%s1021_s30 + $0x60] sm:$0xff]  ;;  %v236_v7 = vld [vmem:[%s1021_s30 + $0x70] sm:$0xff] }
  0x16   : > { %v238_v8 = vld [vmem:[%s1021_s30 + $0x80] sm:$0xff]  ;;  %235 = vst [vmem:[%s161_s5 + $0x30] sm:$0xff] %v234_v6  ;;  %237 = vst [vmem:[%s161_s5 + $0x38] sm:$0xff] %v236_v7  ;;  %v240_v9 = vld [vmem:[%s1021_s30 + $0x90] sm:$0xff] }
  0x17   : > { %239 = vst [vmem:[%s161_s5 + $0x40] sm:$0xff] %v238_v8  ;;  %v242_v10 = vld [vmem:[%s1021_s30 + $0xa0] sm:$0xff]  ;;  %v244_v11 = vld [vmem:[%s1021_s30 + $0xb0] sm:$0xff]  ;;  %241 = vst [vmem:[%s161_s5 + $0x48] sm:$0xff] %v240_v9 }
  0x18   : > { %243 = vst [vmem:[%s161_s5 + $0x50] sm:$0xff] %v242_v10  ;;  %245 = vst [vmem:[%s161_s5 + $0x58] sm:$0xff] %v244_v11  ;;  %v246_v12 = vld [vmem:[%s1021_s30 + $0xc0] sm:$0xff]  ;;  %v248_v13 = vld [vmem:[%s1021_s30 + $0xd0] sm:$0xff] }
  0x19   : > { %v250_v14 = vld [vmem:[%s1021_s30 + $0xe0] sm:$0xff]  ;;  %247 = vst [vmem:[%s161_s5 + $0x60] sm:$0xff] %v246_v12  ;;  %249 = vst [vmem:[%s161_s5 + $0x68] sm:$0xff] %v248_v13  ;;  %v252_v15 = vld [vmem:[%s1021_s30 + $0xf0] sm:$0xff] }
  0x1a   : > { %251 = vst [vmem:[%s161_s5 + $0x70] sm:$0xff] %v250_v14  ;;  %253 = vst [vmem:[%s161_s5 + $0x78] sm:$0xff] %v252_v15 }
  0x1b PF: > { %259 = sbr.rel (!%p1005_p4) target bundleno = 39 (0x27), region = 66  ;;  %s261_s6 = sand.u32 (%p1005_p4), 1, %s943_s16  }
  0x1c   : > { %s889_s7 = sshll.u32 (%p1005_p4), %s947_s17, 3  ;;  %s888_s8 = sshll.u32 (%p1005_p4), %s261_s6, 7 }
  0x1d   : > { %s1046_s11 = scalar_lea.vmem (%p1005_p4), %s1280_s1, %s889_s7  ;;  %s263_s12 = scalar_lea.vmem (%p1005_p4), [#allocation3], %s888_s8 }
  0x1e   : > { %v324_v16 = vld [vmem:[%s1046_s11] sm:$0xff] (%p1005_p4)  ;;  %v326_v17 = vld [vmem:[%s1046_s11 + $0x10] sm:$0xff] (%p1005_p4) }
  0x1f   : > { %v328_v18 = vld [vmem:[%s1046_s11 + $0x20] sm:$0xff] (%p1005_p4)  ;;  %325 = vst [vmem:[%s263_s12] sm:$0xff] (%p1005_p4), %v324_v16  ;;  %327 = vst [vmem:[%s263_s12 + $0x8] sm:$0xff] (%p1005_p4), %v326_v17  ;;  %v330_v19 = vld [vmem:[%s1046_s11 + $0x30] sm:$0xff] (%p1005_p4) }
  0x20   : > { %329 = vst [vmem:[%s263_s12 + $0x10] sm:$0xff] %v328_v18  ;;  %v332_v20 = vld [vmem:[%s1046_s11 + $0x40] sm:$0xff]  ;;  %v334_v21 = vld [vmem:[%s1046_s11 + $0x50] sm:$0xff]  ;;  %331 = vst [vmem:[%s263_s12 + $0x18] sm:$0xff] %v330_v19 }
  0x21   : > { %333 = vst [vmem:[%s263_s12 + $0x20] sm:$0xff] %v332_v20  ;;  %335 = vst [vmem:[%s263_s12 + $0x28] sm:$0xff] %v334_v21  ;;  %v336_v22 = vld [vmem:[%s1046_s11 + $0x60] sm:$0xff]  ;;  %v338_v23 = vld [vmem:[%s1046_s11 + $0x70] sm:$0xff] }
  0x22   : > { %v340_v24 = vld [vmem:[%s1046_s11 + $0x80] sm:$0xff]  ;;  %337 = vst [vmem:[%s263_s12 + $0x30] sm:$0xff] %v336_v22  ;;  %339 = vst [vmem:[%s263_s12 + $0x38] sm:$0xff] %v338_v23  ;;  %v342_v25 = vld [vmem:[%s1046_s11 + $0x90] sm:$0xff] }
  0x23   : > { %341 = vst [vmem:[%s263_s12 + $0x40] sm:$0xff] %v340_v24  ;;  %v344_v26 = vld [vmem:[%s1046_s11 + $0xa0] sm:$0xff]  ;;  %v346_v27 = vld [vmem:[%s1046_s11 + $0xb0] sm:$0xff]  ;;  %343 = vst [vmem:[%s263_s12 + $0x48] sm:$0xff] %v342_v25 }
  0x24   : > { %345 = vst [vmem:[%s263_s12 + $0x50] sm:$0xff] %v344_v26  ;;  %347 = vst [vmem:[%s263_s12 + $0x58] sm:$0xff] %v346_v27  ;;  %v348_v28 = vld [vmem:[%s1046_s11 + $0xc0] sm:$0xff]  ;;  %v350_v29 = vld [vmem:[%s1046_s11 + $0xd0] sm:$0xff] }
  0x25   : > { %v352_v30 = vld [vmem:[%s1046_s11 + $0xe0] sm:$0xff]  ;;  %349 = vst [vmem:[%s263_s12 + $0x60] sm:$0xff] %v348_v28  ;;  %351 = vst [vmem:[%s263_s12 + $0x68] sm:$0xff] %v350_v29  ;;  %v354_v31 = vld [vmem:[%s1046_s11 + $0xf0] sm:$0xff] }
  0x26   : > { %353 = vst [vmem:[%s263_s12 + $0x70] sm:$0xff] %v352_v30  ;;  %355 = vst [vmem:[%s263_s12 + $0x78] sm:$0xff] %v354_v31 }
  0x27 PF: > { %p890_p7 = scmp.ge.s32.totalorder %s947_s17, 1  ;;  %p360_p8 = scmp.lt.s32.totalorder %s947_s17, 3 }
  0x29   : > { %p361_p9 = pnand %p890_p7, %p360_p8 }
  0x2a   : > { %s367_s27 = sand.u32 (!%p361_p9), 1, %s939_s15  }
  0x2b   : > { %364 = sbr.rel (%p361_p9) target bundleno = 249 (0xf9), region = 104  ;;  %s1171_s28 = sshll.u32 (!%p361_p9), %s367_s27, 7 }
  0x2c   : > { %s1178_s29 = scalar_lea.vmem (!%p361_p9), [#allocation2], %s1171_s28  ;;  %s1189_s15 = scalar_lea.vmem (!%p361_p9), [#allocation3], %s1171_s28 }
  0x2d   : > { %s1199_s30 = scalar_lea.vmem (!%p361_p9), [#allocation4], %s1171_s28 }
  0x30   : > { %v420_v32 = vld [vmem:[%s1281_s2 + $0x10] sm:$0xff]  ;;  %v418_v33 = vld [vmem:[%s1281_s2] sm:$0xff]  ;;  %v949_v34 = vmov 0   ;;  %v421_v35 = vld [vmem:[%s1281_s2 + $0x18] sm:$0xff]  ;;  %s895_s5 = sshll.u32 (%p1009_p5), %s882_s18, 3 }
  0x31   : > { %924 = vset.pattern.permute.xlu1 %v949_v34  ;;  %923 = vset.pattern.permute.xlu0 %v949_v34  ;;  %v419_v36 = vld [vmem:[%s1281_s2 + $0x8] sm:$0xff]  ;;  %v422_v38 = vld [vmem:[%s1281_s2 + $0x20] sm:$0xff]  ;;  %v425_v39 = vld [vmem:[%s1281_s2 + $0x38] sm:$0xff]  ;;  %s714_s24 = scalar_lea.vmem (%p1009_p5), %s1283_s4, %s895_s5 }
  0x32   : > { %446 = vperm.xlu1 %924, %v420_v32   ;;  %436 = vperm.xlu0 %923, %v418_v33   ;;  %v423_v37 = vld [vmem:[%s1281_s2 + $0x28] sm:$0xff]  ;;  %v424_v40 = vld [vmem:[%s1281_s2 + $0x30] sm:$0xff]  ;;  %v426_v42 = vld [vmem:[%s1281_s2 + $0x40] sm:$0xff] }
  0x33   : > { %v427_v41 = vld [vmem:[%s1281_s2 + $0x48] sm:$0xff]  ;;  %v429_v43 = vld [vmem:[%s1281_s2 + $0x58] sm:$0xff]  ;;  %v428_v44 = vld [vmem:[%s1281_s2 + $0x50] sm:$0xff] }
  0x34   : > { %v431_v45 = vld [vmem:[%s1281_s2 + $0x68] sm:$0xff]  ;;  %v430_v46 = vld [vmem:[%s1281_s2 + $0x60] sm:$0xff]  ;;  %v433_v47 = vld [vmem:[%s1281_s2 + $0x78] sm:$0xff] }
  0x35   : > { %v432_v48 = vld [vmem:[%s1281_s2 + $0x70] sm:$0xff]  ;;  %v531_v49 = vld [vmem:[%s1282_s3 + $0x8] sm:$0xff]  ;;  %v530_v50 = vld [vmem:[%s1282_s3] sm:$0xff] }
  0x36   : > { %451 = vperm.xlu1 %924, %v421_v35   ;;  %441 = vperm.xlu0 %923, %v419_v36   ;;  %v533_v51 = vld [vmem:[%s1282_s3 + $0x18] sm:$0xff]  ;;  %v532_v52 = vld [vmem:[%s1282_s3 + $0x10] sm:$0xff]  ;;  %v535_v53 = vld [vmem:[%s1282_s3 + $0x28] sm:$0xff] }
  0x37   : > { %v534_v54 = vld [vmem:[%s1282_s3 + $0x20] sm:$0xff]  ;;  %v537_v55 = vld [vmem:[%s1282_s3 + $0x38] sm:$0xff]  ;;  %v536_v56 = vld [vmem:[%s1282_s3 + $0x30] sm:$0xff] }
  0x38   : > { %v539_v57 = vld [vmem:[%s1282_s3 + $0x48] sm:$0xff]  ;;  %v538_v58 = vld [vmem:[%s1282_s3 + $0x40] sm:$0xff]  ;;  %v541_v59 = vld [vmem:[%s1282_s3 + $0x58] sm:$0xff] }
  0x39   : > { %v540_v60 = vld [vmem:[%s1282_s3 + $0x50] sm:$0xff]  ;;  %v543_v61 = vld [vmem:[%s1282_s3 + $0x68] sm:$0xff]  ;;  %v542_v62 = vld [vmem:[%s1282_s3 + $0x60] sm:$0xff] }
  0x3a   : > { %461 = vperm.xlu1 %924, %v423_v37   ;;  %456 = vperm.xlu0 %923, %v422_v38   ;;  %v545_v63 = vld [vmem:[%s1282_s3 + $0x78] sm:$0xff]  ;;  %v544_v0 = vld [vmem:[%s1282_s3 + $0x70] sm:$0xff]  ;;  %v402_v15 = vld [vmem:[%s1178_s29] sm:$0xff] }
  0x3b   : > { %v403_v16 = vld [vmem:[%s1178_s29 + $0x8] sm:$0xff]  ;;  %v404_v19 = vld [vmem:[%s1178_s29 + $0x10] sm:$0xff]  ;;  %v405_v22 = vld [vmem:[%s1178_s29 + $0x18] sm:$0xff] }
  0x3c   : > { %v643_v24 = vld [vmem:[%s1189_s15 + $0x8] sm:$0xff]  ;;  %v642_v26 = vld [vmem:[%s1189_s15] sm:$0xff]  ;;  %v645_v36 = vld [vmem:[%s1189_s15 + $0x18] sm:$0xff] }
  0x3d   : > { %v407_v31 = vld [vmem:[%s1178_s29 + $0x28] sm:$0xff]  ;;  %v406_v34 = vld [vmem:[%s1178_s29 + $0x20] sm:$0xff]  ;;  %v644_v38 = vld [vmem:[%s1189_s15 + $0x10] sm:$0xff] }
  0x3e   : > { %471 = vperm.xlu1 %924, %v425_v39   ;;  %466 = vperm.xlu0 %923, %v424_v40  }
  0x42   : > { %481 = vperm.xlu1 %924, %v427_v41   ;;  %476 = vperm.xlu0 %923, %v426_v42  }
  0x46   : > { %491 = vperm.xlu1 %924, %v429_v43   ;;  %486 = vperm.xlu0 %923, %v428_v44  }
  0x4a   : > { %501 = vperm.xlu1 %924, %v431_v45   ;;  %496 = vperm.xlu0 %923, %v430_v46   ;;  %v409_v45 = vld [vmem:[%s1178_s29 + $0x38] sm:$0xff] }
  0x4e   : > { %511 = vperm.xlu1 %924, %v433_v47   ;;  %506 = vperm.xlu0 %923, %v432_v48   ;;  %v408_v48 = vld [vmem:[%s1178_s29 + $0x30] sm:$0xff] }
  0x52   : > { %553 = vperm.xlu1 %924, %v531_v49   ;;  %548 = vperm.xlu0 %923, %v530_v50   ;;  %v647_v50 = vld [vmem:[%s1189_s15 + $0x28] sm:$0xff] }
  0x56   : > { %563 = vperm.xlu1 %924, %v533_v51   ;;  %558 = vperm.xlu0 %923, %v532_v52   ;;  %v646_v52 = vld [vmem:[%s1189_s15 + $0x20] sm:$0xff] }
  0x5a   : > { %573 = vperm.xlu1 %924, %v535_v53   ;;  %568 = vperm.xlu0 %923, %v534_v54  }
  0x5e   : > { %583 = vperm.xlu1 %924, %v537_v55   ;;  %578 = vperm.xlu0 %923, %v536_v56  }
  0x62   : > { %593 = vperm.xlu1 %924, %v539_v57   ;;  %588 = vperm.xlu0 %923, %v538_v58  }
  0x66   : > { %603 = vperm.xlu1 %924, %v541_v59   ;;  %598 = vperm.xlu0 %923, %v540_v60   ;;  %v411_v59 = vld [vmem:[%s1178_s29 + $0x48] sm:$0xff] }
  0x6a   : > { %613 = vperm.xlu1 %924, %v543_v61   ;;  %608 = vperm.xlu0 %923, %v542_v62   ;;  %v410_v62 = vld [vmem:[%s1178_s29 + $0x40] sm:$0xff] }
  0x6e   : > { %623 = vperm.xlu1 %924, %v545_v63   ;;  %618 = vperm.xlu0 %923, %v544_v0   ;;  %v649_v0 = vld [vmem:[%s1189_s15 + $0x38] sm:$0xff] }
  0xad   : > { %v447_v1 = vpop.permute.xlu1 %446  ;;  %v437_v2 = vpop.permute.xlu0 %436 }
  0xae   : > { %v514_v20 = vmul.f32 %v437_v2, %v402_v15  ;;  %v516_v29 = vmul.f32 %v447_v1, %v404_v19  ;;  %v648_v2 = vld [vmem:[%s1189_s15 + $0x30] sm:$0xff]  ;;  %v413_v15 = vld [vmem:[%s1178_s29 + $0x58] sm:$0xff] }
  0xb1   : > { %v452_v3 = vpop.permute.xlu1 %451  ;;  %v442_v4 = vpop.permute.xlu0 %441 }
  0xb2   : > { %v515_v21 = vmul.f32 %v442_v4, %v403_v16  ;;  %v517_v30 = vmul.f32 %v452_v3, %v405_v22  ;;  %v651_v22 = vld [vmem:[%s1189_s15 + $0x48] sm:$0xff] }
  0xb5   : > { %v462_v5 = vpop.permute.xlu1 %461  ;;  %v457_v6 = vpop.permute.xlu0 %456 }
  0xb6   : > { %v519_v43 = vmul.f32 %v462_v5, %v407_v31  ;;  %v518_v44 = vmul.f32 %v457_v6, %v406_v34  ;;  %v653_v34 = vld [vmem:[%s1189_s15 + $0x58] sm:$0xff] }
  0xb9   : > { %v472_v7 = vpop.permute.xlu1 %471  ;;  %v467_v8 = vpop.permute.xlu0 %466 }
  0xba   : > { %v521_v57 = vmul.f32 %v472_v7, %v409_v45  ;;  %v520_v58 = vmul.f32 %v467_v8, %v408_v48  ;;  %v654_v48 = vld [vmem:[%s1189_s15 + $0x60] sm:$0xff] }
  0xbd   : > { %v1162_v9 = vpop.permute.xlu1 %481  ;;  %v1164_v10 = vpop.permute.xlu0 %476 }
  0xbe   : > { %v523_v7 = vmul.f32 %v1162_v9, %v411_v59  ;;  %v522_v8 = vmul.f32 %v1164_v10, %v410_v62 }
  0xc1   : > { %v1167_v11 = vpop.permute.xlu1 %491  ;;  %v1169_v12 = vpop.permute.xlu0 %486 }
  0xc5   : > { %v1173_v13 = vpop.permute.xlu1 %501  ;;  %v1175_v14 = vpop.permute.xlu0 %496 }
  0xc9   : > { %v1182_v17 = vpop.permute.xlu1 %511  ;;  %v1184_v18 = vpop.permute.xlu0 %506 }
  0xcd   : > { %v554_v23 = vpop.permute.xlu1 %553  ;;  %v549_v25 = vpop.permute.xlu0 %548 }
  0xce   : > { %v627_v27 = vadd.f32 %v554_v23, %v515_v21  ;;  %v626_v28 = vadd.f32 %v549_v25, %v514_v20  ;;  %v412_v20 = vld [vmem:[%s1178_s29 + $0x50] sm:$0xff] }
  0xd0   : > { %v659_v32 = vadd.f32 %v643_v24, %v627_v27  ;;  %v658_v33 = vadd.f32 %v642_v26, %v626_v28  ;;  %v650_v24 = vld [vmem:[%s1189_s15 + $0x40] sm:$0xff]  ;;  %v525_v27 = vmul.f32 %v1167_v11, %v413_v15  ;;  %v524_v28 = vmul.f32 %v1169_v12, %v412_v20 }
  0xd1   : > { %v564_v35 = vpop.permute.xlu1 %563  ;;  %v559_v37 = vpop.permute.xlu0 %558 }
  0xd2   : > { %v675_v39 = vmax.f32 %v659_v32, 0.0  ;;  %v674_v40 = vmax.f32 %v658_v33, 0.0  ;;  %v629_v41 = vadd.f32 %v564_v35, %v517_v30  ;;  %v628_v42 = vadd.f32 %v559_v37, %v516_v29  ;;  %v415_v29 = vld [vmem:[%s1178_s29 + $0x68] sm:$0xff]  ;;  %v414_v32 = vld [vmem:[%s1178_s29 + $0x60] sm:$0xff] }
  0xd4   : > { %691 = vst [vmem:[%s1199_s30 + $0x8] sm:$0xff] %v675_v39  ;;  %690 = vst [vmem:[%s1199_s30] sm:$0xff] %v674_v40  ;;  %v661_v46 = vadd.f32 %v645_v36, %v629_v41  ;;  %v660_v47 = vadd.f32 %v644_v38, %v628_v42  ;;  %v652_v36 = vld [vmem:[%s1189_s15 + $0x50] sm:$0xff]  ;;  %v527_v39 = vmul.f32 %v1173_v13, %v415_v29  ;;  %v417_v41 = vld [vmem:[%s1178_s29 + $0x78] sm:$0xff] }
  0xd5   : > { %v574_v49 = vpop.permute.xlu1 %573  ;;  %v569_v51 = vpop.permute.xlu0 %568  ;;  %v526_v40 = vmul.f32 %v1175_v14, %v414_v32  ;;  %v529_v14 = vmul.f32 %v1182_v17, %v417_v41 }
  0xd6   : > { %v677_v53 = vmax.f32 %v661_v46, 0.0  ;;  %v676_v54 = vmax.f32 %v660_v47, 0.0  ;;  %v631_v55 = vadd.f32 %v574_v49, %v519_v43  ;;  %v630_v56 = vadd.f32 %v569_v51, %v518_v44  ;;  %v416_v44 = vld [vmem:[%s1178_s29 + $0x70] sm:$0xff]  ;;  %v655_v46 = vld [vmem:[%s1189_s15 + $0x68] sm:$0xff] }
  0xd8   : > { %693 = vst [vmem:[%s1199_s30 + $0x18] sm:$0xff] %v677_v53  ;;  %692 = vst [vmem:[%s1199_s30 + $0x10] sm:$0xff] %v676_v54  ;;  %v663_v60 = vadd.f32 %v647_v50, %v631_v55  ;;  %v662_v61 = vadd.f32 %v646_v52, %v630_v56  ;;  %v528_v52 = vmul.f32 %v1184_v18, %v416_v44  ;;  %v657_v56 = vld [vmem:[%s1189_s15 + $0x78] sm:$0xff] }
  0xd9   : > { %v584_v63 = vpop.permute.xlu1 %583  ;;  %v579_v1 = vpop.permute.xlu0 %578 }
  0xda   : > { %v679_v3 = vmax.f32 %v663_v60, 0.0  ;;  %v678_v4 = vmax.f32 %v662_v61, 0.0  ;;  %v633_v5 = vadd.f32 %v584_v63, %v521_v57  ;;  %v632_v6 = vadd.f32 %v579_v1, %v520_v58  ;;  %v656_v58 = vld [vmem:[%s1189_s15 + $0x70] sm:$0xff] }
  0xdb   : > { %v773_v1 = vld [vmem:[%s1199_s30] sm:$0xff] (%p1009_p5) }
  0xdc   : > { %695 = vst [vmem:[%s1199_s30 + $0x28] sm:$0xff] %v679_v3  ;;  %694 = vst [vmem:[%s1199_s30 + $0x20] sm:$0xff] %v678_v4  ;;  %v665_v16 = vadd.f32 %v649_v0, %v633_v5  ;;  %v664_v19 = vadd.f32 %v648_v2, %v632_v6  ;;  %v775_v2 = vld [vmem:[%s1199_s30 + $0x8] sm:$0xff] (%p1009_p5) }
  0xdd   : > { %v594_v21 = vpop.permute.xlu1 %593  ;;  %v589_v23 = vpop.permute.xlu0 %588  ;;  %774 = vst [vmem:[%s714_s24] sm:$0xff] (%p1009_p5), %v773_v1  ;;  %776 = vst [vmem:[%s714_s24 + $0x10] sm:$0xff] (%p1009_p5), %v775_v2 }
  0xde   : > { %v681_v25 = vmax.f32 %v665_v16, 0.0  ;;  %v680_v9 = vmax.f32 %v664_v19, 0.0  ;;  %v635_v26 = vadd.f32 %v594_v21, %v523_v7  ;;  %v634_v10 = vadd.f32 %v589_v23, %v522_v8 }
  0xdf   : > { %v777_v3 = vld [vmem:[%s1199_s30 + $0x10] sm:$0xff] (%p1009_p5)  ;;  %v779_v4 = vld [vmem:[%s1199_s30 + $0x18] sm:$0xff] (%p1009_p5) }
  0xe0   : > { %697 = vst [vmem:[%s1199_s30 + $0x38] sm:$0xff] %v681_v25  ;;  %696 = vst [vmem:[%s1199_s30 + $0x30] sm:$0xff] %v680_v9  ;;  %v667_v30 = vadd.f32 %v651_v22, %v635_v26  ;;  %v666_v31 = vadd.f32 %v650_v24, %v634_v10 }
  0xe1   : > { %v604_v33 = vpop.permute.xlu1 %603  ;;  %v599_v35 = vpop.permute.xlu0 %598  ;;  %778 = vst [vmem:[%s714_s24 + $0x20] sm:$0xff] (%p1009_p5), %v777_v3  ;;  %780 = vst [vmem:[%s714_s24 + $0x30] sm:$0xff] (%p1009_p5), %v779_v4 }
  0xe2   : > { %v683_v37 = vmax.f32 %v667_v30, 0.0  ;;  %v682_v11 = vmax.f32 %v666_v31, 0.0  ;;  %v637_v38 = vadd.f32 %v604_v33, %v525_v27  ;;  %v636_v12 = vadd.f32 %v599_v35, %v524_v28 }
  0xe3   : > { %v781_v5 = vld [vmem:[%s1199_s30 + $0x20] sm:$0xff] (%p1009_p5)  ;;  %v783_v6 = vld [vmem:[%s1199_s30 + $0x28] sm:$0xff] (%p1009_p5) }
  0xe4   : > { %699 = vst [vmem:[%s1199_s30 + $0x48] sm:$0xff] %v683_v37  ;;  %698 = vst [vmem:[%s1199_s30 + $0x40] sm:$0xff] %v682_v11  ;;  %v669_v42 = vadd.f32 %v653_v34, %v637_v38  ;;  %v668_v43 = vadd.f32 %v652_v36, %v636_v12 }
  0xe5   : > { %v614_v45 = vpop.permute.xlu1 %613  ;;  %v609_v47 = vpop.permute.xlu0 %608  ;;  %782 = vst [vmem:[%s714_s24 + $0x40] sm:$0xff] (%p1009_p5), %v781_v5  ;;  %784 = vst [vmem:[%s714_s24 + $0x50] sm:$0xff] (%p1009_p5), %v783_v6 }
  0xe6   : > { %v685_v49 = vmax.f32 %v669_v42, 0.0  ;;  %v684_v50 = vmax.f32 %v668_v43, 0.0  ;;  %v639_v51 = vadd.f32 %v614_v45, %v527_v39  ;;  %v638_v13 = vadd.f32 %v609_v47, %v526_v40 }
  0xe7   : > { %v785_v7 = vld [vmem:[%s1199_s30 + $0x30] sm:$0xff] (%p1009_p5)  ;;  %v787_v8 = vld [vmem:[%s1199_s30 + $0x38] sm:$0xff] (%p1009_p5) }
  0xe8   : > { %701 = vst [vmem:[%s1199_s30 + $0x58] sm:$0xff] %v685_v49  ;;  %700 = vst [vmem:[%s1199_s30 + $0x50] sm:$0xff] %v684_v50  ;;  %v671_v53 = vadd.f32 %v655_v46, %v639_v51  ;;  %v670_v54 = vadd.f32 %v654_v48, %v638_v13 }
  0xe9   : > { %v624_v55 = vpop.permute.xlu1 %623  ;;  %v619_v57 = vpop.permute.xlu0 %618  ;;  %786 = vst [vmem:[%s714_s24 + $0x60] sm:$0xff] (%p1009_p5), %v785_v7  ;;  %788 = vst [vmem:[%s714_s24 + $0x70] sm:$0xff] (%p1009_p5), %v787_v8 }
  0xea   : > { %v687_v59 = vmax.f32 %v671_v53, 0.0  ;;  %v686_v60 = vmax.f32 %v670_v54, 0.0  ;;  %v641_v61 = vadd.f32 %v624_v55, %v529_v14  ;;  %v640_v62 = vadd.f32 %v619_v57, %v528_v52 }
  0xeb   : > { %v789_v15 = vld [vmem:[%s1199_s30 + $0x40] sm:$0xff] (%p1009_p5)  ;;  %v791_v16 = vld [vmem:[%s1199_s30 + $0x48] sm:$0xff] (%p1009_p5) }
  0xec   : > { %703 = vst [vmem:[%s1199_s30 + $0x68] sm:$0xff] %v687_v59  ;;  %702 = vst [vmem:[%s1199_s30 + $0x60] sm:$0xff] %v686_v60  ;;  %v673_v63 = vadd.f32 %v657_v56, %v641_v61  ;;  %v672_v17 = vadd.f32 %v656_v58, %v640_v62  ;;  %712 = sbr.rel (!%p1009_p5) target bundleno = 249 (0xf9), region = 116 }
  0xed   : > { %790 = vst [vmem:[%s714_s24 + $0x80] sm:$0xff] (%p1009_p5), %v789_v15  ;;  %792 = vst [vmem:[%s714_s24 + $0x90] sm:$0xff] (%p1009_p5), %v791_v16 }
  0xee   : > { %v689_v0 = vmax.f32 %v673_v63, 0.0  ;;  %v688_v18 = vmax.f32 %v672_v17, 0.0 }
  0xef   : > { %v793_v19 = vld [vmem:[%s1199_s30 + $0x50] sm:$0xff] (%p1009_p5)  ;;  %v795_v20 = vld [vmem:[%s1199_s30 + $0x58] sm:$0xff] (%p1009_p5) }
  0xf0   : > { %705 = vst [vmem:[%s1199_s30 + $0x78] sm:$0xff] %v689_v0  ;;  %704 = vst [vmem:[%s1199_s30 + $0x70] sm:$0xff] %v688_v18 }
  0xf1   : > { %794 = vst [vmem:[%s714_s24 + $0xa0] sm:$0xff] %v793_v19  ;;  %796 = vst [vmem:[%s714_s24 + $0xb0] sm:$0xff] %v795_v20 }
  0xf3   : > { %v797_v21 = vld [vmem:[%s1199_s30 + $0x60] sm:$0xff]  ;;  %v799_v22 = vld [vmem:[%s1199_s30 + $0x68] sm:$0xff] }
  0xf4   : > { %798 = vst [vmem:[%s714_s24 + $0xc0] sm:$0xff] %v797_v21  ;;  %800 = vst [vmem:[%s714_s24 + $0xd0] sm:$0xff] %v799_v22 }
  0xf7   : > { %v801_v23 = vld [vmem:[%s1199_s30 + $0x70] sm:$0xff]  ;;  %v803_v24 = vld [vmem:[%s1199_s30 + $0x78] sm:$0xff] }
  0xf8   : > { %802 = vst [vmem:[%s714_s24 + $0xe0] sm:$0xff] %v801_v23  ;;  %804 = vst [vmem:[%s714_s24 + $0xf0] sm:$0xff] %v803_v24 }
  0xf9 PF: > { %p11_p10 = scmp.ge.s32.totalorder %s992_s19, 4   ;;  %s1286_s15 = smov %s943_s16 }
  0xfa   : > { %s1287_s16 = smov %s1003_s22  ;;  %s1288_s17 = smov %s992_s19 }
  0xfb   :  { %13 = sbr.rel (!%p11_p10) target bundleno = 2 (0x2), region = 193 }

// kernel: residual_block.3
= control target key start
LH: loop header
LB: loop body
LE: loop exit
PB: predicated region body
PF: predicated region fallthrough
CT: control target
= control target key end

     0   :  { %s1873_s18 = smov 0   ;;  %s1875_s19 = smov 0   ;;  %s2670_s0 = inlined_call_operand.vmem [shape: f32[128,256], index: 0, kind: input, shape index: {}]   ;;  %s2671_s1 = inlined_call_operand.vmem [shape: f32[8,128], index: 1, kind: input, shape index: {}]   ;;  %s2672_s2 = inlined_call_operand.vmem [shape: bf16[128,384], index: 2, kind: input, shape index: {}]   ;;  %s2673_s3 = inlined_call_operand.vmem [shape: f32[128,256], index: 3, kind: output, shape index: {0}]   ;;  %s2674_s4 = inlined_call_operand.vmem [shape: f32[128,1], index: 4, kind: output, shape index: {1}]   ;;  %s2675_s5 = inlined_call_operand.vmem [shape: f32[128,1], index: 5, kind: output, shape index: {2}]  }
   0x1   :  { %s1877_s20 = smov 0   ;;  %s1879_s21 = smov 0  }
   0x2   :  { %s1881_s22 = smov 0  }
   0x3 LB: > { %s25_s23 = sadd.s32 1, %s1834_s21  ;;  %s1527_s24 = sadd.s32 4294967295, %s1838_s22   ;;  %s1838_s22 = sphi %s1881_s22, %s16_s22   ;;  %s1834_s21 = sphi %s1879_s21, %s2680_s21   ;;  %s1830_s20 = sphi %s1877_s20, %s2679_s20   ;;  %s1826_s19 = sphi %s1875_s19, %s2678_s19   ;;  %s1822_s18 = sphi %s1873_s18, %s2677_s18  }
   0x4   : > { %p26_p0 = scmp.ge.s32.totalorder %s25_s23, 2  ;;  %p42_p1 = scmp.ne.s32.totalorder %s1826_s19, %s1822_s18 }
   0x5   : > { %p43_p2 = scmp.eq.s32.totalorder %s1838_s22, 0  ;;  %p121_p4 = scmp.eq.s32.totalorder %s1527_s24, 1 }
   0x6   : > { %s2682_s23 = smov (%p26_p0, %s25_s23), 0  ;;  %s35_s26 = sadd.s32 1, %s1826_s19 }
   0x7   : > { %p44_p3 = por %p43_p2, %p42_p1  ;;  %s32_s25 = ssub.s32 %s1834_s21, %s2682_s23 }
   0x8   : > { %p33_p5 = scmp.eq.s32.totalorder %s32_s25, 0  ;;  %p1908_p6 = por %p121_p4, %p42_p1 }
   0x9   : > { %p1531_p7 = scmp.ge.s32.totalorder %s1838_s22, 2 }
   0xa   : > { %s1913_s28 = scalar_select %p33_p5, %s1826_s19, %s35_s26  }
   0xb   : > { %208 = sbr.rel (%p1531_p7) target bundleno = 28 (0x1c), region = 24 }
  0x10   : > { %211 = sbr.rel (!%p44_p3) target bundleno = 28 (0x1c), region = 28  ;;  %s213_s29 = sand.u32 (%p44_p3), 1, %s1826_s19  }
  0x11   : > { %s1533_s30 = sshll.u32 (%p44_p3), %s1834_s21, 3  ;;  %s1532_s6 = sshll.u32 (%p44_p3), %s213_s29, 7 }
  0x12   : > { %s1921_s9 = scalar_lea.vmem (%p44_p3), %s2670_s0, %s1533_s30  ;;  %s215_s10 = scalar_lea.vmem (%p44_p3), [#allocation2], %s1532_s6 }
  0x13   : > { %v276_v0 = vld [vmem:[%s1921_s9] sm:$0xff] (%p44_p3)  ;;  %v278_v1 = vld [vmem:[%s1921_s9 + $0x10] sm:$0xff] (%p44_p3) }
  0x14   : > { %v280_v2 = vld [vmem:[%s1921_s9 + $0x20] sm:$0xff] (%p44_p3)  ;;  %277 = vst [vmem:[%s215_s10] sm:$0xff] (%p44_p3), %v276_v0  ;;  %279 = vst [vmem:[%s215_s10 + $0x8] sm:$0xff] (%p44_p3), %v278_v1  ;;  %v282_v3 = vld [vmem:[%s1921_s9 + $0x30] sm:$0xff] (%p44_p3) }
  0x15   : > { %281 = vst [vmem:[%s215_s10 + $0x10] sm:$0xff] %v280_v2  ;;  %v284_v4 = vld [vmem:[%s1921_s9 + $0x40] sm:$0xff]  ;;  %v286_v5 = vld [vmem:[%s1921_s9 + $0x50] sm:$0xff]  ;;  %283 = vst [vmem:[%s215_s10 + $0x18] sm:$0xff] %v282_v3 }
  0x16   : > { %285 = vst [vmem:[%s215_s10 + $0x20] sm:$0xff] %v284_v4  ;;  %287 = vst [vmem:[%s215_s10 + $0x28] sm:$0xff] %v286_v5  ;;  %v288_v6 = vld [vmem:[%s1921_s9 + $0x60] sm:$0xff]  ;;  %v290_v7 = vld [vmem:[%s1921_s9 + $0x70] sm:$0xff] }
  0x17   : > { %v292_v8 = vld [vmem:[%s1921_s9 + $0x80] sm:$0xff]  ;;  %289 = vst [vmem:[%s215_s10 + $0x30] sm:$0xff] %v288_v6  ;;  %291 = vst [vmem:[%s215_s10 + $0x38] sm:$0xff] %v290_v7  ;;  %v294_v9 = vld [vmem:[%s1921_s9 + $0x90] sm:$0xff] }
  0x18   : > { %293 = vst [vmem:[%s215_s10 + $0x40] sm:$0xff] %v292_v8  ;;  %v296_v10 = vld [vmem:[%s1921_s9 + $0xa0] sm:$0xff]  ;;  %v298_v11 = vld [vmem:[%s1921_s9 + $0xb0] sm:$0xff]  ;;  %295 = vst [vmem:[%s215_s10 + $0x48] sm:$0xff] %v294_v9 }
  0x19   : > { %297 = vst [vmem:[%s215_s10 + $0x50] sm:$0xff] %v296_v10  ;;  %299 = vst [vmem:[%s215_s10 + $0x58] sm:$0xff] %v298_v11  ;;  %v300_v12 = vld [vmem:[%s1921_s9 + $0xc0] sm:$0xff]  ;;  %v302_v13 = vld [vmem:[%s1921_s9 + $0xd0] sm:$0xff] }
  0x1a   : > { %v304_v14 = vld [vmem:[%s1921_s9 + $0xe0] sm:$0xff]  ;;  %301 = vst [vmem:[%s215_s10 + $0x60] sm:$0xff] %v300_v12  ;;  %303 = vst [vmem:[%s215_s10 + $0x68] sm:$0xff] %v302_v13  ;;  %v306_v15 = vld [vmem:[%s1921_s9 + $0xf0] sm:$0xff] }
  0x1b   : > { %305 = vst [vmem:[%s215_s10 + $0x70] sm:$0xff] %v304_v14  ;;  %307 = vst [vmem:[%s215_s10 + $0x78] sm:$0xff] %v306_v15 }
  0x1c PF: > { %p1534_p8 = scmp.ge.s32.totalorder %s1838_s22, 1  ;;  %p312_p9 = scmp.lt.s32.totalorder %s1838_s22, 3 }
  0x1e   : > { %p313_p10 = pnand %p1534_p8, %p312_p9 }
  0x1f   : > { %s319_s11 = sand.u32 (!%p313_p10), 1, %s1822_s18   ;;  %s1840_s16 = smov (!%p313_p10), 1  }
  0x20   : > { %316 = sbr.rel (%p313_p10) target bundleno = 653 (0x28d), region = 66  ;;  %s1947_s14 = sshll.u32 (!%p313_p10), %s319_s11, 7 }
  0x21   : > { %s1950_s15 = scalar_lea.vmem (!%p313_p10), [#allocation2], %s1947_s14  ;;  %s1841_s26 = smov (!%p313_p10), 127  }
  0x22   : > { %s2167_s24 = scalar_lea.vmem (!%p313_p10), [#allocation3], %s1947_s14  ;;  %p1564_p11 = scmp.ne.s32.totalorder (!%p313_p10), %s1830_s20, 0 }
  0x25   : > { %v1945_v16 = vld [vmem:[%s2671_s1 + $0x1] ss:$0 sm:$0xff]  ;;  %v1953_v17 = vld [vmem:[%s1950_s15 + $0x70] sm:$0xff]  ;;  %v1959_v19 = vld [vmem:[%s1950_s15 + $0x78] sm:$0xff] }
  0x26   : > { %v1956_v18 = vld [vmem:[%s1950_s15 + $0x60] sm:$0xff]  ;;  %426 = vrot.lane.b32.xlu0 %v1953_v17, %s1840_s16  ;;  %v1968_v21 = vld [vmem:[%s1950_s15 + $0x68] sm:$0xff]  ;;  %v494_v22 = vmul.f32 %v1945_v16, %v1953_v17  ;;  %v495_v23 = vmul.f32 %v1945_v16, %v1959_v19  ;;  %v1977_v25 = vld [vmem:[%s1950_s15 + $0x58] sm:$0xff] }
  0x27   : > { %422 = vrot.lane.b32.xlu1 %v1956_v18, %s1840_s16  ;;  %v492_v20 = vmul.f32 %v1945_v16, %v1956_v18  ;;  %v493_v24 = vmul.f32 %v1945_v16, %v1968_v21  ;;  %v1980_v26 = vld [vmem:[%s1950_s15 + $0x50] sm:$0xff]  ;;  %v491_v28 = vmul.f32 %v1945_v16, %v1977_v25  ;;  %v1991_v31 = vld [vmem:[%s1950_s15 + $0x48] sm:$0xff]  ;;  %v1994_v32 = vld [vmem:[%s1950_s15 + $0x40] sm:$0xff] }
  0x28   : > { %v503_v27 = vpack.c.bf16 %v495_v23, %v494_v22  ;;  %v490_v29 = vmul.f32 %v1945_v16, %v1980_v26  ;;  %v489_v33 = vmul.f32 %v1945_v16, %v1991_v31  ;;  %v488_v34 = vmul.f32 %v1945_v16, %v1994_v32  ;;  %v2005_v36 = vld [vmem:[%s1950_s15 + $0x38] sm:$0xff]  ;;  %v2008_v37 = vld [vmem:[%s1950_s15 + $0x30] sm:$0xff]  ;;  %v387_v41 = vld [vmem:[%s1950_s15 + $0x28] sm:$0xff] }
  0x29   : > { %v502_v30 = vpack.c.bf16 %v493_v24, %v492_v20  ;;  %v487_v38 = vmul.f32 %v1945_v16, %v2005_v36  ;;  %v486_v39 = vmul.f32 %v1945_v16, %v2008_v37  ;;  %v386_v42 = vld [vmem:[%s1950_s15 + $0x20] sm:$0xff]  ;;  %v485_v43 = vmul.f32 %v1945_v16, %v387_v41  ;;  %v385_v46 = vld [vmem:[%s1950_s15 + $0x18] sm:$0xff]  ;;  %v384_v47 = vld [vmem:[%s1950_s15 + $0x10] sm:$0xff] }
  0x2a   : > { %428 = vrot.lane.b32.xlu0 %v1959_v19, %s1840_s16  ;;  %1621 = vmatprep.subr.bf16.mxu0 %v503_v27  ;;  %v501_v35 = vpack.c.bf16 %v491_v28, %v490_v29  ;;  %v500_v40 = vpack.c.bf16 %v489_v33, %v488_v34  ;;  %v484_v44 = vmul.f32 %v1945_v16, %v386_v42  ;;  %v1776_v48 = vld [vmem:[%s2672_s2 + $0x4] ss:$12 sps:$4 sm:$0xff]   ;;  %v383_v52 = vld [vmem:[%s1950_s15 + $0x8] sm:$0xff]  ;;  %v1780_v60 = vld [vmem:[%s2672_s2 + $0x34] ss:$12 sps:$4 sm:$0xff]  }
  0x2b   : > { %424 = vrot.lane.b32.xlu1 %v1968_v21, %s1840_s16  ;;  %1622 = vmatpush3.bf16.msra.mxu0 %v503_v27  ;;  %v499_v45 = vpack.c.bf16 %v487_v38, %v486_v39  ;;  %v483_v49 = vmul.f32 %v1945_v16, %v385_v46  ;;  %v482_v50 = vmul.f32 %v1945_v16, %v384_v47  ;;  %v382_v53 = vld [vmem:[%s1950_s15] sm:$0xff]  ;;  %v1777_v59 = vld [vmem:[%s2672_s2 + $0x1c] ss:$12 sps:$4 sm:$0xff]   ;;  %v1781_v61 = vld [vmem:[%s2672_s2 + $0x4c] ss:$12 sps:$4 sm:$0xff]  }
  0x2c   : > { %1623 = vmatprep.subr.bf16.mxu0 %v502_v30  ;;  %v498_v51 = vpack.c.bf16 %v485_v43, %v484_v44  ;;  %1637 = vmatprep.mubr.bf16.mxu0 %v1776_v48  ;;  %v481_v54 = vmul.f32 %v1945_v16, %v383_v52  ;;  %v480_v55 = vmul.f32 %v1945_v16, %v382_v53  ;;  %v1778_v57 = vld [vmem:[%s2672_s2] ss:$12 sps:$4 sm:$0xff]   ;;  %v1784_v62 = vld [vmem:[%s2672_s2 + $0x64] ss:$12 sps:$4 sm:$0xff]   ;;  %v1785_v63 = vld [vmem:[%s2672_s2 + $0x7c] ss:$12 sps:$4 sm:$0xff]  }
  0x2d   : > { %v497_v56 = vpack.c.bf16 %v483_v49, %v482_v50  ;;  %1669 = vmatprep.mubr.bf16.mxu1 %v1778_v57  ;;  %v1788_v0 = vld [vmem:[%s2672_s2 + $0x94] ss:$12 sps:$4 sm:$0xff]   ;;  %v1789_v1 = vld [vmem:[%s2672_s2 + $0xac] ss:$12 sps:$4 sm:$0xff]  }
  0x2e   : > { %418 = vrot.lane.b32.xlu0 %v1980_v26, %s1840_s16  ;;  %v496_v58 = vpack.c.bf16 %v481_v54, %v480_v55  ;;  %v1792_v2 = vld [vmem:[%s2672_s2 + $0x8] ss:$12 sps:$4 sm:$0xff]   ;;  %v1537_v5 = vld [vmem:[%s2671_s1] ss:$0 sm:$0xff]  ;;  %v2102_v43 = vld [vmem:[%s2671_s1 + $0x2] ss:$0 sm:$0xff] }
  0x2f   : > { %420 = vrot.lane.b32.xlu1 %v1977_v25, %s1840_s16  ;;  %1624 = vmatpush3.bf16.msra.mxu0 %v502_v30  ;;  %v1779_v54 = vld [vmem:[%s2672_s2 + $0x18] ss:$12 sps:$4 sm:$0xff]  }
  0x30   : > { %1625 = vmatprep.subr.bf16.mxu0 %v501_v35 }
  0x32   : > { %414 = vrot.lane.b32.xlu0 %v1994_v32, %s1840_s16 }
  0x33   : > { %416 = vrot.lane.b32.xlu1 %v1991_v31, %s1840_s16  ;;  %1626 = vmatpush3.bf16.msra.mxu0 %v501_v35 }
  0x34   : > { %1627 = vmatprep.subr.bf16.mxu0 %v500_v40 }
  0x36   : > { %410 = vrot.lane.b32.xlu0 %v2008_v37, %s1840_s16 }
  0x37   : > { %412 = vrot.lane.b32.xlu1 %v2005_v36, %s1840_s16  ;;  %1628 = vmatpush3.bf16.msra.mxu0 %v500_v40 }
  0x38   : > { %1629 = vmatprep.subr.bf16.mxu0 %v499_v45 }
  0x3a   : > { %406 = vrot.lane.b32.xlu0 %v386_v42, %s1840_s16 }
  0x3b   : > { %408 = vrot.lane.b32.xlu1 %v387_v41, %s1840_s16  ;;  %1630 = vmatpush3.bf16.msra.mxu0 %v499_v45 }
  0x3c   : > { %1631 = vmatprep.subr.bf16.mxu0 %v498_v51 }
  0x3e   : > { %402 = vrot.lane.b32.xlu0 %v384_v47, %s1840_s16 }
  0x3f   : > { %404 = vrot.lane.b32.xlu1 %v385_v46, %s1840_s16  ;;  %1632 = vmatpush3.bf16.msra.mxu0 %v498_v51 }
  0x40   : > { %1633 = vmatprep.subr.bf16.mxu0 %v497_v56 }
  0x42   : > { %398 = vrot.lane.b32.xlu0 %v382_v53, %s1840_s16 }
  0x43   : > { %400 = vrot.lane.b32.xlu1 %v383_v52, %s1840_s16  ;;  %1634 = vmatpush3.bf16.msra.mxu0 %v497_v56  ;;  %v1782_v56 = vld [vmem:[%s2672_s2 + $0x30] ss:$12 sps:$4 sm:$0xff]  }
  0x44   : > { %1635 = vmatprep.subr.bf16.mxu0 %v496_v58 }
  0x46   : > { %838 = vrot.lane.b32.xlu0 %v1953_v17, %s1841_s26 }
  0x47   : > { %840 = vrot.lane.b32.xlu1 %v1959_v19, %s1841_s26  ;;  %1636 = vmatpush3.bf16.msra.mxu0 %v496_v58 }
  0x4a   : > { %834 = vrot.lane.b32.xlu0 %v1956_v18, %s1841_s26  ;;  %1638 = vmatmul.mubr.bf16.vlgmr.msra.gmra.mxu0 %v1777_v59 }
  0x4b   : > { %836 = vrot.lane.b32.xlu1 %v1968_v21, %s1841_s26  ;;  %1641 = vmatprep.mubr.bf16.mxu0 %v1780_v60 }
  0x4e   : > { %830 = vrot.lane.b32.xlu0 %v1980_v26, %s1841_s26 }
  0x4f   : > { %832 = vrot.lane.b32.xlu1 %v1977_v25, %s1841_s26 }
  0x52   : > { %826 = vrot.lane.b32.xlu0 %v1994_v32, %s1841_s26  ;;  %1642 = vmatmul.mubr.bf16.gmra.mxu0 %v1781_v61 }
  0x53   : > { %828 = vrot.lane.b32.xlu1 %v1991_v31, %s1841_s26  ;;  %1645 = vmatprep.mubr.bf16.mxu0 %v1784_v62 }
  0x56   : > { %822 = vrot.lane.b32.xlu0 %v2008_v37, %s1841_s26 }
  0x57   : > { %824 = vrot.lane.b32.xlu1 %v2005_v36, %s1841_s26 }
  0x5a   : > { %818 = vrot.lane.b32.xlu0 %v386_v42, %s1841_s26  ;;  %1646 = vmatmul.mubr.bf16.gmra.mxu0 %v1785_v63 }
  0x5b   : > { %820 = vrot.lane.b32.xlu1 %v387_v41, %s1841_s26  ;;  %1649 = vmatprep.mubr.bf16.mxu0 %v1788_v0 }
  0x5e   : > { %814 = vrot.lane.b32.xlu0 %v384_v47, %s1841_s26 }
  0x5f   : > { %816 = vrot.lane.b32.xlu1 %v385_v46, %s1841_s26 }
  0x62   : > { %810 = vrot.lane.b32.xlu0 %v382_v53, %s1841_s26  ;;  %1650 = vmatmul.mubr.bf16.gmra.mxu0 %v1789_v1 }
  0x63   : > { %812 = vrot.lane.b32.xlu1 %v383_v52, %s1841_s26  ;;  %1701 = vmatprep.mubr.bf16.mxu0 %v1792_v2  ;;  %v1783_v2 = vld [vmem:[%s2672_s2 + $0x48] ss:$12 sps:$4 sm:$0xff]  }
  0x98   : > { %v427_v3 = vpop.permute.xlu0 %426 }
  0x99   : > { %v423_v4 = vpop.permute.xlu1 %422  ;;  %v449_v8 = vmul.f32 %v1537_v5, %v427_v3 }
  0x9a   : > { %v447_v9 = vmul.f32 %v1537_v5, %v423_v4  ;;  %v1786_v4 = vld [vmem:[%s2672_s2 + $0x60] ss:$12 sps:$4 sm:$0xff]  }
  0x9c   : > { %v429_v6 = vpop.permute.xlu0 %428 }
  0x9d   : > { %v425_v7 = vpop.permute.xlu1 %424  ;;  %v450_v10 = vmul.f32 %v1537_v5, %v429_v6 }
  0x9e   : > { %v448_v11 = vmul.f32 %v1537_v5, %v425_v7 }
  0x9f   : > { %v458_v12 = vpack.c.bf16 %v450_v10, %v449_v8 }
  0xa0   : > { %v419_v14 = vpop.permute.xlu0 %418  ;;  %v457_v15 = vpack.c.bf16 %v448_v11, %v447_v9 }
  0xa1   : > { %v421_v13 = vpop.permute.xlu1 %420  ;;  %v445_v17 = vmul.f32 %v1537_v5, %v419_v14  ;;  %1653 = vmatprep.subr.bf16.mxu1 %v458_v12  ;;  %v1787_v14 = vld [vmem:[%s2672_s2 + $0x78] ss:$12 sps:$4 sm:$0xff]  }
  0xa2   : > { %v446_v16 = vmul.f32 %v1537_v5, %v421_v13  ;;  %1654 = vmatpush3.bf16.msra.mxu1 %v458_v12 }
  0xa3   : > { %1655 = vmatprep.subr.bf16.mxu1 %v457_v15 }
  0xa4   : > { %v456_v18 = vpack.c.bf16 %v446_v16, %v445_v17  ;;  %v415_v20 = vpop.permute.xlu0 %414  ;;  %v1790_v16 = vld [vmem:[%s2672_s2 + $0x90] ss:$12 sps:$4 sm:$0xff]  }
  0xa5   : > { %v417_v19 = vpop.permute.xlu1 %416  ;;  %v443_v22 = vmul.f32 %v1537_v5, %v415_v20 }
  0xa6   : > { %v444_v21 = vmul.f32 %v1537_v5, %v417_v19  ;;  %1656 = vmatpush3.bf16.msra.mxu1 %v457_v15 }
  0xa7   : > { %1657 = vmatprep.subr.bf16.mxu1 %v456_v18 }
  0xa8   : > { %v455_v23 = vpack.c.bf16 %v444_v21, %v443_v22  ;;  %v411_v25 = vpop.permute.xlu0 %410 }
  0xa9   : > { %v413_v24 = vpop.permute.xlu1 %412  ;;  %v441_v27 = vmul.f32 %v1537_v5, %v411_v25 }
  0xaa   : > { %v442_v26 = vmul.f32 %v1537_v5, %v413_v24  ;;  %1658 = vmatpush3.bf16.msra.mxu1 %v456_v18 }
  0xab   : > { %1659 = vmatprep.subr.bf16.mxu1 %v455_v23 }
  0xac   : > { %v454_v28 = vpack.c.bf16 %v442_v26, %v441_v27  ;;  %v407_v30 = vpop.permute.xlu0 %406  ;;  %v1791_v26 = vld [vmem:[%s2672_s2 + $0xa8] ss:$12 sps:$4 sm:$0xff]  }
  0xad   : > { %v409_v29 = vpop.permute.xlu1 %408  ;;  %v439_v32 = vmul.f32 %v1537_v5, %v407_v30  ;;  %v1796_v30 = vld [vmem:[%s2672_s2 + $0x38] ss:$12 sps:$4 sm:$0xff]  }
  0xae   : > { %v440_v31 = vmul.f32 %v1537_v5, %v409_v29  ;;  %1660 = vmatpush3.bf16.msra.mxu1 %v455_v23  ;;  %v1793_v29 = vld [vmem:[%s2672_s2 + $0x20] ss:$12 sps:$4 sm:$0xff]  }
  0xaf   : > { %1661 = vmatprep.subr.bf16.mxu1 %v454_v28 }
  0xb0   : > { %v453_v33 = vpack.c.bf16 %v440_v31, %v439_v32  ;;  %v403_v35 = vpop.permute.xlu0 %402  ;;  %v1795_v31 = vld [vmem:[%s2672_s2 + $0x80] ss:$12 sps:$4 sm:$0xff]   ;;  %v1798_v32 = vld [vmem:[%s2672_s2 + $0x98] ss:$12 sps:$4 sm:$0xff]  }
  0xb1   : > { %v405_v34 = vpop.permute.xlu1 %404  ;;  %v437_v37 = vmul.f32 %v1537_v5, %v403_v35 }
  0xb2   : > { %v438_v36 = vmul.f32 %v1537_v5, %v405_v34  ;;  %1662 = vmatpush3.bf16.msra.mxu1 %v454_v28  ;;  %v1794_v28 = vld [vmem:[%s2672_s2 + $0x68] ss:$12 sps:$4 sm:$0xff]   ;;  %v1799_v34 = vld [vmem:[%s2672_s2 + $0xb0] ss:$12 sps:$4 sm:$0xff]  }
  0xb3   : > { %1663 = vmatprep.subr.bf16.mxu1 %v453_v33 }
  0xb4   : > { %v452_v38 = vpack.c.bf16 %v438_v36, %v437_v37  ;;  %v399_v40 = vpop.permute.xlu0 %398 }
  0xb5   : > { %v401_v39 = vpop.permute.xlu1 %400  ;;  %v435_v42 = vmul.f32 %v1537_v5, %v399_v40 }
  0xb6   : > { %v436_v41 = vmul.f32 %v1537_v5, %v401_v39  ;;  %1664 = vmatpush3.bf16.msra.mxu1 %v453_v33  ;;  %v1797_v33 = vld [vmem:[%s2672_s2 + $0x50] ss:$12 sps:$4 sm:$0xff]  }
  0xb7   : > { %1665 = vmatprep.subr.bf16.mxu1 %v452_v38 }
  0xb8   : > { %v451_v44 = vpack.c.bf16 %v436_v41, %v435_v42  ;;  %v839_v46 = vpop.permute.xlu0 %838 }
  0xb9   : > { %v841_v45 = vpop.permute.xlu1 %840  ;;  %v861_v48 = vmul.f32 %v2102_v43, %v839_v46 }
  0xba   : > { %v862_v47 = vmul.f32 %v2102_v43, %v841_v45  ;;  %1666 = vmatpush3.bf16.msra.mxu1 %v452_v38 }
  0xbb   : > { %1667 = vmatprep.subr.bf16.mxu1 %v451_v44 }
  0xbc   : > { %v870_v49 = vpack.c.bf16 %v862_v47, %v861_v48  ;;  %v835_v51 = vpop.permute.xlu0 %834 }
  0xbd   : > { %v837_v50 = vpop.permute.xlu1 %836  ;;  %v859_v53 = vmul.f32 %v2102_v43, %v835_v51 }
  0xbe   : > { %v860_v52 = vmul.f32 %v2102_v43, %v837_v50  ;;  %1685 = vmatprep.subr.bf16.mxu0 %v870_v49  ;;  %1668 = vmatpush3.bf16.msra.mxu1 %v451_v44 }
  0xbf   : > { %1686 = vmatpush3.bf16.msra.mxu0 %v870_v49  ;;  %1717 = vmatprep.subr.bf16.mxu1 %v870_v49 }
  0xc0   : > { %v869_v55 = vpack.c.bf16 %v860_v52, %v859_v53  ;;  %v831_v58 = vpop.permute.xlu0 %830 }
  0xc1   : > { %v833_v57 = vpop.permute.xlu1 %832  ;;  %v857_v60 = vmul.f32 %v2102_v43, %v831_v58  ;;  %1670 = vmatmul.mubr.bf16.vlgmr.msra.gmra.mxu1 %v1779_v54 }
  0xc2   : > { %v858_v59 = vmul.f32 %v2102_v43, %v833_v57  ;;  %1687 = vmatprep.subr.bf16.mxu0 %v869_v55  ;;  %1725 = vmatpush3.bf16.msra.mxu1 %v870_v49 }
  0xc3   : > { %1688 = vmatpush3.bf16.msra.mxu0 %v869_v55  ;;  %1718 = vmatprep.subr.bf16.mxu1 %v869_v55 }
  0xc4   : > { %v868_v61 = vpack.c.bf16 %v858_v59, %v857_v60  ;;  %1673 = vmatprep.mubr.bf16.mxu1 %v1782_v56  ;;  %v827_v63 = vpop.permute.xlu0 %826 }
  0xc5   : > { %v829_v62 = vpop.permute.xlu1 %828  ;;  %v855_v1 = vmul.f32 %v2102_v43, %v827_v63 }
  0xc6   : > { %v856_v0 = vmul.f32 %v2102_v43, %v829_v62  ;;  %1689 = vmatprep.subr.bf16.mxu0 %v868_v61  ;;  %1726 = vmatpush3.bf16.msra.mxu1 %v869_v55 }
  0xc7   : > { %1690 = vmatpush3.bf16.msra.mxu0 %v868_v61  ;;  %1719 = vmatprep.subr.bf16.mxu1 %v868_v61 }
  0xc8   : > { %v867_v3 = vpack.c.bf16 %v856_v0, %v855_v1  ;;  %v823_v6 = vpop.permute.xlu0 %822 }
  0xc9   : > { %v825_v5 = vpop.permute.xlu1 %824  ;;  %v853_v8 = vmul.f32 %v2102_v43, %v823_v6  ;;  %1674 = vmatmul.mubr.bf16.gmra.mxu1 %v1783_v2 }
  0xca   : > { %v854_v7 = vmul.f32 %v2102_v43, %v825_v5  ;;  %1691 = vmatprep.subr.bf16.mxu0 %v867_v3  ;;  %1727 = vmatpush3.bf16.msra.mxu1 %v868_v61 }
  0xcb   : > { %1692 = vmatpush3.bf16.msra.mxu0 %v867_v3  ;;  %1720 = vmatprep.subr.bf16.mxu1 %v867_v3 }
  0xcc   : > { %v866_v9 = vpack.c.bf16 %v854_v7, %v853_v8  ;;  %1677 = vmatprep.mubr.bf16.mxu1 %v1786_v4  ;;  %v819_v11 = vpop.permute.xlu0 %818 }
  0xcd   : > { %v821_v10 = vpop.permute.xlu1 %820  ;;  %v851_v13 = vmul.f32 %v2102_v43, %v819_v11 }
  0xce   : > { %v852_v12 = vmul.f32 %v2102_v43, %v821_v10  ;;  %1693 = vmatprep.subr.bf16.mxu0 %v866_v9  ;;  %1728 = vmatpush3.bf16.msra.mxu1 %v867_v3 }
  0xcf   : > { %1694 = vmatpush3.bf16.msra.mxu0 %v866_v9  ;;  %1721 = vmatprep.subr.bf16.mxu1 %v866_v9 }
  0xd0   : > { %v865_v15 = vpack.c.bf16 %v852_v12, %v851_v13  ;;  %v815_v18 = vpop.permute.xlu0 %814 }
  0xd1   : > { %v817_v17 = vpop.permute.xlu1 %816  ;;  %v849_v20 = vmul.f32 %v2102_v43, %v815_v18  ;;  %1678 = vmatmul.mubr.bf16.gmra.mxu1 %v1787_v14 }
  0xd2   : > { %v850_v19 = vmul.f32 %v2102_v43, %v817_v17  ;;  %1695 = vmatprep.subr.bf16.mxu0 %v865_v15  ;;  %1729 = vmatpush3.bf16.msra.mxu1 %v866_v9 }
  0xd3   : > { %1696 = vmatpush3.bf16.msra.mxu0 %v865_v15  ;;  %1722 = vmatprep.subr.bf16.mxu1 %v865_v15 }
  0xd4   : > { %v864_v21 = vpack.c.bf16 %v850_v19, %v849_v20  ;;  %1681 = vmatprep.mubr.bf16.mxu1 %v1790_v16  ;;  %v811_v23 = vpop.permute.xlu0 %810 }
  0xd5   : > { %v813_v22 = vpop.permute.xlu1 %812  ;;  %v847_v25 = vmul.f32 %v2102_v43, %v811_v23 }
  0xd6   : > { %v848_v24 = vmul.f32 %v2102_v43, %v813_v22  ;;  %1697 = vmatprep.subr.bf16.mxu0 %v864_v21  ;;  %1730 = vmatpush3.bf16.msra.mxu1 %v865_v15 }
  0xd7   : > { %1698 = vmatpush3.bf16.msra.mxu0 %v864_v21  ;;  %1723 = vmatprep.subr.bf16.mxu1 %v864_v21 }
  0xd8   : > { %v863_v27 = vpack.c.bf16 %v848_v24, %v847_v25 }
  0xd9   : > { %1682 = vmatmul.mubr.bf16.gmra.mxu1 %v1791_v26 }
  0xda   : > { %1699 = vmatprep.subr.bf16.mxu0 %v863_v27  ;;  %1731 = vmatpush3.bf16.msra.mxu1 %v864_v21 }
  0xdb   : > { %1700 = vmatpush3.bf16.msra.mxu0 %v863_v27  ;;  %1724 = vmatprep.subr.bf16.mxu1 %v863_v27 }
  0xdc   : > { %1709 = vmatprep.mubr.bf16.mxu1 %v1794_v28 }
  0xde   : > { %1702 = vmatmul.mubr.bf16.vlgmr.msra.gmra.mxu0 %v1793_v29  ;;  %1732 = vmatpush3.bf16.msra.mxu1 %v863_v27 }
  0xdf   : > { %1705 = vmatprep.mubr.bf16.mxu0 %v1796_v30 }
  0xe1   : > { %1710 = vmatmul.mubr.bf16.vlgmr.msra.gmra.mxu1 %v1795_v31 }
  0xe2   : > { %1713 = vmatprep.mubr.bf16.mxu1 %v1798_v32 }
  0xe6   : > { %1706 = vmatmul.mubr.bf16.gmra.mxu0 %v1797_v33 }
  0xe9   : > { %1714 = vmatmul.mubr.bf16.gmra.mxu1 %v1799_v34 }
 0x10a   : > { %v1639_v35 = vpop.f32.mrf.mxu0 }
 0x10c   : > { %v602_v36 = vpop.f32.mrf.mxu0 }
 0x10e   : > { %v1640_v37 = vpop.f32.mrf.mxu0 }
 0x110   : > { %v605_v38 = vpop.f32.mrf.mxu0 }
 0x112   : > { %v1643_v39 = vpop.f32.mrf.mxu0 }
 0x114   : > { %v618_v40 = vpop.f32.mrf.mxu0 }
 0x116   : > { %v1644_v41 = vpop.f32.mrf.mxu0 }
 0x118   : > { %v2162_v42 = vpop.f32.mrf.mxu0 }
 0x11a   : > { %v1647_v43 = vpop.f32.mrf.mxu0 }
 0x11c   : > { %v634_v46 = vpop.f32.mrf.mxu0 }
 0x11e   : > { %v1648_v49 = vpop.f32.mrf.mxu0 }
 0x120   : > { %v637_v52 = vpop.f32.mrf.mxu0 }
 0x122   : > { %v1651_v55 = vpop.f32.mrf.mxu0 }
 0x124   : > { %v650_v58 = vpop.f32.mrf.mxu0 }
 0x126   : > { %v1652_v61 = vpop.f32.mrf.mxu0 }
 0x128   : > { %v653_v63 = vpop.f32.mrf.mxu0 }
 0x181   : > { %v1671_v44 = vpop.f32.mrf.mxu1 }
 0x182   : > { %v756_v1 = vadd.f32 %v1671_v44, %v1639_v35 }
 0x183   : > { %v747_v45 = vpop.f32.mrf.mxu1 }
 0x184   : > { %v748_v4 = vadd.f32 %v747_v45, %v602_v36 }
 0x185   : > { %v1672_v47 = vpop.f32.mrf.mxu1 }
 0x186   : > { %v759_v8 = vadd.f32 %v1672_v47, %v1640_v37 }
 0x187   : > { %v750_v48 = vpop.f32.mrf.mxu1 }
 0x188   : > { %v751_v13 = vadd.f32 %v750_v48, %v605_v38 }
 0x189   : > { %v1675_v50 = vpop.f32.mrf.mxu1 }
 0x18a   : > { %v772_v19 = vadd.f32 %v1675_v50, %v1643_v39 }
 0x18b   : > { %v763_v51 = vpop.f32.mrf.mxu1 }
 0x18c   : > { %v764_v25 = vadd.f32 %v763_v51, %v618_v40 }
 0x18d   : > { %v1676_v53 = vpop.f32.mrf.mxu1 }
 0x18e   : > { %v775_v31 = vadd.f32 %v1676_v53, %v1644_v41 }
 0x18f   : > { %v766_v54 = vpop.f32.mrf.mxu1 }
 0x190   : > { %v767_v37 = vadd.f32 %v766_v54, %v2162_v42 }
 0x191   : > { %v1679_v56 = vpop.f32.mrf.mxu1 }
 0x192   : > { %v788_v9 = vadd.f32 %v1679_v56, %v1647_v43 }
 0x193   : > { %v779_v57 = vpop.f32.mrf.mxu1 }
 0x194   : > { %v780_v14 = vadd.f32 %v779_v57, %v634_v46 }
 0x195   : > { %v1680_v59 = vpop.f32.mrf.mxu1 }
 0x196   : > { %v791_v20 = vadd.f32 %v1680_v59, %v1648_v49 }
 0x197   : > { %v782_v60 = vpop.f32.mrf.mxu1 }
 0x198   : > { %v783_v26 = vadd.f32 %v782_v60, %v637_v52 }
 0x199   : > { %v1683_v62 = vpop.f32.mrf.mxu1 }
 0x19a   : > { %v804_v32 = vadd.f32 %v1683_v62, %v1651_v55 }
 0x19b   : > { %v795_v0 = vpop.f32.mrf.mxu1 }
 0x19c   : > { %v796_v38 = vadd.f32 %v795_v0, %v650_v58 }
 0x19d   : > { %v1684_v2 = vpop.f32.mrf.mxu1 }
 0x19e   : > { %v1703_v3 = vpop.f32.mrf.mxu0  ;;  %v807_v44 = vadd.f32 %v1684_v2, %v1652_v61 }
 0x19f   : > { %v2164_v5 = vadd.f32 %v1703_v3, %v756_v1  ;;  %v798_v6 = vpop.f32.mrf.mxu1 }
 0x1a0   : > { %v969_v7 = vpop.f32.mrf.mxu0  ;;  %v799_v47 = vadd.f32 %v798_v6, %v653_v63 }
 0x1a1   : > { %1050 = vst [vmem:[%s2167_s24 + $0x10] sm:$0xff] %v2164_v5  ;;  %v2171_v10 = vadd.f32 %v969_v7, %v748_v4  ;;  %v1711_v12 = vpop.f32.mrf.mxu1 }
 0x1a2   : > { %v1704_v11 = vpop.f32.mrf.mxu0  ;;  %v2177_v16 = vadd.f32 %v1711_v12, %v788_v9 }
 0x1a3   : > { %1048 = vst [vmem:[%s2167_s24] sm:$0xff] %v2171_v10  ;;  %v2175_v15 = vadd.f32 %v1704_v11, %v759_v8  ;;  %v1001_v18 = vpop.f32.mrf.mxu1 }
 0x1a4   : > { %v972_v17 = vpop.f32.mrf.mxu0  ;;  %1058 = vst [vmem:[%s2167_s24 + $0x50] sm:$0xff] %v2177_v16  ;;  %v2185_v22 = vadd.f32 %v1001_v18, %v780_v14 }
 0x1a5   : > { %1051 = vst [vmem:[%s2167_s24 + $0x18] sm:$0xff] %v2175_v15  ;;  %v2183_v21 = vadd.f32 %v972_v17, %v751_v13  ;;  %v1712_v24 = vpop.f32.mrf.mxu1 }
 0x1a6   : > { %v1707_v23 = vpop.f32.mrf.mxu0  ;;  %1056 = vst [vmem:[%s2167_s24 + $0x40] sm:$0xff] %v2185_v22  ;;  %v2193_v28 = vadd.f32 %v1712_v24, %v791_v20 }
 0x1a7   : > { %1049 = vst [vmem:[%s2167_s24 + $0x8] sm:$0xff] %v2183_v21  ;;  %v2191_v27 = vadd.f32 %v1707_v23, %v772_v19  ;;  %v1004_v30 = vpop.f32.mrf.mxu1 }
 0x1a8   : > { %v985_v29 = vpop.f32.mrf.mxu0  ;;  %1059 = vst [vmem:[%s2167_s24 + $0x58] sm:$0xff] %v2193_v28  ;;  %v2201_v34 = vadd.f32 %v1004_v30, %v783_v26 }
 0x1a9   : > { %1054 = vst [vmem:[%s2167_s24 + $0x30] sm:$0xff] %v2191_v27  ;;  %v2199_v33 = vadd.f32 %v985_v29, %v764_v25  ;;  %v1715_v36 = vpop.f32.mrf.mxu1 }
 0x1aa   : > { %v1708_v35 = vpop.f32.mrf.mxu0  ;;  %1057 = vst [vmem:[%s2167_s24 + $0x48] sm:$0xff] %v2201_v34  ;;  %v2210_v40 = vadd.f32 %v1715_v36, %v804_v32 }
 0x1ab   : > { %1052 = vst [vmem:[%s2167_s24 + $0x20] sm:$0xff] %v2199_v33  ;;  %v2208_v39 = vadd.f32 %v1708_v35, %v775_v31  ;;  %v1017_v43 = vpop.f32.mrf.mxu1 }
 0x1ac   : > { %v988_v41 = vpop.f32.mrf.mxu0  ;;  %1062 = vst [vmem:[%s2167_s24 + $0x70] sm:$0xff] %v2210_v40  ;;  %v2218_v45 = vadd.f32 %v1017_v43, %v796_v38 }
 0x1ad   : > { %1055 = vst [vmem:[%s2167_s24 + $0x38] sm:$0xff] %v2208_v39  ;;  %v2216_v42 = vadd.f32 %v988_v41, %v767_v37  ;;  %v1716_v46 = vpop.f32.mrf.mxu1 }
 0x1ae   : > { %1060 = vst [vmem:[%s2167_s24 + $0x60] sm:$0xff] %v2218_v45  ;;  %v2224_v48 = vadd.f32 %v1716_v46, %v807_v44  ;;  %1067 = sbr.rel (%p1564_p11) target bundleno = 452 (0x1c4), region = 74 }
 0x1af   : > { %1053 = vst [vmem:[%s2167_s24 + $0x28] sm:$0xff] %v2216_v42  ;;  %v1020_v49 = vpop.f32.mrf.mxu1 }
 0x1b0   : > { %1063 = vst [vmem:[%s2167_s24 + $0x78] sm:$0xff] %v2224_v48  ;;  %v2228_v50 = vadd.f32 %v1020_v49, %v799_v47 }
 0x1b2   : > { %1061 = vst [vmem:[%s2167_s24 + $0x68] sm:$0xff] %v2228_v50 }
 0x1b3   : > { %vm1068_vm0 = vcmask 7168   ;;  %v1842_v51 = vmov 0.0  }
 0x1b4   : > { %1069 = vst.msk [vmem:[%s2674_s4] sm:$0xff] %vm1068_vm0, %v1842_v51  ;;  %1070 = vst.msk [vmem:[%s2674_s4 + $0x8] sm:$0xff] %vm1068_vm0, %v1842_v51 }
 0x1b5   : > { %1071 = vst.msk [vmem:[%s2674_s4 + $0x10] sm:$0xff] %vm1068_vm0, %v1842_v51  ;;  %1072 = vst.msk [vmem:[%s2674_s4 + $0x18] sm:$0xff] %vm1068_vm0, %v1842_v51 }
 0x1b6   : > { %1073 = vst.msk [vmem:[%s2674_s4 + $0x20] sm:$0xff] %vm1068_vm0, %v1842_v51  ;;  %1074 = vst.msk [vmem:[%s2674_s4 + $0x28] sm:$0xff] %vm1068_vm0, %v1842_v51 }
 0x1b7   : > { %1075 = vst.msk [vmem:[%s2674_s4 + $0x30] sm:$0xff] %vm1068_vm0, %v1842_v51  ;;  %1076 = vst.msk [vmem:[%s2674_s4 + $0x38] sm:$0xff] %vm1068_vm0, %v1842_v51 }
 0x1b8   : > { %1077 = vst.msk [vmem:[%s2674_s4 + $0x40] sm:$0xff] %vm1068_vm0, %v1842_v51  ;;  %1078 = vst.msk [vmem:[%s2674_s4 + $0x48] sm:$0xff] %vm1068_vm0, %v1842_v51 }
 0x1b9   : > { %1079 = vst.msk [vmem:[%s2674_s4 + $0x50] sm:$0xff] %vm1068_vm0, %v1842_v51  ;;  %1080 = vst.msk [vmem:[%s2674_s4 + $0x58] sm:$0xff] %vm1068_vm0, %v1842_v51 }
 0x1ba   : > { %1081 = vst.msk [vmem:[%s2674_s4 + $0x60] sm:$0xff] %vm1068_vm0, %v1842_v51  ;;  %1082 = vst.msk [vmem:[%s2674_s4 + $0x68] sm:$0xff] %vm1068_vm0, %v1842_v51 }
 0x1bb   : > { %1083 = vst.msk [vmem:[%s2674_s4 + $0x70] sm:$0xff] %vm1068_vm0, %v1842_v51  ;;  %1084 = vst.msk [vmem:[%s2674_s4 + $0x78] sm:$0xff] %vm1068_vm0, %v1842_v51 }
 0x1bc   : > { %1085 = vst.msk [vmem:[%s2675_s5] sm:$0xff] %vm1068_vm0, %v1842_v51  ;;  %1086 = vst.msk [vmem:[%s2675_s5 + $0x8] sm:$0xff] %vm1068_vm0, %v1842_v51 }
 0x1bd   : > { %1087 = vst.msk [vmem:[%s2675_s5 + $0x10] sm:$0xff] %vm1068_vm0, %v1842_v51  ;;  %1088 = vst.msk [vmem:[%s2675_s5 + $0x18] sm:$0xff] %vm1068_vm0, %v1842_v51 }
 0x1be   : > { %1089 = vst.msk [vmem:[%s2675_s5 + $0x20] sm:$0xff] %vm1068_vm0, %v1842_v51  ;;  %1090 = vst.msk [vmem:[%s2675_s5 + $0x28] sm:$0xff] %vm1068_vm0, %v1842_v51 }
 0x1bf   : > { %1091 = vst.msk [vmem:[%s2675_s5 + $0x30] sm:$0xff] %vm1068_vm0, %v1842_v51  ;;  %1092 = vst.msk [vmem:[%s2675_s5 + $0x38] sm:$0xff] %vm1068_vm0, %v1842_v51 }
 0x1c0   : > { %1093 = vst.msk [vmem:[%s2675_s5 + $0x40] sm:$0xff] %vm1068_vm0, %v1842_v51  ;;  %1094 = vst.msk [vmem:[%s2675_s5 + $0x48] sm:$0xff] %vm1068_vm0, %v1842_v51 }
 0x1c1   : > { %1095 = vst.msk [vmem:[%s2675_s5 + $0x50] sm:$0xff] %vm1068_vm0, %v1842_v51  ;;  %1096 = vst.msk [vmem:[%s2675_s5 + $0x58] sm:$0xff] %vm1068_vm0, %v1842_v51 }
 0x1c2   : > { %1097 = vst.msk [vmem:[%s2675_s5 + $0x60] sm:$0xff] %vm1068_vm0, %v1842_v51  ;;  %1098 = vst.msk [vmem:[%s2675_s5 + $0x68] sm:$0xff] %vm1068_vm0, %v1842_v51 }
 0x1c3   : > { %1099 = vst.msk [vmem:[%s2675_s5 + $0x70] sm:$0xff] %vm1068_vm0, %v1842_v51  ;;  %1100 = vst.msk [vmem:[%s2675_s5 + $0x78] sm:$0xff] %vm1068_vm0, %v1842_v51 }
 0x1c4 PF: > { %1121 = vadd.xlane.f32.xlu1 %v2164_v5  ;;  %1117 = vadd.xlane.f32.xlu0 %v2171_v10  ;;  %v1199_v52 = vmul.f32 %v2183_v21, %v2183_v21  ;;  %v1198_v53 = vmul.f32 %v2171_v10, %v2171_v10  ;;  %v1201_v54 = vmul.f32 %v2175_v15, %v2175_v15  ;;  %v1103_v4 = vld [vmem:[%s2674_s4 + $0x10] sm:$0xff]  ;;  %vm1165_vm1 = vcmask 7168   ;;  %v1104_v10 = vld [vmem:[%s2674_s4 + $0x18] sm:$0xff]  ;;  %v1102_v11 = vld [vmem:[%s2674_s4 + $0x8] sm:$0xff]  ;;  %s1566_s6 = sshll.u32 (%p1908_p6), %s1830_s20, 3 }
 0x1c5   : > { %v1200_v55 = vmul.f32 %v2164_v5, %v2164_v5  ;;  %v1203_v56 = vmul.f32 %v2216_v42, %v2216_v42  ;;  %v1202_v57 = vmul.f32 %v2199_v33, %v2199_v33  ;;  %v1205_v58 = vmul.f32 %v2208_v39, %v2208_v39  ;;  %v1101_v5 = vld [vmem:[%s2674_s4] sm:$0xff]  ;;  %v1107_v23 = vld [vmem:[%s2674_s4 + $0x30] sm:$0xff]  ;;  %v1116_v46 = vld [vmem:[%s2674_s4 + $0x78] sm:$0xff]  ;;  %s1299_s9 = scalar_lea.vmem (%p1908_p6), %s2673_s3, %s1566_s6 }
 0x1c6   : > { %v1204_v59 = vmul.f32 %v2191_v27, %v2191_v27  ;;  %v1207_v60 = vmul.f32 %v2201_v34, %v2201_v34  ;;  %v1206_v61 = vmul.f32 %v2185_v22, %v2185_v22  ;;  %v1209_v62 = vmul.f32 %v2193_v28, %v2193_v28  ;;  %v1105_v17 = vld [vmem:[%s2674_s4 + $0x20] sm:$0xff]  ;;  %v1111_v35 = vld [vmem:[%s2674_s4 + $0x50] sm:$0xff] }
 0x1c7   : > { %v1208_v63 = vmul.f32 %v2177_v16, %v2177_v16  ;;  %v1211_v0 = vmul.f32 %v2228_v50, %v2228_v50  ;;  %v1210_v1 = vmul.f32 %v2218_v45, %v2218_v45  ;;  %v1213_v2 = vmul.f32 %v2224_v48, %v2224_v48  ;;  %v1109_v29 = vld [vmem:[%s2674_s4 + $0x40] sm:$0xff]  ;;  %v1115_v47 = vld [vmem:[%s2674_s4 + $0x70] sm:$0xff] }
 0x1c8   : > { %1123 = vadd.xlane.f32.xlu1 %v2175_v15  ;;  %1119 = vadd.xlane.f32.xlu0 %v2183_v21  ;;  %v1212_v3 = vmul.f32 %v2210_v40, %v2210_v40  ;;  %v1113_v41 = vld [vmem:[%s2674_s4 + $0x60] sm:$0xff] }
 0x1cc   : > { %1127 = vadd.xlane.f32.xlu1 %v2216_v42  ;;  %1125 = vadd.xlane.f32.xlu0 %v2199_v33 }
 0x1d0   : > { %1131 = vadd.xlane.f32.xlu1 %v2208_v39  ;;  %1129 = vadd.xlane.f32.xlu0 %v2191_v27 }
 0x1d4   : > { %1135 = vadd.xlane.f32.xlu1 %v2201_v34  ;;  %1133 = vadd.xlane.f32.xlu0 %v2185_v22  ;;  %v1108_v22 = vld [vmem:[%s2674_s4 + $0x38] sm:$0xff] }
 0x1d5   : > { %v1112_v34 = vld [vmem:[%s2674_s4 + $0x58] sm:$0xff] }
 0x1d8   : > { %1139 = vadd.xlane.f32.xlu1 %v2193_v28  ;;  %1137 = vadd.xlane.f32.xlu0 %v2177_v16  ;;  %v1106_v16 = vld [vmem:[%s2674_s4 + $0x28] sm:$0xff] }
 0x1d9   : > { %v1110_v28 = vld [vmem:[%s2674_s4 + $0x48] sm:$0xff] }
 0x1dc   : > { %1143 = vadd.xlane.f32.xlu1 %v2228_v50  ;;  %1141 = vadd.xlane.f32.xlu0 %v2218_v45 }
 0x1e0   : > { %1147 = vadd.xlane.f32.xlu1 %v2224_v48  ;;  %1145 = vadd.xlane.f32.xlu0 %v2210_v40  ;;  %v1114_v40 = vld [vmem:[%s2674_s4 + $0x68] sm:$0xff] }
 0x1e4   : > { %1216 = vadd.xlane.f32.xlu1 %v1199_v52  ;;  %1214 = vadd.xlane.f32.xlu0 %v1198_v53  ;;  %v1183_v52 = vld [vmem:[%s2675_s5 + $0x8] sm:$0xff]  ;;  %v1182_v53 = vld [vmem:[%s2675_s5] sm:$0xff] }
 0x1e8   : > { %1220 = vadd.xlane.f32.xlu1 %v1201_v54  ;;  %1218 = vadd.xlane.f32.xlu0 %v1200_v55 }
 0x1ec   : > { %1224 = vadd.xlane.f32.xlu1 %v1203_v56  ;;  %1222 = vadd.xlane.f32.xlu0 %v1202_v57 }
 0x1f0   : > { %1228 = vadd.xlane.f32.xlu1 %v1205_v58  ;;  %1226 = vadd.xlane.f32.xlu0 %v1204_v59  ;;  %v1185_v58 = vld [vmem:[%s2675_s5 + $0x18] sm:$0xff]  ;;  %v1184_v59 = vld [vmem:[%s2675_s5 + $0x10] sm:$0xff] }
 0x1f4   : > { %1232 = vadd.xlane.f32.xlu1 %v1207_v60  ;;  %1230 = vadd.xlane.f32.xlu0 %v1206_v61 }
 0x1f8   : > { %1236 = vadd.xlane.f32.xlu1 %v1209_v62  ;;  %1234 = vadd.xlane.f32.xlu0 %v1208_v63 }
 0x1fc   : > { %1240 = vadd.xlane.f32.xlu1 %v1211_v0  ;;  %1238 = vadd.xlane.f32.xlu0 %v1210_v1  ;;  %v1187_v0 = vld [vmem:[%s2675_s5 + $0x28] sm:$0xff]  ;;  %v1186_v1 = vld [vmem:[%s2675_s5 + $0x20] sm:$0xff] }
 0x200   : > { %1244 = vadd.xlane.f32.xlu1 %v1213_v2  ;;  %1242 = vadd.xlane.f32.xlu0 %v1212_v3 }
 0x24d   : > { %v1122_v6 = vpop.xlane.xlu1 %1121  ;;  %v1118_v7 = vpop.xlane.xlu0 %1117 }
 0x24e   : > { %v1151_v8 = vadd.f32 %v1122_v6, %v1103_v4  ;;  %v1149_v9 = vadd.f32 %v1118_v7, %v1101_v5  ;;  %v1189_v6 = vld [vmem:[%s2675_s5 + $0x38] sm:$0xff]  ;;  %v1188_v7 = vld [vmem:[%s2675_s5 + $0x30] sm:$0xff] }
 0x250   : > { %1168 = vst.msk [vmem:[%s2674_s4 + $0x10] sm:$0xff] %vm1165_vm1, %v1151_v8  ;;  %1166 = vst.msk [vmem:[%s2674_s4] sm:$0xff] %vm1165_vm1, %v1149_v9 }
 0x251   : > { %v1124_v12 = vpop.xlane.xlu1 %1123  ;;  %v1120_v13 = vpop.xlane.xlu0 %1119 }
 0x252   : > { %v1152_v14 = vadd.f32 %v1124_v12, %v1104_v10  ;;  %v1150_v15 = vadd.f32 %v1120_v13, %v1102_v11  ;;  %v1191_v12 = vld [vmem:[%s2675_s5 + $0x48] sm:$0xff]  ;;  %v1190_v13 = vld [vmem:[%s2675_s5 + $0x40] sm:$0xff] }
 0x254   : > { %1169 = vst.msk [vmem:[%s2674_s4 + $0x18] sm:$0xff] %vm1165_vm1, %v1152_v14  ;;  %1167 = vst.msk [vmem:[%s2674_s4 + $0x8] sm:$0xff] %vm1165_vm1, %v1150_v15 }
 0x255   : > { %v1128_v18 = vpop.xlane.xlu1 %1127  ;;  %v1126_v19 = vpop.xlane.xlu0 %1125 }
 0x256   : > { %v1154_v20 = vadd.f32 %v1128_v18, %v1106_v16  ;;  %v1153_v21 = vadd.f32 %v1126_v19, %v1105_v17  ;;  %v1193_v18 = vld [vmem:[%s2675_s5 + $0x58] sm:$0xff]  ;;  %v1192_v19 = vld [vmem:[%s2675_s5 + $0x50] sm:$0xff] }
 0x258   : > { %1171 = vst.msk [vmem:[%s2674_s4 + $0x28] sm:$0xff] %vm1165_vm1, %v1154_v20  ;;  %1170 = vst.msk [vmem:[%s2674_s4 + $0x20] sm:$0xff] %vm1165_vm1, %v1153_v21 }
 0x259   : > { %v1132_v24 = vpop.xlane.xlu1 %1131  ;;  %v1130_v25 = vpop.xlane.xlu0 %1129 }
 0x25a   : > { %v1156_v26 = vadd.f32 %v1132_v24, %v1108_v22  ;;  %v1155_v27 = vadd.f32 %v1130_v25, %v1107_v23  ;;  %v1195_v24 = vld [vmem:[%s2675_s5 + $0x68] sm:$0xff]  ;;  %v1194_v25 = vld [vmem:[%s2675_s5 + $0x60] sm:$0xff] }
 0x25c   : > { %1173 = vst.msk [vmem:[%s2674_s4 + $0x38] sm:$0xff] %vm1165_vm1, %v1156_v26  ;;  %1172 = vst.msk [vmem:[%s2674_s4 + $0x30] sm:$0xff] %vm1165_vm1, %v1155_v27 }
 0x25d   : > { %v1136_v30 = vpop.xlane.xlu1 %1135  ;;  %v1134_v31 = vpop.xlane.xlu0 %1133 }
 0x25e   : > { %v1158_v32 = vadd.f32 %v1136_v30, %v1110_v28  ;;  %v1157_v33 = vadd.f32 %v1134_v31, %v1109_v29  ;;  %v1197_v30 = vld [vmem:[%s2675_s5 + $0x78] sm:$0xff]  ;;  %v1196_v31 = vld [vmem:[%s2675_s5 + $0x70] sm:$0xff] }
 0x260   : > { %1175 = vst.msk [vmem:[%s2674_s4 + $0x48] sm:$0xff] %vm1165_vm1, %v1158_v32  ;;  %1174 = vst.msk [vmem:[%s2674_s4 + $0x40] sm:$0xff] %vm1165_vm1, %v1157_v33 }
 0x261   : > { %v1140_v36 = vpop.xlane.xlu1 %1139  ;;  %v1138_v37 = vpop.xlane.xlu0 %1137 }
 0x262   : > { %v1160_v38 = vadd.f32 %v1140_v36, %v1112_v34  ;;  %v1159_v39 = vadd.f32 %v1138_v37, %v1111_v35  ;;  %v1358_v36 = vld [vmem:[%s2167_s24] sm:$0xff] (%p1908_p6)  ;;  %v1360_v37 = vld [vmem:[%s2167_s24 + $0x8] sm:$0xff] (%p1908_p6) }
 0x263   : > { %1359 = vst [vmem:[%s1299_s9] sm:$0xff] (%p1908_p6), %v1358_v36  ;;  %1361 = vst [vmem:[%s1299_s9 + $0x10] sm:$0xff] (%p1908_p6), %v1360_v37 }
 0x264   : > { %1177 = vst.msk [vmem:[%s2674_s4 + $0x58] sm:$0xff] %vm1165_vm1, %v1160_v38  ;;  %1176 = vst.msk [vmem:[%s2674_s4 + $0x50] sm:$0xff] %vm1165_vm1, %v1159_v39  ;;  %v1362_v38 = vld [vmem:[%s2167_s24 + $0x10] sm:$0xff] (%p1908_p6)  ;;  %v1364_v39 = vld [vmem:[%s2167_s24 + $0x18] sm:$0xff] (%p1908_p6) }
 0x265   : > { %v1144_v43 = vpop.xlane.xlu1 %1143  ;;  %v1142_v44 = vpop.xlane.xlu0 %1141  ;;  %1363 = vst [vmem:[%s1299_s9 + $0x20] sm:$0xff] (%p1908_p6), %v1362_v38  ;;  %1365 = vst [vmem:[%s1299_s9 + $0x30] sm:$0xff] (%p1908_p6), %v1364_v39 }
 0x266   : > { %v1162_v42 = vadd.f32 %v1144_v43, %v1114_v40  ;;  %v1161_v45 = vadd.f32 %v1142_v44, %v1113_v41  ;;  %v1366_v40 = vld [vmem:[%s2167_s24 + $0x20] sm:$0xff] (%p1908_p6)  ;;  %v1368_v41 = vld [vmem:[%s2167_s24 + $0x28] sm:$0xff] (%p1908_p6)  ;;  %v1370_v43 = vld [vmem:[%s2167_s24 + $0x30] sm:$0xff] (%p1908_p6) }
 0x267   : > { %1367 = vst [vmem:[%s1299_s9 + $0x40] sm:$0xff] (%p1908_p6), %v1366_v40  ;;  %1369 = vst [vmem:[%s1299_s9 + $0x50] sm:$0xff] (%p1908_p6), %v1368_v41  ;;  %v1372_v44 = vld [vmem:[%s2167_s24 + $0x38] sm:$0xff] (%p1908_p6) }
 0x268   : > { %1179 = vst.msk [vmem:[%s2674_s4 + $0x68] sm:$0xff] %vm1165_vm1, %v1162_v42  ;;  %1178 = vst.msk [vmem:[%s2674_s4 + $0x60] sm:$0xff] %vm1165_vm1, %v1161_v45  ;;  %v1374_v42 = vld [vmem:[%s2167_s24 + $0x40] sm:$0xff] (%p1908_p6)  ;;  %v1376_v45 = vld [vmem:[%s2167_s24 + $0x48] sm:$0xff] (%p1908_p6) }
 0x269   : > { %v1148_v48 = vpop.xlane.xlu1 %1147  ;;  %v1146_v49 = vpop.xlane.xlu0 %1145  ;;  %1371 = vst [vmem:[%s1299_s9 + $0x60] sm:$0xff] (%p1908_p6), %v1370_v43  ;;  %1373 = vst [vmem:[%s1299_s9 + $0x70] sm:$0xff] (%p1908_p6), %v1372_v44 }
 0x26a   : > { %v1164_v50 = vadd.f32 %v1148_v48, %v1116_v46  ;;  %v1163_v51 = vadd.f32 %v1146_v49, %v1115_v47  ;;  %1375 = vst [vmem:[%s1299_s9 + $0x80] sm:$0xff] (%p1908_p6), %v1374_v42  ;;  %v1378_v46 = vld [vmem:[%s2167_s24 + $0x50] sm:$0xff] (%p1908_p6)  ;;  %v1380_v47 = vld [vmem:[%s2167_s24 + $0x58] sm:$0xff] (%p1908_p6)  ;;  %1377 = vst [vmem:[%s1299_s9 + $0x90] sm:$0xff] (%p1908_p6), %v1376_v45 }
 0x26b   : > { %1379 = vst [vmem:[%s1299_s9 + $0xa0] sm:$0xff] (%p1908_p6), %v1378_v46  ;;  %1381 = vst [vmem:[%s1299_s9 + $0xb0] sm:$0xff] (%p1908_p6), %v1380_v47  ;;  %v1382_v48 = vld [vmem:[%s2167_s24 + $0x60] sm:$0xff] (%p1908_p6)  ;;  %v1384_v49 = vld [vmem:[%s2167_s24 + $0x68] sm:$0xff] (%p1908_p6) }
 0x26c   : > { %1181 = vst.msk [vmem:[%s2674_s4 + $0x78] sm:$0xff] %vm1165_vm1, %v1164_v50  ;;  %1180 = vst.msk [vmem:[%s2674_s4 + $0x70] sm:$0xff] %vm1165_vm1, %v1163_v51  ;;  %v1386_v50 = vld [vmem:[%s2167_s24 + $0x70] sm:$0xff] (%p1908_p6)  ;;  %v1388_v51 = vld [vmem:[%s2167_s24 + $0x78] sm:$0xff] (%p1908_p6) }
 0x26d   : > { %v1217_v54 = vpop.xlane.xlu1 %1216  ;;  %v1215_v55 = vpop.xlane.xlu0 %1214  ;;  %1383 = vst [vmem:[%s1299_s9 + $0xc0] sm:$0xff] (%p1908_p6), %v1382_v48  ;;  %1385 = vst [vmem:[%s1299_s9 + $0xd0] sm:$0xff] (%p1908_p6), %v1384_v49 }
 0x26e   : > { %v1247_v56 = vadd.f32 %v1217_v54, %v1183_v52  ;;  %v1246_v57 = vadd.f32 %v1215_v55, %v1182_v53  ;;  %1387 = vst [vmem:[%s1299_s9 + $0xe0] sm:$0xff] (%p1908_p6), %v1386_v50  ;;  %1389 = vst [vmem:[%s1299_s9 + $0xf0] sm:$0xff] (%p1908_p6), %v1388_v51 }
 0x270   : > { %1263 = vst.msk [vmem:[%s2675_s5 + $0x8] sm:$0xff] %vm1165_vm1, %v1247_v56  ;;  %1262 = vst.msk [vmem:[%s2675_s5] sm:$0xff] %vm1165_vm1, %v1246_v57 }
 0x271   : > { %v1221_v60 = vpop.xlane.xlu1 %1220  ;;  %v1219_v61 = vpop.xlane.xlu0 %1218 }
 0x272   : > { %v1249_v62 = vadd.f32 %v1221_v60, %v1185_v58  ;;  %v1248_v63 = vadd.f32 %v1219_v61, %v1184_v59 }
 0x274   : > { %1265 = vst.msk [vmem:[%s2675_s5 + $0x18] sm:$0xff] %vm1165_vm1, %v1249_v62  ;;  %1264 = vst.msk [vmem:[%s2675_s5 + $0x10] sm:$0xff] %vm1165_vm1, %v1248_v63 }
 0x275   : > { %v1225_v2 = vpop.xlane.xlu1 %1224  ;;  %v1223_v3 = vpop.xlane.xlu0 %1222 }
 0x276   : > { %v1251_v4 = vadd.f32 %v1225_v2, %v1187_v0  ;;  %v1250_v5 = vadd.f32 %v1223_v3, %v1186_v1 }
 0x278   : > { %1267 = vst.msk [vmem:[%s2675_s5 + $0x28] sm:$0xff] %vm1165_vm1, %v1251_v4  ;;  %1266 = vst.msk [vmem:[%s2675_s5 + $0x20] sm:$0xff] %vm1165_vm1, %v1250_v5 }
 0x279   : > { %v1229_v8 = vpop.xlane.xlu1 %1228  ;;  %v1227_v9 = vpop.xlane.xlu0 %1226 }
 0x27a   : > { %v1253_v10 = vadd.f32 %v1229_v8, %v1189_v6  ;;  %v1252_v11 = vadd.f32 %v1227_v9, %v1188_v7 }
 0x27c   : > { %1269 = vst.msk [vmem:[%s2675_s5 + $0x38] sm:$0xff] %vm1165_vm1, %v1253_v10  ;;  %1268 = vst.msk [vmem:[%s2675_s5 + $0x30] sm:$0xff] %vm1165_vm1, %v1252_v11 }
 0x27d   : > { %v1233_v14 = vpop.xlane.xlu1 %1232  ;;  %v1231_v15 = vpop.xlane.xlu0 %1230 }
 0x27e   : > { %v1255_v16 = vadd.f32 %v1233_v14, %v1191_v12  ;;  %v1254_v17 = vadd.f32 %v1231_v15, %v1190_v13 }
 0x280   : > { %1271 = vst.msk [vmem:[%s2675_s5 + $0x48] sm:$0xff] %vm1165_vm1, %v1255_v16  ;;  %1270 = vst.msk [vmem:[%s2675_s5 + $0x40] sm:$0xff] %vm1165_vm1, %v1254_v17 }
 0x281   : > { %v1237_v20 = vpop.xlane.xlu1 %1236  ;;  %v1235_v21 = vpop.xlane.xlu0 %1234 }
 0x282   : > { %v1257_v22 = vadd.f32 %v1237_v20, %v1193_v18  ;;  %v1256_v23 = vadd.f32 %v1235_v21, %v1192_v19 }
 0x284   : > { %1273 = vst.msk [vmem:[%s2675_s5 + $0x58] sm:$0xff] %vm1165_vm1, %v1257_v22  ;;  %1272 = vst.msk [vmem:[%s2675_s5 + $0x50] sm:$0xff] %vm1165_vm1, %v1256_v23 }
 0x285   : > { %v1241_v26 = vpop.xlane.xlu1 %1240  ;;  %v1239_v27 = vpop.xlane.xlu0 %1238 }
 0x286   : > { %v1259_v28 = vadd.f32 %v1241_v26, %v1195_v24  ;;  %v1258_v29 = vadd.f32 %v1239_v27, %v1194_v25 }
 0x288   : > { %1275 = vst.msk [vmem:[%s2675_s5 + $0x68] sm:$0xff] %vm1165_vm1, %v1259_v28  ;;  %1274 = vst.msk [vmem:[%s2675_s5 + $0x60] sm:$0xff] %vm1165_vm1, %v1258_v29  ;;  %1294 = sbr.rel (!%p1908_p6) target bundleno = 653 (0x28d), region = 78 }
 0x289   : > { %v1245_v32 = vpop.xlane.xlu1 %1244  ;;  %v1243_v33 = vpop.xlane.xlu0 %1242 }
 0x28a   : > { %v1261_v34 = vadd.f32 %v1245_v32, %v1197_v30  ;;  %v1260_v35 = vadd.f32 %v1243_v33, %v1196_v31 }
 0x28c   : > { %1277 = vst.msk [vmem:[%s2675_s5 + $0x78] sm:$0xff] %vm1165_vm1, %v1261_v34  ;;  %1276 = vst.msk [vmem:[%s2675_s5 + $0x70] sm:$0xff] %vm1165_vm1, %v1260_v35 }
 0x28d PF: > { %s16_s22 = sadd.s32 1, %s1838_s22   ;;  %s2677_s18 = smov %s1826_s19 }
 0x28e   : > { %p13_p12 = scmp.ge.s32.totalorder %s16_s22, 4   ;;  %s2678_s19 = smov %s1913_s28 }
 0x28f   : > { %s2679_s20 = smov %s1834_s21  ;;  %s2680_s21 = smov %s2682_s23 }
 0x290   :  { %15 = sbr.rel (!%p13_p12) target bundleno = 3 (0x3), region = 174 }

// kernel: residual_block.4
= control target key start
LH: loop header
LB: loop body
LE: loop exit
PB: predicated region body
PF: predicated region fallthrough
CT: control target
= control target key end

     0   :  { %s2181_s24 = smov 0   ;;  %s2183_s25 = smov 0   ;;  %s3090_s0 = inlined_call_operand.vmem [shape: f32[128,256], index: 0, kind: input, shape index: {}]   ;;  %s3091_s1 = inlined_call_operand.vmem [shape: f32[128,1], index: 1, kind: input, shape index: {}]   ;;  %s3092_s2 = inlined_call_operand.vmem [shape: f32[128,1], index: 2, kind: input, shape index: {}]   ;;  %s3093_s3 = inlined_call_operand.vmem [shape: f32[8,128], index: 3, kind: input, shape index: {}]   ;;  %s3094_s4 = inlined_call_operand.vmem [shape: bf16[128,384], index: 4, kind: input, shape index: {}]   ;;  %s3095_s5 = inlined_call_operand.vmem [shape: f32[128,256], index: 5, kind: output, shape index: {0}]   ;;  %s3096_s6 = inlined_call_operand.vmem [shape: f32[128,1], index: 6, kind: output, shape index: {1}]   ;;  %s3097_s7 = inlined_call_operand.vmem [shape: f32[128,1], index: 7, kind: output, shape index: {2}]  }
   0x1   :  { %s2185_s26 = smov 0   ;;  %s2187_s27 = smov 0  }
   0x2   :  { %s2189_s28 = smov 0  }
   0x3 LB: > { %s27_s29 = sadd.s32 1, %s2131_s27  ;;  %s1821_s30 = sadd.s32 4294967295, %s2135_s28   ;;  %s2135_s28 = sphi %s2189_s28, %s18_s28   ;;  %s2131_s27 = sphi %s2187_s27, %s3102_s27   ;;  %s2127_s26 = sphi %s2185_s26, %s3101_s26   ;;  %s2123_s25 = sphi %s2183_s25, %s3100_s25   ;;  %s2119_s24 = sphi %s2181_s24, %s3099_s24  }
   0x4   : > { %p28_p0 = scmp.ge.s32.totalorder %s27_s29, 2  ;;  %p44_p1 = scmp.ne.s32.totalorder %s2123_s25, %s2119_s24 }
   0x5   : > { %p45_p2 = scmp.eq.s32.totalorder %s2135_s28, 0  ;;  %p165_p4 = scmp.eq.s32.totalorder %s1821_s30, 1 }
   0x6   : > { %s3104_s29 = smov (%p28_p0, %s27_s29), 0  ;;  %s37_s9 = sadd.s32 1, %s2123_s25 }
   0x7   : > { %p46_p3 = por %p45_p2, %p44_p1  ;;  %s34_s8 = ssub.s32 %s2131_s27, %s3104_s29 }
   0x8   : > { %p35_p5 = scmp.eq.s32.totalorder %s34_s8, 0  ;;  %p2216_p6 = por %p165_p4, %p44_p1 }
   0x9   : > { %p1825_p7 = scmp.ge.s32.totalorder %s2135_s28, 2 }
   0xa   : > { %s2221_s11 = scalar_select %p35_p5, %s2123_s25, %s37_s9  }
   0xb   : > { %258 = sbr.rel (%p1825_p7) target bundleno = 28 (0x1c), region = 32 }
  0x10   : > { %261 = sbr.rel (!%p46_p3) target bundleno = 28 (0x1c), region = 36  ;;  %s263_s12 = sand.u32 (%p46_p3), 1, %s2123_s25  }
  0x11   : > { %s1827_s13 = sshll.u32 (%p46_p3), %s2131_s27, 3  ;;  %s1826_s14 = sshll.u32 (%p46_p3), %s263_s12, 7 }
  0x12   : > { %s2229_s17 = scalar_lea.vmem (%p46_p3), %s3090_s0, %s1827_s13  ;;  %s265_s18 = scalar_lea.vmem (%p46_p3), [#allocation2], %s1826_s14 }
  0x13   : > { %v326_v0 = vld [vmem:[%s2229_s17] sm:$0xff] (%p46_p3)  ;;  %v328_v1 = vld [vmem:[%s2229_s17 + $0x10] sm:$0xff] (%p46_p3) }
  0x14   : > { %v330_v2 = vld [vmem:[%s2229_s17 + $0x20] sm:$0xff] (%p46_p3)  ;;  %327 = vst [vmem:[%s265_s18] sm:$0xff] (%p46_p3), %v326_v0  ;;  %329 = vst [vmem:[%s265_s18 + $0x8] sm:$0xff] (%p46_p3), %v328_v1  ;;  %v332_v3 = vld [vmem:[%s2229_s17 + $0x30] sm:$0xff] (%p46_p3) }
  0x15   : > { %331 = vst [vmem:[%s265_s18 + $0x10] sm:$0xff] %v330_v2  ;;  %v334_v4 = vld [vmem:[%s2229_s17 + $0x40] sm:$0xff]  ;;  %v336_v5 = vld [vmem:[%s2229_s17 + $0x50] sm:$0xff]  ;;  %333 = vst [vmem:[%s265_s18 + $0x18] sm:$0xff] %v332_v3 }
  0x16   : > { %335 = vst [vmem:[%s265_s18 + $0x20] sm:$0xff] %v334_v4  ;;  %337 = vst [vmem:[%s265_s18 + $0x28] sm:$0xff] %v336_v5  ;;  %v338_v6 = vld [vmem:[%s2229_s17 + $0x60] sm:$0xff]  ;;  %v340_v7 = vld [vmem:[%s2229_s17 + $0x70] sm:$0xff] }
  0x17   : > { %v342_v8 = vld [vmem:[%s2229_s17 + $0x80] sm:$0xff]  ;;  %339 = vst [vmem:[%s265_s18 + $0x30] sm:$0xff] %v338_v6  ;;  %341 = vst [vmem:[%s265_s18 + $0x38] sm:$0xff] %v340_v7  ;;  %v344_v9 = vld [vmem:[%s2229_s17 + $0x90] sm:$0xff] }
  0x18   : > { %343 = vst [vmem:[%s265_s18 + $0x40] sm:$0xff] %v342_v8  ;;  %v346_v10 = vld [vmem:[%s2229_s17 + $0xa0] sm:$0xff]  ;;  %v348_v11 = vld [vmem:[%s2229_s17 + $0xb0] sm:$0xff]  ;;  %345 = vst [vmem:[%s265_s18 + $0x48] sm:$0xff] %v344_v9 }
  0x19   : > { %347 = vst [vmem:[%s265_s18 + $0x50] sm:$0xff] %v346_v10  ;;  %349 = vst [vmem:[%s265_s18 + $0x58] sm:$0xff] %v348_v11  ;;  %v350_v12 = vld [vmem:[%s2229_s17 + $0xc0] sm:$0xff]  ;;  %v352_v13 = vld [vmem:[%s2229_s17 + $0xd0] sm:$0xff] }
  0x1a   : > { %v354_v14 = vld [vmem:[%s2229_s17 + $0xe0] sm:$0xff]  ;;  %351 = vst [vmem:[%s265_s18 + $0x60] sm:$0xff] %v350_v12  ;;  %353 = vst [vmem:[%s265_s18 + $0x68] sm:$0xff] %v352_v13  ;;  %v356_v15 = vld [vmem:[%s2229_s17 + $0xf0] sm:$0xff] }
  0x1b   : > { %355 = vst [vmem:[%s265_s18 + $0x70] sm:$0xff] %v354_v14  ;;  %357 = vst [vmem:[%s265_s18 + $0x78] sm:$0xff] %v356_v15 }
  0x1c PF: > { %p1828_p8 = scmp.ge.s32.totalorder %s2135_s28, 1  ;;  %p362_p9 = scmp.lt.s32.totalorder %s2135_s28, 3 }
  0x1e   : > { %p363_p10 = pnand %p1828_p8, %p362_p9 }
  0x1f   : > { %s369_s23 = sand.u32 (!%p363_p10), 1, %s2119_s24   ;;  %s2138_s24 = smov (!%p363_p10), 1  }
  0x20   : > { %366 = sbr.rel (%p363_p10) target bundleno = 811 (0x32b), region = 74  ;;  %s2346_s30 = sshll.u32 (!%p363_p10), %s369_s23, 7 }
  0x21   : > { %s2349_s8 = scalar_lea.vmem (!%p363_p10), [#allocation2], %s2346_s30  ;;  %s2139_s17 = smov (!%p363_p10), 127  }
  0x22   : > { %p1858_p11 = scmp.ne.s32.totalorder (!%p363_p10), %s2127_s26, 0 }
  0x25   : > { %v578_v16 = vld [vmem:[%s3092_s2 + $0x70] sm:$0xff]  ;;  %v2137_v18 = vmov 0   ;;  %v579_v19 = vld [vmem:[%s3092_s2 + $0x78] sm:$0xff]  ;;  %v465_v21 = vld [vmem:[%s3091_s1 + $0x68] sm:$0xff] }
  0x26   : > { %v466_v17 = vld [vmem:[%s3091_s1 + $0x70] sm:$0xff]  ;;  %2072 = vset.pattern.permute.xlu1 %v2137_v18  ;;  %2071 = vset.pattern.permute.xlu0 %v2137_v18  ;;  %v467_v20 = vld [vmem:[%s3091_s1 + $0x78] sm:$0xff]  ;;  %v464_v22 = vld [vmem:[%s3091_s1 + $0x60] sm:$0xff] }
  0x27   : > { %652 = vperm.xlu1 %2072, %v578_v16   ;;  %540 = vperm.xlu0 %2071, %v466_v17   ;;  %v577_v23 = vld [vmem:[%s3092_s2 + $0x68] sm:$0xff]  ;;  %v576_v24 = vld [vmem:[%s3092_s2 + $0x60] sm:$0xff]  ;;  %v463_v25 = vld [vmem:[%s3091_s1 + $0x58] sm:$0xff] }
  0x28   : > { %v462_v26 = vld [vmem:[%s3091_s1 + $0x50] sm:$0xff]  ;;  %v575_v27 = vld [vmem:[%s3092_s2 + $0x58] sm:$0xff]  ;;  %v461_v29 = vld [vmem:[%s3091_s1 + $0x48] sm:$0xff] }
  0x29   : > { %v574_v28 = vld [vmem:[%s3092_s2 + $0x50] sm:$0xff]  ;;  %v460_v30 = vld [vmem:[%s3091_s1 + $0x40] sm:$0xff]  ;;  %v573_v31 = vld [vmem:[%s3092_s2 + $0x48] sm:$0xff] }
  0x2a   : > { %v572_v32 = vld [vmem:[%s3092_s2 + $0x40] sm:$0xff]  ;;  %v459_v33 = vld [vmem:[%s3091_s1 + $0x38] sm:$0xff]  ;;  %v458_v34 = vld [vmem:[%s3091_s1 + $0x30] sm:$0xff] }
  0x2b   : > { %657 = vperm.xlu1 %2072, %v579_v19   ;;  %545 = vperm.xlu0 %2071, %v467_v20   ;;  %v571_v35 = vld [vmem:[%s3092_s2 + $0x38] sm:$0xff]  ;;  %v570_v36 = vld [vmem:[%s3092_s2 + $0x30] sm:$0xff]  ;;  %v457_v37 = vld [vmem:[%s3091_s1 + $0x28] sm:$0xff] }
  0x2c   : > { %v456_v38 = vld [vmem:[%s3091_s1 + $0x20] sm:$0xff]  ;;  %v569_v39 = vld [vmem:[%s3092_s2 + $0x28] sm:$0xff]  ;;  %v455_v41 = vld [vmem:[%s3091_s1 + $0x18] sm:$0xff] }
  0x2d   : > { %v568_v40 = vld [vmem:[%s3092_s2 + $0x20] sm:$0xff]  ;;  %v454_v42 = vld [vmem:[%s3091_s1 + $0x10] sm:$0xff]  ;;  %v567_v43 = vld [vmem:[%s3092_s2 + $0x18] sm:$0xff] }
  0x2e   : > { %v566_v44 = vld [vmem:[%s3092_s2 + $0x10] sm:$0xff]  ;;  %v453_v45 = vld [vmem:[%s3091_s1 + $0x8] sm:$0xff]  ;;  %v452_v46 = vld [vmem:[%s3091_s1] sm:$0xff] }
  0x2f   : > { %535 = vperm.xlu1 %2072, %v465_v21   ;;  %530 = vperm.xlu0 %2071, %v464_v22   ;;  %v565_v47 = vld [vmem:[%s3092_s2 + $0x8] sm:$0xff]  ;;  %v564_v48 = vld [vmem:[%s3092_s2] sm:$0xff]  ;;  %v450_v49 = vld [vmem:[%s2349_s8 + $0x70] sm:$0xff] }
  0x30   : > { %v451_v53 = vld [vmem:[%s2349_s8 + $0x78] sm:$0xff]  ;;  %v449_v61 = vld [vmem:[%s2349_s8 + $0x68] sm:$0xff]  ;;  %v448_v63 = vld [vmem:[%s2349_s8 + $0x60] sm:$0xff] }
  0x31   : > { %v2362_v0 = vld [vmem:[%s3093_s3 + $0x1] ss:$0 sm:$0xff]  ;;  %v447_v14 = vld [vmem:[%s2349_s8 + $0x58] sm:$0xff]  ;;  %v446_v16 = vld [vmem:[%s2349_s8 + $0x50] sm:$0xff] }
  0x33   : > { %647 = vperm.xlu1 %2072, %v577_v23   ;;  %642 = vperm.xlu0 %2071, %v576_v24  }
  0x37   : > { %525 = vperm.xlu1 %2072, %v463_v25   ;;  %520 = vperm.xlu0 %2071, %v462_v26  }
  0x3b   : > { %637 = vperm.xlu1 %2072, %v575_v27   ;;  %632 = vperm.xlu0 %2071, %v574_v28  }
  0x3f   : > { %515 = vperm.xlu1 %2072, %v461_v29   ;;  %510 = vperm.xlu0 %2071, %v460_v30   ;;  %v445_v29 = vld [vmem:[%s2349_s8 + $0x48] sm:$0xff] }
  0x43   : > { %627 = vperm.xlu1 %2072, %v573_v31   ;;  %622 = vperm.xlu0 %2071, %v572_v32   ;;  %v444_v31 = vld [vmem:[%s2349_s8 + $0x40] sm:$0xff] }
  0x47   : > { %505 = vperm.xlu1 %2072, %v459_v33   ;;  %500 = vperm.xlu0 %2071, %v458_v34  }
  0x4b   : > { %617 = vperm.xlu1 %2072, %v571_v35   ;;  %612 = vperm.xlu0 %2071, %v570_v36  }
  0x4f   : > { %495 = vperm.xlu1 %2072, %v457_v37   ;;  %490 = vperm.xlu0 %2071, %v456_v38  }
  0x53   : > { %607 = vperm.xlu1 %2072, %v569_v39   ;;  %602 = vperm.xlu0 %2071, %v568_v40  }
  0x57   : > { %485 = vperm.xlu1 %2072, %v455_v41   ;;  %480 = vperm.xlu0 %2071, %v454_v42  }
  0x5b   : > { %597 = vperm.xlu1 %2072, %v567_v43   ;;  %592 = vperm.xlu0 %2071, %v566_v44   ;;  %v443_v44 = vld [vmem:[%s2349_s8 + $0x38] sm:$0xff] }
  0x5f   : > { %475 = vperm.xlu1 %2072, %v453_v45   ;;  %470 = vperm.xlu0 %2071, %v452_v46   ;;  %v442_v46 = vld [vmem:[%s2349_s8 + $0x30] sm:$0xff] }
  0x63   : > { %587 = vperm.xlu1 %2072, %v565_v47   ;;  %582 = vperm.xlu0 %2071, %v564_v48  }
  0xa2   : > { %v653_v50 = vpop.permute.xlu1 %652  ;;  %v541_v51 = vpop.permute.xlu0 %540 }
  0xa3   : > { %v562_v52 = vmul.f32 %v541_v51, %v450_v49 }
  0xa5   : > { %v674_v54 = vadd.f32 %v653_v50, %v562_v52 }
  0xa6   : > { %v658_v55 = vpop.permute.xlu1 %657  ;;  %v546_v56 = vpop.permute.xlu0 %545 }
  0xa7   : > { %v2353_v57 = vmax.f32 %v674_v54, 0.0  ;;  %v563_v58 = vmul.f32 %v546_v56, %v451_v53 }
  0xa9   : > { %v675_v59 = vadd.f32 %v658_v55, %v563_v58  ;;  %720 = vrot.lane.b32.xlu0 %v2353_v57, %s2138_s24  ;;  %v788_v4 = vmul.f32 %v2362_v0, %v2353_v57 }
  0xaa   : > { %v536_v60 = vpop.permute.xlu1 %535  ;;  %v531_v62 = vpop.permute.xlu0 %530 }
  0xab   : > { %v2364_v1 = vmax.f32 %v675_v59, 0.0  ;;  %v561_v2 = vmul.f32 %v536_v60, %v449_v61  ;;  %v560_v3 = vmul.f32 %v531_v62, %v448_v63  ;;  %v441_v60 = vld [vmem:[%s2349_s8 + $0x28] sm:$0xff]  ;;  %v440_v62 = vld [vmem:[%s2349_s8 + $0x20] sm:$0xff] }
  0xad   : > { %722 = vrot.lane.b32.xlu1 %v2364_v1, %s2138_s24  ;;  %v789_v5 = vmul.f32 %v2362_v0, %v2364_v1 }
  0xae   : > { %v648_v6 = vpop.permute.xlu1 %647  ;;  %v643_v7 = vpop.permute.xlu0 %642 }
  0xaf   : > { %v673_v8 = vadd.f32 %v648_v6, %v561_v2  ;;  %v672_v9 = vadd.f32 %v643_v7, %v560_v3  ;;  %v797_v10 = vpack.c.bf16 %v789_v5, %v788_v4 }
  0xb1   : > { %v2372_v11 = vmax.f32 %v673_v8, 0.0  ;;  %v2374_v12 = vmax.f32 %v672_v9, 0.0  ;;  %1915 = vmatprep.subr.bf16.mxu0 %v797_v10 }
  0xb2   : > { %v526_v13 = vpop.permute.xlu1 %525  ;;  %v521_v15 = vpop.permute.xlu0 %520  ;;  %1916 = vmatpush3.bf16.msra.mxu0 %v797_v10 }
  0xb3   : > { %v787_v17 = vmul.f32 %v2362_v0, %v2372_v11  ;;  %v786_v18 = vmul.f32 %v2362_v0, %v2374_v12  ;;  %718 = vrot.lane.b32.xlu1 %v2372_v11, %s2138_s24  ;;  %716 = vrot.lane.b32.xlu0 %v2374_v12, %s2138_s24  ;;  %v559_v19 = vmul.f32 %v526_v13, %v447_v14 }
  0xb4   : > { %v558_v20 = vmul.f32 %v521_v15, %v446_v16  ;;  %v439_v15 = vld [vmem:[%s2349_s8 + $0x18] sm:$0xff] }
  0xb5   : > { %v796_v21 = vpack.c.bf16 %v787_v17, %v786_v18  ;;  %v438_v17 = vld [vmem:[%s2349_s8 + $0x10] sm:$0xff] }
  0xb6   : > { %v638_v22 = vpop.permute.xlu1 %637  ;;  %v633_v23 = vpop.permute.xlu0 %632 }
  0xb7   : > { %v671_v24 = vadd.f32 %v638_v22, %v559_v19  ;;  %v670_v25 = vadd.f32 %v633_v23, %v558_v20  ;;  %1917 = vmatprep.subr.bf16.mxu0 %v796_v21 }
  0xb8   : > { %1918 = vmatpush3.bf16.msra.mxu0 %v796_v21 }
  0xb9   : > { %v2386_v26 = vmax.f32 %v671_v24, 0.0  ;;  %v2388_v27 = vmax.f32 %v670_v25, 0.0  ;;  %v2073_v25 = vld [vmem:[%s3094_s4 + $0x4] ss:$12 sps:$4 sm:$0xff]  }
  0xba   : > { %v516_v28 = vpop.permute.xlu1 %515  ;;  %v511_v30 = vpop.permute.xlu0 %510  ;;  %1931 = vmatprep.mubr.bf16.mxu0 %v2073_v25 }
  0xbb   : > { %v785_v32 = vmul.f32 %v2362_v0, %v2386_v26  ;;  %v784_v33 = vmul.f32 %v2362_v0, %v2388_v27  ;;  %714 = vrot.lane.b32.xlu1 %v2386_v26, %s2138_s24  ;;  %712 = vrot.lane.b32.xlu0 %v2388_v27, %s2138_s24  ;;  %v557_v34 = vmul.f32 %v516_v28, %v445_v29 }
  0xbc   : > { %v556_v35 = vmul.f32 %v511_v30, %v444_v31 }
  0xbd   : > { %v795_v36 = vpack.c.bf16 %v785_v32, %v784_v33  ;;  %v437_v33 = vld [vmem:[%s2349_s8 + $0x8] sm:$0xff] }
  0xbe   : > { %v628_v37 = vpop.permute.xlu1 %627  ;;  %v623_v38 = vpop.permute.xlu0 %622 }
  0xbf   : > { %v669_v39 = vadd.f32 %v628_v37, %v557_v34  ;;  %v668_v40 = vadd.f32 %v623_v38, %v556_v35  ;;  %1919 = vmatprep.subr.bf16.mxu0 %v795_v36  ;;  %v436_v35 = vld [vmem:[%s2349_s8] sm:$0xff] }
  0xc0   : > { %1920 = vmatpush3.bf16.msra.mxu0 %v795_v36  ;;  %v2075_v38 = vld [vmem:[%s3094_s4] ss:$12 sps:$4 sm:$0xff]  }
  0xc1   : > { %v2400_v41 = vmax.f32 %v669_v39, 0.0  ;;  %v2402_v42 = vmax.f32 %v668_v40, 0.0  ;;  %1963 = vmatprep.mubr.bf16.mxu1 %v2075_v38 }
  0xc2   : > { %v506_v43 = vpop.permute.xlu1 %505  ;;  %v501_v45 = vpop.permute.xlu0 %500 }
  0xc3   : > { %v783_v47 = vmul.f32 %v2362_v0, %v2400_v41  ;;  %v782_v48 = vmul.f32 %v2362_v0, %v2402_v42  ;;  %710 = vrot.lane.b32.xlu1 %v2400_v41, %s2138_s24  ;;  %708 = vrot.lane.b32.xlu0 %v2402_v42, %s2138_s24  ;;  %v555_v49 = vmul.f32 %v506_v43, %v443_v44 }
  0xc4   : > { %v554_v50 = vmul.f32 %v501_v45, %v442_v46 }
  0xc5   : > { %v794_v51 = vpack.c.bf16 %v783_v47, %v782_v48 }
  0xc6   : > { %v618_v52 = vpop.permute.xlu1 %617  ;;  %v613_v53 = vpop.permute.xlu0 %612 }
  0xc7   : > { %v667_v54 = vadd.f32 %v618_v52, %v555_v49  ;;  %v666_v55 = vadd.f32 %v613_v53, %v554_v50  ;;  %1921 = vmatprep.subr.bf16.mxu0 %v794_v51  ;;  %v2074_v53 = vld [vmem:[%s3094_s4 + $0x1c] ss:$12 sps:$4 sm:$0xff]  }
  0xc8   : > { %1922 = vmatpush3.bf16.msra.mxu0 %v794_v51 }
  0xc9   : > { %v2414_v56 = vmax.f32 %v667_v54, 0.0  ;;  %v2416_v58 = vmax.f32 %v666_v55, 0.0 }
  0xca   : > { %v496_v59 = vpop.permute.xlu1 %495  ;;  %v491_v61 = vpop.permute.xlu0 %490 }
  0xcb   : > { %v781_v63 = vmul.f32 %v2362_v0, %v2414_v56  ;;  %v780_v2 = vmul.f32 %v2362_v0, %v2416_v58  ;;  %706 = vrot.lane.b32.xlu1 %v2414_v56, %s2138_s24  ;;  %704 = vrot.lane.b32.xlu0 %v2416_v58, %s2138_s24  ;;  %v553_v3 = vmul.f32 %v496_v59, %v441_v60 }
  0xcc   : > { %v552_v4 = vmul.f32 %v491_v61, %v440_v62 }
  0xcd   : > { %v793_v5 = vpack.c.bf16 %v781_v63, %v780_v2 }
  0xce   : > { %v608_v6 = vpop.permute.xlu1 %607  ;;  %v603_v7 = vpop.permute.xlu0 %602 }
  0xcf   : > { %v665_v8 = vadd.f32 %v608_v6, %v553_v3  ;;  %v664_v9 = vadd.f32 %v603_v7, %v552_v4  ;;  %1923 = vmatprep.subr.bf16.mxu0 %v793_v5 }
  0xd0   : > { %1924 = vmatpush3.bf16.msra.mxu0 %v793_v5 }
  0xd1   : > { %v2428_v10 = vmax.f32 %v665_v8, 0.0  ;;  %v2430_v13 = vmax.f32 %v664_v9, 0.0 }
  0xd2   : > { %v486_v14 = vpop.permute.xlu1 %485  ;;  %v481_v16 = vpop.permute.xlu0 %480 }
  0xd3   : > { %v779_v18 = vmul.f32 %v2362_v0, %v2428_v10  ;;  %v778_v19 = vmul.f32 %v2362_v0, %v2430_v13  ;;  %702 = vrot.lane.b32.xlu1 %v2428_v10, %s2138_s24  ;;  %700 = vrot.lane.b32.xlu0 %v2430_v13, %s2138_s24  ;;  %v551_v20 = vmul.f32 %v486_v14, %v439_v15 }
  0xd4   : > { %v550_v21 = vmul.f32 %v481_v16, %v438_v17 }
  0xd5   : > { %v792_v22 = vpack.c.bf16 %v779_v18, %v778_v19 }
  0xd6   : > { %v598_v23 = vpop.permute.xlu1 %597  ;;  %v593_v24 = vpop.permute.xlu0 %592 }
  0xd7   : > { %v663_v28 = vadd.f32 %v598_v23, %v551_v20  ;;  %v662_v29 = vadd.f32 %v593_v24, %v550_v21  ;;  %1925 = vmatprep.subr.bf16.mxu0 %v792_v22 }
  0xd8   : > { %1926 = vmatpush3.bf16.msra.mxu0 %v792_v22 }
  0xd9   : > { %v679_v30 = vmax.f32 %v663_v28, 0.0  ;;  %v678_v31 = vmax.f32 %v662_v29, 0.0 }
  0xda   : > { %v476_v32 = vpop.permute.xlu1 %475  ;;  %v471_v34 = vpop.permute.xlu0 %470 }
  0xdb   : > { %v777_v36 = vmul.f32 %v2362_v0, %v679_v30  ;;  %v776_v37 = vmul.f32 %v2362_v0, %v678_v31  ;;  %698 = vrot.lane.b32.xlu1 %v679_v30, %s2138_s24  ;;  %696 = vrot.lane.b32.xlu0 %v678_v31, %s2138_s24  ;;  %v549_v39 = vmul.f32 %v476_v32, %v437_v33 }
  0xdc   : > { %v548_v40 = vmul.f32 %v471_v34, %v436_v35  ;;  %v2516_v35 = vld [vmem:[%s3093_s3 + $0x2] ss:$0 sm:$0xff] }
  0xdd   : > { %v791_v43 = vpack.c.bf16 %v777_v36, %v776_v37 }
  0xde   : > { %v588_v44 = vpop.permute.xlu1 %587  ;;  %v583_v45 = vpop.permute.xlu0 %582 }
  0xdf   : > { %v661_v46 = vadd.f32 %v588_v44, %v549_v39  ;;  %v660_v47 = vadd.f32 %v583_v45, %v548_v40  ;;  %1927 = vmatprep.subr.bf16.mxu0 %v791_v43  ;;  %v2079_v45 = vld [vmem:[%s3094_s4 + $0x30] ss:$12 sps:$4 sm:$0xff]  }
  0xe0   : > { %1928 = vmatpush3.bf16.msra.mxu0 %v791_v43  ;;  %v2076_v43 = vld [vmem:[%s3094_s4 + $0x18] ss:$12 sps:$4 sm:$0xff]  }
  0xe1   : > { %v677_v48 = vmax.f32 %v661_v46, 0.0  ;;  %v676_v49 = vmax.f32 %v660_v47, 0.0 }
  0xe3   : > { %v775_v50 = vmul.f32 %v2362_v0, %v677_v48  ;;  %v774_v51 = vmul.f32 %v2362_v0, %v676_v49  ;;  %694 = vrot.lane.b32.xlu1 %v677_v48, %s2138_s24  ;;  %692 = vrot.lane.b32.xlu0 %v676_v49, %s2138_s24  ;;  %v2077_v0 = vld [vmem:[%s3094_s4 + $0x34] ss:$12 sps:$4 sm:$0xff]  }
  0xe5   : > { %v790_v52 = vpack.c.bf16 %v775_v50, %v774_v51 }
  0xe7   : > { %1134 = vrot.lane.b32.xlu1 %v2364_v1, %s2139_s17  ;;  %1132 = vrot.lane.b32.xlu0 %v2353_v57, %s2139_s17  ;;  %v2078_v57 = vld [vmem:[%s3094_s4 + $0x4c] ss:$12 sps:$4 sm:$0xff]   ;;  %v2081_v1 = vld [vmem:[%s3094_s4 + $0x64] ss:$12 sps:$4 sm:$0xff]  }
  0xe8   : > { %1929 = vmatprep.subr.bf16.mxu0 %v790_v52 }
  0xe9   : > { %1930 = vmatpush3.bf16.msra.mxu0 %v790_v52 }
  0xeb   : > { %1130 = vrot.lane.b32.xlu1 %v2372_v11, %s2139_s17  ;;  %1128 = vrot.lane.b32.xlu0 %v2374_v12, %s2139_s17  ;;  %v2082_v11 = vld [vmem:[%s3094_s4 + $0x7c] ss:$12 sps:$4 sm:$0xff]   ;;  %v2085_v12 = vld [vmem:[%s3094_s4 + $0x94] ss:$12 sps:$4 sm:$0xff]  }
  0xec   : > { %1932 = vmatmul.mubr.bf16.vlgmr.msra.gmra.mxu0 %v2074_v53 }
  0xed   : > { %1935 = vmatprep.mubr.bf16.mxu0 %v2077_v0 }
  0xef   : > { %1126 = vrot.lane.b32.xlu1 %v2386_v26, %s2139_s17  ;;  %1124 = vrot.lane.b32.xlu0 %v2388_v27, %s2139_s17  ;;  %v2086_v26 = vld [vmem:[%s3094_s4 + $0xac] ss:$12 sps:$4 sm:$0xff]   ;;  %v2089_v27 = vld [vmem:[%s3094_s4 + $0x8] ss:$12 sps:$4 sm:$0xff]  }
  0xf3   : > { %1122 = vrot.lane.b32.xlu1 %v2400_v41, %s2139_s17  ;;  %1120 = vrot.lane.b32.xlu0 %v2402_v42, %s2139_s17  ;;  %v1831_v41 = vld [vmem:[%s3093_s3] ss:$0 sm:$0xff] }
  0xf4   : > { %1936 = vmatmul.mubr.bf16.gmra.mxu0 %v2078_v57  ;;  %v2080_v57 = vld [vmem:[%s3094_s4 + $0x48] ss:$12 sps:$4 sm:$0xff]  }
  0xf5   : > { %1939 = vmatprep.mubr.bf16.mxu0 %v2081_v1 }
  0xf7   : > { %1118 = vrot.lane.b32.xlu1 %v2414_v56, %s2139_s17  ;;  %1116 = vrot.lane.b32.xlu0 %v2416_v58, %s2139_s17 }
  0xfb   : > { %1114 = vrot.lane.b32.xlu1 %v2428_v10, %s2139_s17  ;;  %1112 = vrot.lane.b32.xlu0 %v2430_v13, %s2139_s17 }
  0xfc   : > { %1940 = vmatmul.mubr.bf16.gmra.mxu0 %v2082_v11  ;;  %v2083_v11 = vld [vmem:[%s3094_s4 + $0x60] ss:$12 sps:$4 sm:$0xff]  }
  0xfd   : > { %1943 = vmatprep.mubr.bf16.mxu0 %v2085_v12 }
  0xff   : > { %1110 = vrot.lane.b32.xlu1 %v679_v30, %s2139_s17  ;;  %1108 = vrot.lane.b32.xlu0 %v678_v31, %s2139_s17 }
 0x103   : > { %1106 = vrot.lane.b32.xlu1 %v677_v48, %s2139_s17  ;;  %1104 = vrot.lane.b32.xlu0 %v676_v49, %s2139_s17  ;;  %s2587_s17 = scalar_lea.vmem [#allocation3], %s2346_s30 }
 0x104   : > { %1944 = vmatmul.mubr.bf16.gmra.mxu0 %v2086_v26 }
 0x105   : > { %1995 = vmatprep.mubr.bf16.mxu0 %v2089_v27 }
 0x11b   : > { %v721_v42 = vpop.permute.xlu0 %720 }
 0x11c   : > { %v743_v55 = vmul.f32 %v1831_v41, %v721_v42 }
 0x11f   : > { %v723_v54 = vpop.permute.xlu1 %722 }
 0x120   : > { %v744_v56 = vmul.f32 %v1831_v41, %v723_v54 }
 0x122   : > { %v752_v58 = vpack.c.bf16 %v744_v56, %v743_v55 }
 0x124   : > { %1947 = vmatprep.subr.bf16.mxu1 %v752_v58 }
 0x125   : > { %1948 = vmatpush3.bf16.msra.mxu1 %v752_v58  ;;  %v719_v59 = vpop.permute.xlu1 %718  ;;  %v717_v61 = vpop.permute.xlu0 %716 }
 0x126   : > { %v742_v60 = vmul.f32 %v1831_v41, %v719_v59  ;;  %v741_v62 = vmul.f32 %v1831_v41, %v717_v61  ;;  %v2084_v59 = vld [vmem:[%s3094_s4 + $0x78] ss:$12 sps:$4 sm:$0xff]   ;;  %v2087_v61 = vld [vmem:[%s3094_s4 + $0x90] ss:$12 sps:$4 sm:$0xff]  }
 0x128   : > { %v751_v63 = vpack.c.bf16 %v742_v60, %v741_v62 }
 0x12a   : > { %1949 = vmatprep.subr.bf16.mxu1 %v751_v63 }
 0x12b   : > { %1950 = vmatpush3.bf16.msra.mxu1 %v751_v63 }
 0x12d   : > { %v715_v2 = vpop.permute.xlu1 %714  ;;  %v713_v4 = vpop.permute.xlu0 %712 }
 0x12e   : > { %v740_v3 = vmul.f32 %v1831_v41, %v715_v2  ;;  %v739_v5 = vmul.f32 %v1831_v41, %v713_v4 }
 0x130   : > { %v750_v6 = vpack.c.bf16 %v740_v3, %v739_v5 }
 0x132   : > { %1951 = vmatprep.subr.bf16.mxu1 %v750_v6 }
 0x133   : > { %1952 = vmatpush3.bf16.msra.mxu1 %v750_v6 }
 0x135   : > { %v711_v7 = vpop.permute.xlu1 %710  ;;  %v709_v9 = vpop.permute.xlu0 %708 }
 0x136   : > { %v738_v8 = vmul.f32 %v1831_v41, %v711_v7  ;;  %v737_v10 = vmul.f32 %v1831_v41, %v709_v9  ;;  %v2088_v9 = vld [vmem:[%s3094_s4 + $0xa8] ss:$12 sps:$4 sm:$0xff]  }
 0x138   : > { %v749_v13 = vpack.c.bf16 %v738_v8, %v737_v10 }
 0x13a   : > { %1953 = vmatprep.subr.bf16.mxu1 %v749_v13 }
 0x13b   : > { %1954 = vmatpush3.bf16.msra.mxu1 %v749_v13  ;;  %v2090_v13 = vld [vmem:[%s3094_s4 + $0x68] ss:$12 sps:$4 sm:$0xff]  }
 0x13d   : > { %v707_v14 = vpop.permute.xlu1 %706  ;;  %v705_v16 = vpop.permute.xlu0 %704 }
 0x13e   : > { %v736_v15 = vmul.f32 %v1831_v41, %v707_v14  ;;  %v735_v17 = vmul.f32 %v1831_v41, %v705_v16 }
 0x140   : > { %v748_v18 = vpack.c.bf16 %v736_v15, %v735_v17 }
 0x142   : > { %1955 = vmatprep.subr.bf16.mxu1 %v748_v18 }
 0x143   : > { %1956 = vmatpush3.bf16.msra.mxu1 %v748_v18 }
 0x145   : > { %v703_v19 = vpop.permute.xlu1 %702  ;;  %v701_v21 = vpop.permute.xlu0 %700 }
 0x146   : > { %v734_v20 = vmul.f32 %v1831_v41, %v703_v19  ;;  %v733_v22 = vmul.f32 %v1831_v41, %v701_v21  ;;  %v2091_v19 = vld [vmem:[%s3094_s4 + $0x20] ss:$12 sps:$4 sm:$0xff]   ;;  %v2093_v21 = vld [vmem:[%s3094_s4 + $0x38] ss:$12 sps:$4 sm:$0xff]  }
 0x148   : > { %v747_v23 = vpack.c.bf16 %v734_v20, %v733_v22  ;;  %v2092_v20 = vld [vmem:[%s3094_s4 + $0x80] ss:$12 sps:$4 sm:$0xff]   ;;  %v2094_v22 = vld [vmem:[%s3094_s4 + $0x98] ss:$12 sps:$4 sm:$0xff]  }
 0x14a   : > { %1957 = vmatprep.subr.bf16.mxu1 %v747_v23 }
 0x14b   : > { %1958 = vmatpush3.bf16.msra.mxu1 %v747_v23  ;;  %v2095_v23 = vld [vmem:[%s3094_s4 + $0x50] ss:$12 sps:$4 sm:$0xff]  }
 0x14d   : > { %v699_v24 = vpop.permute.xlu1 %698  ;;  %v697_v28 = vpop.permute.xlu0 %696 }
 0x14e   : > { %v732_v25 = vmul.f32 %v1831_v41, %v699_v24  ;;  %v731_v29 = vmul.f32 %v1831_v41, %v697_v28  ;;  %v2096_v24 = vld [vmem:[%s3094_s4 + $0xb0] ss:$12 sps:$4 sm:$0xff]  }
 0x150   : > { %v746_v30 = vpack.c.bf16 %v732_v25, %v731_v29 }
 0x152   : > { %1959 = vmatprep.subr.bf16.mxu1 %v746_v30 }
 0x153   : > { %1960 = vmatpush3.bf16.msra.mxu1 %v746_v30 }
 0x155   : > { %v695_v31 = vpop.permute.xlu1 %694  ;;  %v693_v32 = vpop.permute.xlu0 %692 }
 0x156   : > { %v730_v33 = vmul.f32 %v1831_v41, %v695_v31  ;;  %v729_v34 = vmul.f32 %v1831_v41, %v693_v32 }
 0x158   : > { %v745_v36 = vpack.c.bf16 %v730_v33, %v729_v34 }
 0x159   : > { %v1135_v37 = vpop.permute.xlu1 %1134  ;;  %v1133_v38 = vpop.permute.xlu0 %1132 }
 0x15a   : > { %v1156_v39 = vmul.f32 %v2516_v35, %v1135_v37  ;;  %v1155_v40 = vmul.f32 %v2516_v35, %v1133_v38  ;;  %1961 = vmatprep.subr.bf16.mxu1 %v745_v36 }
 0x15b   : > { %1962 = vmatpush3.bf16.msra.mxu1 %v745_v36 }
 0x15c   : > { %v1164_v44 = vpack.c.bf16 %v1156_v39, %v1155_v40 }
 0x15d   : > { %v1131_v46 = vpop.permute.xlu1 %1130  ;;  %v1129_v47 = vpop.permute.xlu0 %1128 }
 0x15e   : > { %v1154_v48 = vmul.f32 %v2516_v35, %v1131_v46  ;;  %v1153_v49 = vmul.f32 %v2516_v35, %v1129_v47  ;;  %1964 = vmatmul.mubr.bf16.vlgmr.msra.gmra.mxu1 %v2076_v43  ;;  %1979 = vmatprep.subr.bf16.mxu0 %v1164_v44 }
 0x15f   : > { %2011 = vmatprep.subr.bf16.mxu1 %v1164_v44  ;;  %1980 = vmatpush3.bf16.msra.mxu0 %v1164_v44 }
 0x160   : > { %v1163_v50 = vpack.c.bf16 %v1154_v48, %v1153_v49  ;;  %2019 = vmatpush3.bf16.msra.mxu1 %v1164_v44  ;;  %1967 = vmatprep.mubr.bf16.mxu1 %v2079_v45 }
 0x161   : > { %v1127_v51 = vpop.permute.xlu1 %1126  ;;  %v1125_v52 = vpop.permute.xlu0 %1124 }
 0x162   : > { %v1152_v53 = vmul.f32 %v2516_v35, %v1127_v51  ;;  %v1151_v0 = vmul.f32 %v2516_v35, %v1125_v52  ;;  %1981 = vmatprep.subr.bf16.mxu0 %v1163_v50  ;;  %2012 = vmatprep.subr.bf16.mxu1 %v1163_v50 }
 0x163   : > { %1982 = vmatpush3.bf16.msra.mxu0 %v1163_v50 }
 0x164   : > { %v1162_v1 = vpack.c.bf16 %v1152_v53, %v1151_v0  ;;  %2020 = vmatpush3.bf16.msra.mxu1 %v1163_v50 }
 0x165   : > { %v1123_v12 = vpop.permute.xlu1 %1122  ;;  %v1121_v26 = vpop.permute.xlu0 %1120 }
 0x166   : > { %v1150_v27 = vmul.f32 %v2516_v35, %v1123_v12  ;;  %v1149_v41 = vmul.f32 %v2516_v35, %v1121_v26  ;;  %1968 = vmatmul.mubr.bf16.gmra.mxu1 %v2080_v57  ;;  %1983 = vmatprep.subr.bf16.mxu0 %v1162_v1 }
 0x167   : > { %2013 = vmatprep.subr.bf16.mxu1 %v1162_v1  ;;  %1984 = vmatpush3.bf16.msra.mxu0 %v1162_v1 }
 0x168   : > { %v1161_v42 = vpack.c.bf16 %v1150_v27, %v1149_v41  ;;  %2021 = vmatpush3.bf16.msra.mxu1 %v1162_v1  ;;  %1971 = vmatprep.mubr.bf16.mxu1 %v2083_v11 }
 0x169   : > { %v1119_v54 = vpop.permute.xlu1 %1118  ;;  %v1117_v55 = vpop.permute.xlu0 %1116 }
 0x16a   : > { %v1148_v56 = vmul.f32 %v2516_v35, %v1119_v54  ;;  %v1147_v58 = vmul.f32 %v2516_v35, %v1117_v55  ;;  %1985 = vmatprep.subr.bf16.mxu0 %v1161_v42  ;;  %2014 = vmatprep.subr.bf16.mxu1 %v1161_v42 }
 0x16b   : > { %1986 = vmatpush3.bf16.msra.mxu0 %v1161_v42 }
 0x16c   : > { %v1160_v60 = vpack.c.bf16 %v1148_v56, %v1147_v58  ;;  %2022 = vmatpush3.bf16.msra.mxu1 %v1161_v42 }
 0x16d   : > { %v1115_v62 = vpop.permute.xlu1 %1114  ;;  %v1113_v63 = vpop.permute.xlu0 %1112 }
 0x16e   : > { %v1146_v2 = vmul.f32 %v2516_v35, %v1115_v62  ;;  %v1145_v3 = vmul.f32 %v2516_v35, %v1113_v63  ;;  %1972 = vmatmul.mubr.bf16.gmra.mxu1 %v2084_v59  ;;  %1987 = vmatprep.subr.bf16.mxu0 %v1160_v60 }
 0x16f   : > { %2015 = vmatprep.subr.bf16.mxu1 %v1160_v60  ;;  %1988 = vmatpush3.bf16.msra.mxu0 %v1160_v60 }
 0x170   : > { %v1159_v4 = vpack.c.bf16 %v1146_v2, %v1145_v3  ;;  %2023 = vmatpush3.bf16.msra.mxu1 %v1160_v60  ;;  %1975 = vmatprep.mubr.bf16.mxu1 %v2087_v61 }
 0x171   : > { %v1111_v5 = vpop.permute.xlu1 %1110  ;;  %v1109_v6 = vpop.permute.xlu0 %1108 }
 0x172   : > { %v1144_v7 = vmul.f32 %v2516_v35, %v1111_v5  ;;  %v1143_v8 = vmul.f32 %v2516_v35, %v1109_v6  ;;  %1989 = vmatprep.subr.bf16.mxu0 %v1159_v4  ;;  %2016 = vmatprep.subr.bf16.mxu1 %v1159_v4 }
 0x173   : > { %1990 = vmatpush3.bf16.msra.mxu0 %v1159_v4 }
 0x174   : > { %v1158_v10 = vpack.c.bf16 %v1144_v7, %v1143_v8  ;;  %2024 = vmatpush3.bf16.msra.mxu1 %v1159_v4 }
 0x175   : > { %v1107_v14 = vpop.permute.xlu1 %1106  ;;  %v1105_v15 = vpop.permute.xlu0 %1104 }
 0x176   : > { %v1142_v16 = vmul.f32 %v2516_v35, %v1107_v14  ;;  %v1141_v17 = vmul.f32 %v2516_v35, %v1105_v15  ;;  %1976 = vmatmul.mubr.bf16.gmra.mxu1 %v2088_v9  ;;  %1991 = vmatprep.subr.bf16.mxu0 %v1158_v10 }
 0x177   : > { %2017 = vmatprep.subr.bf16.mxu1 %v1158_v10  ;;  %1992 = vmatpush3.bf16.msra.mxu0 %v1158_v10 }
 0x178   : > { %v1157_v18 = vpack.c.bf16 %v1142_v16, %v1141_v17  ;;  %2025 = vmatpush3.bf16.msra.mxu1 %v1158_v10  ;;  %2003 = vmatprep.mubr.bf16.mxu1 %v2090_v13 }
 0x17a   : > { %1993 = vmatprep.subr.bf16.mxu0 %v1157_v18  ;;  %2018 = vmatprep.subr.bf16.mxu1 %v1157_v18 }
 0x17b   : > { %1994 = vmatpush3.bf16.msra.mxu0 %v1157_v18 }
 0x17c   : > { %2026 = vmatpush3.bf16.msra.mxu1 %v1157_v18 }
 0x17e   : > { %1996 = vmatmul.mubr.bf16.vlgmr.msra.gmra.mxu0 %v2091_v19 }
 0x17f   : > { %2004 = vmatmul.mubr.bf16.vlgmr.msra.gmra.mxu1 %v2092_v20  ;;  %1999 = vmatprep.mubr.bf16.mxu0 %v2093_v21 }
 0x180   : > { %2007 = vmatprep.mubr.bf16.mxu1 %v2094_v22 }
 0x186   : > { %2000 = vmatmul.mubr.bf16.gmra.mxu0 %v2095_v23 }
 0x187   : > { %2008 = vmatmul.mubr.bf16.gmra.mxu1 %v2096_v24 }
 0x1ac   : > { %v1933_v25 = vpop.f32.mrf.mxu0 }
 0x1ae   : > { %v896_v28 = vpop.f32.mrf.mxu0 }
 0x1b0   : > { %v1934_v29 = vpop.f32.mrf.mxu0 }
 0x1b2   : > { %v899_v30 = vpop.f32.mrf.mxu0 }
 0x1b4   : > { %v1937_v31 = vpop.f32.mrf.mxu0 }
 0x1b6   : > { %v912_v32 = vpop.f32.mrf.mxu0 }
 0x1b8   : > { %v2576_v33 = vpop.f32.mrf.mxu0 }
 0x1ba   : > { %v2578_v34 = vpop.f32.mrf.mxu0 }
 0x1bc   : > { %v1941_v37 = vpop.f32.mrf.mxu0 }
 0x1be   : > { %v928_v40 = vpop.f32.mrf.mxu0 }
 0x1c0   : > { %v1942_v45 = vpop.f32.mrf.mxu0 }
 0x1c2   : > { %v931_v48 = vpop.f32.mrf.mxu0 }
 0x1c4   : > { %v1945_v51 = vpop.f32.mrf.mxu0 }
 0x1c6   : > { %v944_v53 = vpop.f32.mrf.mxu0 }
 0x1c8   : > { %v1946_v1 = vpop.f32.mrf.mxu0 }
 0x1ca   : > { %v947_v26 = vpop.f32.mrf.mxu0 }
 0x21e   : > { %v1965_v35 = vpop.f32.mrf.mxu1 }
 0x21f   : > { %v1050_v41 = vadd.f32 %v1965_v35, %v1933_v25 }
 0x220   : > { %v1041_v36 = vpop.f32.mrf.mxu1 }
 0x221   : > { %v1042_v55 = vadd.f32 %v1041_v36, %v896_v28 }
 0x222   : > { %v1966_v38 = vpop.f32.mrf.mxu1 }
 0x223   : > { %v1053_v62 = vadd.f32 %v1966_v38, %v1934_v29 }
 0x224   : > { %v1044_v39 = vpop.f32.mrf.mxu1 }
 0x225   : > { %v1045_v6 = vadd.f32 %v1044_v39, %v899_v30 }
 0x226   : > { %v1969_v43 = vpop.f32.mrf.mxu1 }
 0x227   : > { %v1066_v14 = vadd.f32 %v1969_v43, %v1937_v31 }
 0x228   : > { %v1057_v44 = vpop.f32.mrf.mxu1 }
 0x229   : > { %v1058_v20 = vadd.f32 %v1057_v44, %v912_v32 }
 0x22a   : > { %v1970_v46 = vpop.f32.mrf.mxu1 }
 0x22b   : > { %v1069_v28 = vadd.f32 %v1970_v46, %v2576_v33 }
 0x22c   : > { %v2580_v47 = vpop.f32.mrf.mxu1 }
 0x22d   : > { %v1061_v36 = vadd.f32 %v2580_v47, %v2578_v34 }
 0x22e   : > { %v1973_v49 = vpop.f32.mrf.mxu1 }
 0x22f   : > { %v1082_v42 = vadd.f32 %v1973_v49, %v1941_v37 }
 0x230   : > { %v1073_v50 = vpop.f32.mrf.mxu1 }
 0x231   : > { %v1074_v59 = vadd.f32 %v1073_v50, %v928_v40 }
 0x232   : > { %v1974_v52 = vpop.f32.mrf.mxu1 }
 0x233   : > { %v1085_v3 = vadd.f32 %v1974_v52, %v1942_v45 }
 0x234   : > { %v1076_v0 = vpop.f32.mrf.mxu1 }
 0x235   : > { %v1077_v9 = vadd.f32 %v1076_v0, %v931_v48 }
 0x236   : > { %v1977_v57 = vpop.f32.mrf.mxu1 }
 0x237   : > { %v1098_v17 = vadd.f32 %v1977_v57, %v1945_v51 }
 0x238   : > { %v1089_v11 = vpop.f32.mrf.mxu1 }
 0x239   : > { %v1090_v23 = vadd.f32 %v1089_v11, %v944_v53 }
 0x23a   : > { %v1978_v12 = vpop.f32.mrf.mxu1 }
 0x23b   : > { %v1101_v31 = vadd.f32 %v1978_v12, %v1946_v1 }
 0x23c   : > { %v1092_v27 = vpop.f32.mrf.mxu1 }
 0x23d   : > { %v1093_v38 = vadd.f32 %v1092_v27, %v947_v26 }
 0x23e   : > { %v1997_v54 = vpop.f32.mrf.mxu0 }
 0x23f   : > { %v2582_v56 = vadd.f32 %v1997_v54, %v1050_v41  ;;  %v2005_v58 = vpop.f32.mrf.mxu1 }
 0x240   : > { %v2584_v60 = vadd.f32 %v2005_v58, %v1082_v42  ;;  %v1263_v61 = vpop.f32.mrf.mxu0 }
 0x241   : > { %1344 = vst [vmem:[%s2587_s17 + $0x10] sm:$0xff] %v2582_v56  ;;  %v2591_v63 = vadd.f32 %v1263_v61, %v1042_v55  ;;  %v1295_v2 = vpop.f32.mrf.mxu1 }
 0x242   : > { %1352 = vst [vmem:[%s2587_s17 + $0x50] sm:$0xff] %v2584_v60  ;;  %v2595_v4 = vadd.f32 %v1295_v2, %v1074_v59  ;;  %v1998_v5 = vpop.f32.mrf.mxu0 }
 0x243   : > { %1342 = vst [vmem:[%s2587_s17] sm:$0xff] %v2591_v63  ;;  %v2599_v7 = vadd.f32 %v1998_v5, %v1053_v62  ;;  %v2006_v8 = vpop.f32.mrf.mxu1 }
 0x244   : > { %1350 = vst [vmem:[%s2587_s17 + $0x40] sm:$0xff] %v2595_v4  ;;  %v2603_v10 = vadd.f32 %v2006_v8, %v1085_v3  ;;  %v1266_v13 = vpop.f32.mrf.mxu0 }
 0x245   : > { %1345 = vst [vmem:[%s2587_s17 + $0x18] sm:$0xff] %v2599_v7  ;;  %v2607_v15 = vadd.f32 %v1266_v13, %v1045_v6  ;;  %v1298_v16 = vpop.f32.mrf.mxu1 }
 0x246   : > { %1353 = vst [vmem:[%s2587_s17 + $0x58] sm:$0xff] %v2603_v10  ;;  %v2611_v18 = vadd.f32 %v1298_v16, %v1077_v9  ;;  %v2001_v19 = vpop.f32.mrf.mxu0 }
 0x247   : > { %1343 = vst [vmem:[%s2587_s17 + $0x8] sm:$0xff] %v2607_v15  ;;  %v2615_v21 = vadd.f32 %v2001_v19, %v1066_v14  ;;  %v2009_v22 = vpop.f32.mrf.mxu1 }
 0x248   : > { %1351 = vst [vmem:[%s2587_s17 + $0x48] sm:$0xff] %v2611_v18  ;;  %v2619_v24 = vadd.f32 %v2009_v22, %v1098_v17  ;;  %v1279_v25 = vpop.f32.mrf.mxu0 }
 0x249   : > { %1348 = vst [vmem:[%s2587_s17 + $0x30] sm:$0xff] %v2615_v21  ;;  %v2624_v29 = vadd.f32 %v1279_v25, %v1058_v20  ;;  %v1311_v30 = vpop.f32.mrf.mxu1 }
 0x24a   : > { %1356 = vst [vmem:[%s2587_s17 + $0x70] sm:$0xff] %v2619_v24  ;;  %v2628_v32 = vadd.f32 %v1311_v30, %v1090_v23  ;;  %v2002_v35 = vpop.f32.mrf.mxu0 }
 0x24b   : > { %1346 = vst [vmem:[%s2587_s17 + $0x20] sm:$0xff] %v2624_v29  ;;  %v2634_v33 = vadd.f32 %v2002_v35, %v1069_v28  ;;  %v2010_v37 = vpop.f32.mrf.mxu1 }
 0x24c   : > { %1354 = vst [vmem:[%s2587_s17 + $0x60] sm:$0xff] %v2628_v32  ;;  %v2638_v39 = vadd.f32 %v2010_v37, %v1101_v31  ;;  %v1282_v40 = vpop.f32.mrf.mxu0  ;;  %1361 = sbr.rel (%p1858_p11) target bundleno = 610 (0x262), region = 82 }
 0x24d   : > { %1349 = vst [vmem:[%s2587_s17 + $0x38] sm:$0xff] %v2634_v33  ;;  %v2642_v43 = vadd.f32 %v1282_v40, %v1061_v36  ;;  %v1314_v44 = vpop.f32.mrf.mxu1 }
 0x24e   : > { %1357 = vst [vmem:[%s2587_s17 + $0x78] sm:$0xff] %v2638_v39  ;;  %v2646_v45 = vadd.f32 %v1314_v44, %v1093_v38 }
 0x24f   : > { %1347 = vst [vmem:[%s2587_s17 + $0x28] sm:$0xff] %v2642_v43 }
 0x250   : > { %1355 = vst [vmem:[%s2587_s17 + $0x68] sm:$0xff] %v2646_v45 }
 0x251   : > { %vm1362_vm0 = vcmask 7168   ;;  %v2140_v34 = vmov 0.0  }
 0x252   : > { %1363 = vst.msk [vmem:[%s3096_s6] sm:$0xff] %vm1362_vm0, %v2140_v34  ;;  %1364 = vst.msk [vmem:[%s3096_s6 + $0x8] sm:$0xff] %vm1362_vm0, %v2140_v34 }
 0x253   : > { %1365 = vst.msk [vmem:[%s3096_s6 + $0x10] sm:$0xff] %vm1362_vm0, %v2140_v34  ;;  %1366 = vst.msk [vmem:[%s3096_s6 + $0x18] sm:$0xff] %vm1362_vm0, %v2140_v34 }
 0x254   : > { %1367 = vst.msk [vmem:[%s3096_s6 + $0x20] sm:$0xff] %vm1362_vm0, %v2140_v34  ;;  %1368 = vst.msk [vmem:[%s3096_s6 + $0x28] sm:$0xff] %vm1362_vm0, %v2140_v34 }
 0x255   : > { %1369 = vst.msk [vmem:[%s3096_s6 + $0x30] sm:$0xff] %vm1362_vm0, %v2140_v34  ;;  %1370 = vst.msk [vmem:[%s3096_s6 + $0x38] sm:$0xff] %vm1362_vm0, %v2140_v34 }
 0x256   : > { %1371 = vst.msk [vmem:[%s3096_s6 + $0x40] sm:$0xff] %vm1362_vm0, %v2140_v34  ;;  %1372 = vst.msk [vmem:[%s3096_s6 + $0x48] sm:$0xff] %vm1362_vm0, %v2140_v34 }
 0x257   : > { %1373 = vst.msk [vmem:[%s3096_s6 + $0x50] sm:$0xff] %vm1362_vm0, %v2140_v34  ;;  %1374 = vst.msk [vmem:[%s3096_s6 + $0x58] sm:$0xff] %vm1362_vm0, %v2140_v34 }
 0x258   : > { %1375 = vst.msk [vmem:[%s3096_s6 + $0x60] sm:$0xff] %vm1362_vm0, %v2140_v34  ;;  %1376 = vst.msk [vmem:[%s3096_s6 + $0x68] sm:$0xff] %vm1362_vm0, %v2140_v34 }
 0x259   : > { %1377 = vst.msk [vmem:[%s3096_s6 + $0x70] sm:$0xff] %vm1362_vm0, %v2140_v34  ;;  %1378 = vst.msk [vmem:[%s3096_s6 + $0x78] sm:$0xff] %vm1362_vm0, %v2140_v34 }
 0x25a   : > { %1379 = vst.msk [vmem:[%s3097_s7] sm:$0xff] %vm1362_vm0, %v2140_v34  ;;  %1380 = vst.msk [vmem:[%s3097_s7 + $0x8] sm:$0xff] %vm1362_vm0, %v2140_v34 }
 0x25b   : > { %1381 = vst.msk [vmem:[%s3097_s7 + $0x10] sm:$0xff] %vm1362_vm0, %v2140_v34  ;;  %1382 = vst.msk [vmem:[%s3097_s7 + $0x18] sm:$0xff] %vm1362_vm0, %v2140_v34 }
 0x25c   : > { %1383 = vst.msk [vmem:[%s3097_s7 + $0x20] sm:$0xff] %vm1362_vm0, %v2140_v34  ;;  %1384 = vst.msk [vmem:[%s3097_s7 + $0x28] sm:$0xff] %vm1362_vm0, %v2140_v34 }
 0x25d   : > { %1385 = vst.msk [vmem:[%s3097_s7 + $0x30] sm:$0xff] %vm1362_vm0, %v2140_v34  ;;  %1386 = vst.msk [vmem:[%s3097_s7 + $0x38] sm:$0xff] %vm1362_vm0, %v2140_v34 }
 0x25e   : > { %1387 = vst.msk [vmem:[%s3097_s7 + $0x40] sm:$0xff] %vm1362_vm0, %v2140_v34  ;;  %1388 = vst.msk [vmem:[%s3097_s7 + $0x48] sm:$0xff] %vm1362_vm0, %v2140_v34 }
 0x25f   : > { %1389 = vst.msk [vmem:[%s3097_s7 + $0x50] sm:$0xff] %vm1362_vm0, %v2140_v34  ;;  %1390 = vst.msk [vmem:[%s3097_s7 + $0x58] sm:$0xff] %vm1362_vm0, %v2140_v34 }
 0x260   : > { %1391 = vst.msk [vmem:[%s3097_s7 + $0x60] sm:$0xff] %vm1362_vm0, %v2140_v34  ;;  %1392 = vst.msk [vmem:[%s3097_s7 + $0x68] sm:$0xff] %vm1362_vm0, %v2140_v34 }
 0x261   : > { %1393 = vst.msk [vmem:[%s3097_s7 + $0x70] sm:$0xff] %vm1362_vm0, %v2140_v34  ;;  %1394 = vst.msk [vmem:[%s3097_s7 + $0x78] sm:$0xff] %vm1362_vm0, %v2140_v34 }
 0x262 PF: > { %1415 = vadd.xlane.f32.xlu1 %v2582_v56  ;;  %1411 = vadd.xlane.f32.xlu0 %v2591_v63  ;;  %v1493_v46 = vmul.f32 %v2607_v15, %v2607_v15  ;;  %v1492_v47 = vmul.f32 %v2591_v63, %v2591_v63  ;;  %v1495_v48 = vmul.f32 %v2599_v7, %v2599_v7  ;;  %v1397_v42 = vld [vmem:[%s3096_s6 + $0x10] sm:$0xff]  ;;  %v1395_v54 = vld [vmem:[%s3096_s6] sm:$0xff]  ;;  %vm1459_vm1 = vcmask 7168   ;;  %v1396_v61 = vld [vmem:[%s3096_s6 + $0x8] sm:$0xff]  ;;  %s1860_s19 = sshll.u32 (%p2216_p6), %s2127_s26, 3 }
 0x263   : > { %v1494_v49 = vmul.f32 %v2582_v56, %v2582_v56  ;;  %v1497_v50 = vmul.f32 %v2642_v43, %v2642_v43  ;;  %v1496_v51 = vmul.f32 %v2624_v29, %v2624_v29  ;;  %v1499_v52 = vmul.f32 %v2634_v33, %v2634_v33  ;;  %v1399_v5 = vld [vmem:[%s3096_s6 + $0x20] sm:$0xff]  ;;  %v1401_v13 = vld [vmem:[%s3096_s6 + $0x30] sm:$0xff]  ;;  %s1593_s30 = scalar_lea.vmem (%p2216_p6), %s3095_s5, %s1860_s19 }
 0x264   : > { %v1498_v53 = vmul.f32 %v2615_v21, %v2615_v21  ;;  %v1501_v0 = vmul.f32 %v2611_v18, %v2611_v18  ;;  %v1500_v57 = vmul.f32 %v2595_v4, %v2595_v4  ;;  %v1503_v1 = vmul.f32 %v2603_v10, %v2603_v10  ;;  %v1403_v19 = vld [vmem:[%s3096_s6 + $0x40] sm:$0xff]  ;;  %v1405_v25 = vld [vmem:[%s3096_s6 + $0x50] sm:$0xff] }
 0x265   : > { %v1502_v11 = vmul.f32 %v2584_v60, %v2584_v60  ;;  %v1505_v12 = vmul.f32 %v2646_v45, %v2646_v45  ;;  %v1504_v26 = vmul.f32 %v2628_v32, %v2628_v32  ;;  %v1507_v27 = vmul.f32 %v2638_v39, %v2638_v39  ;;  %v1407_v35 = vld [vmem:[%s3096_s6 + $0x60] sm:$0xff]  ;;  %v1409_v40 = vld [vmem:[%s3096_s6 + $0x70] sm:$0xff] }
 0x266   : > { %1417 = vadd.xlane.f32.xlu1 %v2599_v7  ;;  %1413 = vadd.xlane.f32.xlu0 %v2607_v15  ;;  %v1506_v41 = vmul.f32 %v2619_v24, %v2619_v24 }
 0x26a   : > { %1421 = vadd.xlane.f32.xlu1 %v2642_v43  ;;  %1419 = vadd.xlane.f32.xlu0 %v2624_v29 }
 0x26e   : > { %1425 = vadd.xlane.f32.xlu1 %v2634_v33  ;;  %1423 = vadd.xlane.f32.xlu0 %v2615_v21 }
 0x272   : > { %1429 = vadd.xlane.f32.xlu1 %v2611_v18  ;;  %1427 = vadd.xlane.f32.xlu0 %v2595_v4  ;;  %v1400_v4 = vld [vmem:[%s3096_s6 + $0x28] sm:$0xff] }
 0x273   : > { %v1404_v18 = vld [vmem:[%s3096_s6 + $0x48] sm:$0xff] }
 0x276   : > { %1433 = vadd.xlane.f32.xlu1 %v2603_v10  ;;  %1431 = vadd.xlane.f32.xlu0 %v2584_v60  ;;  %v1398_v60 = vld [vmem:[%s3096_s6 + $0x18] sm:$0xff] }
 0x277   : > { %v1402_v10 = vld [vmem:[%s3096_s6 + $0x38] sm:$0xff] }
 0x27a   : > { %1437 = vadd.xlane.f32.xlu1 %v2646_v45  ;;  %1435 = vadd.xlane.f32.xlu0 %v2628_v32  ;;  %v1408_v32 = vld [vmem:[%s3096_s6 + $0x68] sm:$0xff] }
 0x27e   : > { %1441 = vadd.xlane.f32.xlu1 %v2638_v39  ;;  %1439 = vadd.xlane.f32.xlu0 %v2619_v24  ;;  %v1406_v24 = vld [vmem:[%s3096_s6 + $0x58] sm:$0xff] }
 0x27f   : > { %v1410_v39 = vld [vmem:[%s3096_s6 + $0x78] sm:$0xff] }
 0x282   : > { %1510 = vadd.xlane.f32.xlu1 %v1493_v46  ;;  %1508 = vadd.xlane.f32.xlu0 %v1492_v47  ;;  %v1477_v46 = vld [vmem:[%s3097_s7 + $0x8] sm:$0xff]  ;;  %v1476_v47 = vld [vmem:[%s3097_s7] sm:$0xff] }
 0x286   : > { %1514 = vadd.xlane.f32.xlu1 %v1495_v48  ;;  %1512 = vadd.xlane.f32.xlu0 %v1494_v49 }
 0x28a   : > { %1518 = vadd.xlane.f32.xlu1 %v1497_v50  ;;  %1516 = vadd.xlane.f32.xlu0 %v1496_v51 }
 0x28e   : > { %1522 = vadd.xlane.f32.xlu1 %v1499_v52  ;;  %1520 = vadd.xlane.f32.xlu0 %v1498_v53  ;;  %v1479_v52 = vld [vmem:[%s3097_s7 + $0x18] sm:$0xff]  ;;  %v1478_v53 = vld [vmem:[%s3097_s7 + $0x10] sm:$0xff] }
 0x292   : > { %1526 = vadd.xlane.f32.xlu1 %v1501_v0  ;;  %1524 = vadd.xlane.f32.xlu0 %v1500_v57 }
 0x296   : > { %1530 = vadd.xlane.f32.xlu1 %v1503_v1  ;;  %1528 = vadd.xlane.f32.xlu0 %v1502_v11 }
 0x29a   : > { %1534 = vadd.xlane.f32.xlu1 %v1505_v12  ;;  %1532 = vadd.xlane.f32.xlu0 %v1504_v26  ;;  %v1481_v12 = vld [vmem:[%s3097_s7 + $0x28] sm:$0xff]  ;;  %v1480_v26 = vld [vmem:[%s3097_s7 + $0x20] sm:$0xff] }
 0x29e   : > { %1538 = vadd.xlane.f32.xlu1 %v1507_v27  ;;  %1536 = vadd.xlane.f32.xlu0 %v1506_v41 }
 0x2eb   : > { %v1416_v55 = vpop.xlane.xlu1 %1415  ;;  %v1412_v56 = vpop.xlane.xlu0 %1411 }
 0x2ec   : > { %v1445_v58 = vadd.f32 %v1416_v55, %v1397_v42  ;;  %v1443_v59 = vadd.f32 %v1412_v56, %v1395_v54  ;;  %v1483_v55 = vld [vmem:[%s3097_s7 + $0x38] sm:$0xff]  ;;  %v1482_v56 = vld [vmem:[%s3097_s7 + $0x30] sm:$0xff] }
 0x2ee   : > { %1462 = vst.msk [vmem:[%s3096_s6 + $0x10] sm:$0xff] %vm1459_vm1, %v1445_v58  ;;  %1460 = vst.msk [vmem:[%s3096_s6] sm:$0xff] %vm1459_vm1, %v1443_v59 }
 0x2ef   : > { %v1418_v62 = vpop.xlane.xlu1 %1417  ;;  %v1414_v63 = vpop.xlane.xlu0 %1413 }
 0x2f0   : > { %v1446_v2 = vadd.f32 %v1418_v62, %v1398_v60  ;;  %v1444_v3 = vadd.f32 %v1414_v63, %v1396_v61  ;;  %v1485_v62 = vld [vmem:[%s3097_s7 + $0x48] sm:$0xff]  ;;  %v1484_v63 = vld [vmem:[%s3097_s7 + $0x40] sm:$0xff] }
 0x2f2   : > { %1463 = vst.msk [vmem:[%s3096_s6 + $0x18] sm:$0xff] %vm1459_vm1, %v1446_v2  ;;  %1461 = vst.msk [vmem:[%s3096_s6 + $0x8] sm:$0xff] %vm1459_vm1, %v1444_v3 }
 0x2f3   : > { %v1422_v6 = vpop.xlane.xlu1 %1421  ;;  %v1420_v7 = vpop.xlane.xlu0 %1419 }
 0x2f4   : > { %v1448_v8 = vadd.f32 %v1422_v6, %v1400_v4  ;;  %v1447_v9 = vadd.f32 %v1420_v7, %v1399_v5  ;;  %v1487_v6 = vld [vmem:[%s3097_s7 + $0x58] sm:$0xff]  ;;  %v1486_v7 = vld [vmem:[%s3097_s7 + $0x50] sm:$0xff] }
 0x2f6   : > { %1465 = vst.msk [vmem:[%s3096_s6 + $0x28] sm:$0xff] %vm1459_vm1, %v1448_v8  ;;  %1464 = vst.msk [vmem:[%s3096_s6 + $0x20] sm:$0xff] %vm1459_vm1, %v1447_v9 }
 0x2f7   : > { %v1426_v14 = vpop.xlane.xlu1 %1425  ;;  %v1424_v15 = vpop.xlane.xlu0 %1423 }
 0x2f8   : > { %v1450_v16 = vadd.f32 %v1426_v14, %v1402_v10  ;;  %v1449_v17 = vadd.f32 %v1424_v15, %v1401_v13  ;;  %v1489_v14 = vld [vmem:[%s3097_s7 + $0x68] sm:$0xff]  ;;  %v1488_v15 = vld [vmem:[%s3097_s7 + $0x60] sm:$0xff] }
 0x2fa   : > { %1467 = vst.msk [vmem:[%s3096_s6 + $0x38] sm:$0xff] %vm1459_vm1, %v1450_v16  ;;  %1466 = vst.msk [vmem:[%s3096_s6 + $0x30] sm:$0xff] %vm1459_vm1, %v1449_v17 }
 0x2fb   : > { %v1430_v20 = vpop.xlane.xlu1 %1429  ;;  %v1428_v21 = vpop.xlane.xlu0 %1427 }
 0x2fc   : > { %v1452_v22 = vadd.f32 %v1430_v20, %v1404_v18  ;;  %v1451_v23 = vadd.f32 %v1428_v21, %v1403_v19  ;;  %v1491_v20 = vld [vmem:[%s3097_s7 + $0x78] sm:$0xff]  ;;  %v1490_v21 = vld [vmem:[%s3097_s7 + $0x70] sm:$0xff] }
 0x2fe   : > { %1469 = vst.msk [vmem:[%s3096_s6 + $0x48] sm:$0xff] %vm1459_vm1, %v1452_v22  ;;  %1468 = vst.msk [vmem:[%s3096_s6 + $0x40] sm:$0xff] %vm1459_vm1, %v1451_v23 }
 0x2ff   : > { %v1434_v28 = vpop.xlane.xlu1 %1433  ;;  %v1432_v29 = vpop.xlane.xlu0 %1431 }
 0x300   : > { %v1454_v30 = vadd.f32 %v1434_v28, %v1406_v24  ;;  %v1453_v31 = vadd.f32 %v1432_v29, %v1405_v25  ;;  %v1652_v28 = vld [vmem:[%s2587_s17] sm:$0xff] (%p2216_p6)  ;;  %v1654_v29 = vld [vmem:[%s2587_s17 + $0x8] sm:$0xff] (%p2216_p6) }
 0x301   : > { %1653 = vst [vmem:[%s1593_s30] sm:$0xff] (%p2216_p6), %v1652_v28  ;;  %1655 = vst [vmem:[%s1593_s30 + $0x10] sm:$0xff] (%p2216_p6), %v1654_v29 }
 0x302   : > { %1471 = vst.msk [vmem:[%s3096_s6 + $0x58] sm:$0xff] %vm1459_vm1, %v1454_v30  ;;  %1470 = vst.msk [vmem:[%s3096_s6 + $0x50] sm:$0xff] %vm1459_vm1, %v1453_v31  ;;  %v1656_v30 = vld [vmem:[%s2587_s17 + $0x10] sm:$0xff] (%p2216_p6)  ;;  %v1658_v31 = vld [vmem:[%s2587_s17 + $0x18] sm:$0xff] (%p2216_p6) }
 0x303   : > { %v1438_v36 = vpop.xlane.xlu1 %1437  ;;  %v1436_v33 = vpop.xlane.xlu0 %1435  ;;  %1657 = vst [vmem:[%s1593_s30 + $0x20] sm:$0xff] (%p2216_p6), %v1656_v30  ;;  %1659 = vst [vmem:[%s1593_s30 + $0x30] sm:$0xff] (%p2216_p6), %v1658_v31 }
 0x304   : > { %v1456_v37 = vadd.f32 %v1438_v36, %v1408_v32  ;;  %v1455_v38 = vadd.f32 %v1436_v33, %v1407_v35  ;;  %v1660_v32 = vld [vmem:[%s2587_s17 + $0x20] sm:$0xff] (%p2216_p6)  ;;  %v1662_v35 = vld [vmem:[%s2587_s17 + $0x28] sm:$0xff] (%p2216_p6)  ;;  %v1664_v36 = vld [vmem:[%s2587_s17 + $0x30] sm:$0xff] (%p2216_p6) }
 0x305   : > { %1661 = vst [vmem:[%s1593_s30 + $0x40] sm:$0xff] (%p2216_p6), %v1660_v32  ;;  %1663 = vst [vmem:[%s1593_s30 + $0x50] sm:$0xff] (%p2216_p6), %v1662_v35  ;;  %v1666_v33 = vld [vmem:[%s2587_s17 + $0x38] sm:$0xff] (%p2216_p6) }
 0x306   : > { %1473 = vst.msk [vmem:[%s3096_s6 + $0x68] sm:$0xff] %vm1459_vm1, %v1456_v37  ;;  %1472 = vst.msk [vmem:[%s3096_s6 + $0x60] sm:$0xff] %vm1459_vm1, %v1455_v38  ;;  %v1668_v37 = vld [vmem:[%s2587_s17 + $0x40] sm:$0xff] (%p2216_p6)  ;;  %v1670_v38 = vld [vmem:[%s2587_s17 + $0x48] sm:$0xff] (%p2216_p6) }
 0x307   : > { %v1442_v43 = vpop.xlane.xlu1 %1441  ;;  %v1440_v44 = vpop.xlane.xlu0 %1439  ;;  %1665 = vst [vmem:[%s1593_s30 + $0x60] sm:$0xff] (%p2216_p6), %v1664_v36  ;;  %1667 = vst [vmem:[%s1593_s30 + $0x70] sm:$0xff] (%p2216_p6), %v1666_v33 }
 0x308   : > { %v1458_v45 = vadd.f32 %v1442_v43, %v1410_v39  ;;  %v1457_v34 = vadd.f32 %v1440_v44, %v1409_v40  ;;  %1669 = vst [vmem:[%s1593_s30 + $0x80] sm:$0xff] (%p2216_p6), %v1668_v37  ;;  %v1672_v39 = vld [vmem:[%s2587_s17 + $0x50] sm:$0xff] (%p2216_p6)  ;;  %v1674_v40 = vld [vmem:[%s2587_s17 + $0x58] sm:$0xff] (%p2216_p6)  ;;  %1671 = vst [vmem:[%s1593_s30 + $0x90] sm:$0xff] (%p2216_p6), %v1670_v38 }
 0x309   : > { %1673 = vst [vmem:[%s1593_s30 + $0xa0] sm:$0xff] (%p2216_p6), %v1672_v39  ;;  %1675 = vst [vmem:[%s1593_s30 + $0xb0] sm:$0xff] (%p2216_p6), %v1674_v40  ;;  %v1676_v43 = vld [vmem:[%s2587_s17 + $0x60] sm:$0xff] (%p2216_p6)  ;;  %v1678_v44 = vld [vmem:[%s2587_s17 + $0x68] sm:$0xff] (%p2216_p6) }
 0x30a   : > { %1475 = vst.msk [vmem:[%s3096_s6 + $0x78] sm:$0xff] %vm1459_vm1, %v1458_v45  ;;  %1474 = vst.msk [vmem:[%s3096_s6 + $0x70] sm:$0xff] %vm1459_vm1, %v1457_v34  ;;  %v1680_v45 = vld [vmem:[%s2587_s17 + $0x70] sm:$0xff] (%p2216_p6)  ;;  %v1682_v34 = vld [vmem:[%s2587_s17 + $0x78] sm:$0xff] (%p2216_p6) }
 0x30b   : > { %v1511_v48 = vpop.xlane.xlu1 %1510  ;;  %v1509_v49 = vpop.xlane.xlu0 %1508  ;;  %1677 = vst [vmem:[%s1593_s30 + $0xc0] sm:$0xff] (%p2216_p6), %v1676_v43  ;;  %1679 = vst [vmem:[%s1593_s30 + $0xd0] sm:$0xff] (%p2216_p6), %v1678_v44 }
 0x30c   : > { %v1541_v50 = vadd.f32 %v1511_v48, %v1477_v46  ;;  %v1540_v51 = vadd.f32 %v1509_v49, %v1476_v47  ;;  %1681 = vst [vmem:[%s1593_s30 + $0xe0] sm:$0xff] (%p2216_p6), %v1680_v45  ;;  %1683 = vst [vmem:[%s1593_s30 + $0xf0] sm:$0xff] (%p2216_p6), %v1682_v34 }
 0x30e   : > { %1557 = vst.msk [vmem:[%s3097_s7 + $0x8] sm:$0xff] %vm1459_vm1, %v1541_v50  ;;  %1556 = vst.msk [vmem:[%s3097_s7] sm:$0xff] %vm1459_vm1, %v1540_v51 }
 0x30f   : > { %v1515_v0 = vpop.xlane.xlu1 %1514  ;;  %v1513_v57 = vpop.xlane.xlu0 %1512 }
 0x310   : > { %v1543_v1 = vadd.f32 %v1515_v0, %v1479_v52  ;;  %v1542_v11 = vadd.f32 %v1513_v57, %v1478_v53 }
 0x312   : > { %1559 = vst.msk [vmem:[%s3097_s7 + $0x18] sm:$0xff] %vm1459_vm1, %v1543_v1  ;;  %1558 = vst.msk [vmem:[%s3097_s7 + $0x10] sm:$0xff] %vm1459_vm1, %v1542_v11 }
 0x313   : > { %v1519_v27 = vpop.xlane.xlu1 %1518  ;;  %v1517_v41 = vpop.xlane.xlu0 %1516 }
 0x314   : > { %v1545_v42 = vadd.f32 %v1519_v27, %v1481_v12  ;;  %v1544_v54 = vadd.f32 %v1517_v41, %v1480_v26 }
 0x316   : > { %1561 = vst.msk [vmem:[%s3097_s7 + $0x28] sm:$0xff] %vm1459_vm1, %v1545_v42  ;;  %1560 = vst.msk [vmem:[%s3097_s7 + $0x20] sm:$0xff] %vm1459_vm1, %v1544_v54 }
 0x317   : > { %v1523_v58 = vpop.xlane.xlu1 %1522  ;;  %v1521_v59 = vpop.xlane.xlu0 %1520 }
 0x318   : > { %v1547_v60 = vadd.f32 %v1523_v58, %v1483_v55  ;;  %v1546_v61 = vadd.f32 %v1521_v59, %v1482_v56 }
 0x31a   : > { %1563 = vst.msk [vmem:[%s3097_s7 + $0x38] sm:$0xff] %vm1459_vm1, %v1547_v60  ;;  %1562 = vst.msk [vmem:[%s3097_s7 + $0x30] sm:$0xff] %vm1459_vm1, %v1546_v61 }
 0x31b   : > { %v1527_v2 = vpop.xlane.xlu1 %1526  ;;  %v1525_v3 = vpop.xlane.xlu0 %1524 }
 0x31c   : > { %v1549_v4 = vadd.f32 %v1527_v2, %v1485_v62  ;;  %v1548_v5 = vadd.f32 %v1525_v3, %v1484_v63 }
 0x31e   : > { %1565 = vst.msk [vmem:[%s3097_s7 + $0x48] sm:$0xff] %vm1459_vm1, %v1549_v4  ;;  %1564 = vst.msk [vmem:[%s3097_s7 + $0x40] sm:$0xff] %vm1459_vm1, %v1548_v5 }
 0x31f   : > { %v1531_v8 = vpop.xlane.xlu1 %1530  ;;  %v1529_v9 = vpop.xlane.xlu0 %1528 }
 0x320   : > { %v1551_v10 = vadd.f32 %v1531_v8, %v1487_v6  ;;  %v1550_v13 = vadd.f32 %v1529_v9, %v1486_v7 }
 0x322   : > { %1567 = vst.msk [vmem:[%s3097_s7 + $0x58] sm:$0xff] %vm1459_vm1, %v1551_v10  ;;  %1566 = vst.msk [vmem:[%s3097_s7 + $0x50] sm:$0xff] %vm1459_vm1, %v1550_v13 }
 0x323   : > { %v1535_v16 = vpop.xlane.xlu1 %1534  ;;  %v1533_v17 = vpop.xlane.xlu0 %1532 }
 0x324   : > { %v1553_v18 = vadd.f32 %v1535_v16, %v1489_v14  ;;  %v1552_v19 = vadd.f32 %v1533_v17, %v1488_v15 }
 0x326   : > { %1569 = vst.msk [vmem:[%s3097_s7 + $0x68] sm:$0xff] %vm1459_vm1, %v1553_v18  ;;  %1568 = vst.msk [vmem:[%s3097_s7 + $0x60] sm:$0xff] %vm1459_vm1, %v1552_v19  ;;  %1588 = sbr.rel (!%p2216_p6) target bundleno = 811 (0x32b), region = 86 }
 0x327   : > { %v1539_v22 = vpop.xlane.xlu1 %1538  ;;  %v1537_v23 = vpop.xlane.xlu0 %1536 }
 0x328   : > { %v1555_v24 = vadd.f32 %v1539_v22, %v1491_v20  ;;  %v1554_v25 = vadd.f32 %v1537_v23, %v1490_v21 }
 0x32a   : > { %1571 = vst.msk [vmem:[%s3097_s7 + $0x78] sm:$0xff] %vm1459_vm1, %v1555_v24  ;;  %1570 = vst.msk [vmem:[%s3097_s7 + $0x70] sm:$0xff] %vm1459_vm1, %v1554_v25 }
 0x32b PF: > { %s18_s28 = sadd.s32 1, %s2135_s28   ;;  %s3099_s24 = smov %s2123_s25 }
 0x32c   : > { %p15_p12 = scmp.ge.s32.totalorder %s18_s28, 4   ;;  %s3100_s25 = smov %s2221_s11 }
 0x32d   : > { %s3101_s26 = smov %s2131_s27  ;;  %s3102_s27 = smov %s3104_s29 }
 0x32e   :  { %17 = sbr.rel (!%p15_p12) target bundleno = 3 (0x3), region = 182 }

</bundles_post_ra>
